<compile_context>
chip_gen: v7x
topology: tpu7x:2x2x1
jax: 0.10.0
libtpu: 0.0.40
codegen_flags: <defaults>
</compile_context>

<pallas_src>
import jax
import jax.numpy as jnp
from jax import lax
from jax.experimental import pallas as pl
from jax.experimental.pallas import tpu as pltpu

INPUT_SIZE = 1
HIDDEN_SIZE = 50
NUM_LAYERS = 2
OUTPUT_SIZE = 1
HP = 128        # per-gate padded lane width (one full 128-lane group)
OUT_PAD = 128   # lane-padded fc output width (unmasked vst; wrapper slices back)


def lstm_kernel(xp_ref,    # (T+1, B_pad, 8*HP) f32: [l0 xproj+b0 | b1], g cols pre-scaled x2
                wbig_ref,  # (2*HP, 8*HP) bf16 fused [[Whh0, Wih1], [0, Whh1]], g cols x2
                wfc_ref,   # (HP, OUT_PAD) f32, zero-padded rows/cols
                bfc_ref,   # (1, OUT_PAD)  f32
                out_ref):  # (B_pad, OUT_PAD) f32
    S, B, _ = xp_ref.shape
    T = S - 1

    def hc_update(sig_half, c):
        # sig_half = sigmoid(gate pre-activations) for one layer, (B, 4*HP), f32.
        # g-gate columns were pre-scaled by 2 at pack time: tanh(x) = 2*sigmoid(2x) - 1.
        i_g = sig_half[:, 0 * HP:1 * HP]
        f_g = sig_half[:, 1 * HP:2 * HP]
        g_g = 2.0 * sig_half[:, 2 * HP:3 * HP] - 1.0
        o_g = sig_half[:, 3 * HP:4 * HP]
        c_new = f_g * c + i_g * g_g
        h_new = o_g * jnp.tanh(c_new)
        return h_new, c_new

    def fused_gates(xp_s, h0, h1):
        # Wavefront stage: one bf16 MXU matmul yields layer-0 gates for t=s (cols :4*HP)
        # and layer-1 gates for t=s-1 (cols 4*HP:) from [h0_{s-1} | h1_{s-2}].
        # xp_s already carries (x_s @ Wih0 + b0) in its first half and b1 in its second
        # half, so nothing else is added on the per-stage path.
        hcat = jnp.concatenate([h0, h1], axis=1).astype(jnp.bfloat16)      # (B, 2*HP)
        g_all = jnp.dot(hcat, wbig_ref[...],
                        preferred_element_type=jnp.float32) + xp_s         # (B, 8*HP) f32
        return jax.nn.sigmoid(g_all)                                       # one EUP dispatch

    zh = jnp.zeros((B, HP), jnp.float32)
    h0, c0, h1, c1 = zh, zh, zh, zh

    if T <= 64:
        # Full trace-time unroll: static offsets into xp_ref + cross-stage LLO visibility.
        for s in range(T + 1):
            if s == 0:
                # h0_{-1} = h1_{-2} = 0: the matmul contributes nothing; gates = xp_0.
                sig = jax.nn.sigmoid(xp_ref[0])
            else:
                sig = fused_gates(xp_ref[s], h0, h1)
            if s < T:
                h0, c0 = hc_update(sig[:, :4 * HP], c0)
            if s > 0:
                h1, c1 = hc_update(sig[:, 4 * HP:], c1)
    else:
        # Prologue: stage 0 has layer-0 work only (zero initial state -> gates = xp_0).
        sig = jax.nn.sigmoid(xp_ref[0])
        h0, c0 = hc_update(sig[:, :4 * HP], c0)

        def body(s, carry):
            h0, c0, h1, c1 = carry
            sig = fused_gates(xp_ref[s], h0, h1)
            h0, c0 = hc_update(sig[:, :4 * HP], c0)
            h1, c1 = hc_update(sig[:, 4 * HP:], c1)
            return h0, c0, h1, c1

        h0, c0, h1, c1 = lax.fori_loop(1, T, body, (h0, c0, h1, c1), unroll=8)

        # Epilogue: stage T has layer-1 work only.
        sig = fused_gates(xp_ref[T], h0, h1)
        h1, c1 = hc_update(sig[:, 4 * HP:], c1)

    # fc on the final top-layer hidden state (one-time, off the per-stage path; padded
    # rows/cols of wfc are zero so padded h1 lanes contribute nothing).
    out_ref[...] = (jnp.dot(h1, wfc_ref[...], preferred_element_type=jnp.float32)
                    + bfc_ref[...])


# ----------------------------------------------------------------------------- params

def init_raw_params(key, input_size=INPUT_SIZE, hidden_size=HIDDEN_SIZE,
                    output_size=OUTPUT_SIZE):
    """Deterministic synthetic params in PyTorch nn.LSTM / nn.Linear layout."""
    ks = jax.random.split(key, 10)
    H = hidden_size
    bound = 1.0 / jnp.sqrt(jnp.float32(H))

    def u(k, shape):
        return jax.random.uniform(k, shape, jnp.float32, -bound, bound)

    return dict(
        w_ih_l0=u(ks[0], (4 * H, input_size)),
        w_hh_l0=u(ks[1], (4 * H, H)),
        b_ih_l0=u(ks[2], (4 * H,)),
        b_hh_l0=u(ks[3], (4 * H,)),
        w_ih_l1=u(ks[4], (4 * H, H)),
        w_hh_l1=u(ks[5], (4 * H, H)),
        b_ih_l1=u(ks[6], (4 * H,)),
        b_hh_l1=u(ks[7], (4 * H,)),
        w_fc=u(ks[8], (output_size, H)),
        b_fc=u(ks[9], (output_size,)),
    )


def _pad_gate_cols(m, H):
    """(K, 4H) -> (K, 4*HP): PyTorch gate k [i,f,g,o] moves to cols [k*HP, k*HP+H); rest 0."""
    K = m.shape[0]
    out = jnp.zeros((K, 4 * HP), m.dtype)
    for k in range(4):
        out = out.at[:, k * HP:k * HP + H].set(m[:, k * H:(k + 1) * H])
    return out


def _pad_rows(m):
    """(H, N) -> (HP, N): zero-pad the contraction rows."""
    H, N = m.shape
    return jnp.zeros((HP, N), m.dtype).at[:H, :].set(m)


def _scale_g_cols(m):
    """Pre-scale the g-gate column block by 2 (tanh(x) = 2*sigmoid(2x) - 1 trick)."""
    return m.at[..., 2 * HP:3 * HP].multiply(2.0)


def pack_params(raw, hidden_size=HIDDEN_SIZE):
    """Transform PyTorch-layout params into the padded / fused / pre-scaled kernel layout."""
    H = hidden_size
    # layer-0 input projection (hoisted into the wrapper; stays f32)
    wih0 = _scale_g_cols(_pad_gate_cols(raw["w_ih_l0"].T, H))                       # (I, 4HP)
    b0 = _scale_g_cols(_pad_gate_cols((raw["b_ih_l0"] + raw["b_hh_l0"])[None], H))  # (1, 4HP)
    # fused wavefront weight: cols [:4HP] -> layer-0 gates at t=s (from h0 rows only);
    # cols [4HP:] -> layer-1 gates at t=s-1 (from [h0 | h1] rows).
    whh0 = _scale_g_cols(_pad_rows(_pad_gate_cols(raw["w_hh_l0"].T, H)))            # (HP, 4HP)
    wih1 = _scale_g_cols(_pad_rows(_pad_gate_cols(raw["w_ih_l1"].T, H)))            # (HP, 4HP)
    whh1 = _scale_g_cols(_pad_rows(_pad_gate_cols(raw["w_hh_l1"].T, H)))            # (HP, 4HP)
    top = jnp.concatenate([whh0, wih1], axis=1)                                     # h0 rows
    bot = jnp.concatenate([jnp.zeros_like(whh0), whh1], axis=1)                     # h1 rows
    w_big = jnp.concatenate([top, bot], axis=0).astype(jnp.bfloat16)                # (2HP, 8HP)
    b1 = _scale_g_cols(_pad_gate_cols((raw["b_ih_l1"] + raw["b_hh_l1"])[None], H))  # (1, 4HP)
    # fc (one-time matmul, kept f32; lane-padded output for an unmasked store)
    wfc = jnp.zeros((HP, OUT_PAD), jnp.float32).at[:H, :OUTPUT_SIZE].set(raw["w_fc"].T)
    bfc = jnp.zeros((1, OUT_PAD), jnp.float32).at[0, :OUTPUT_SIZE].set(raw["b_fc"])
    return dict(wih0=wih0, b0=b0, w_big=w_big, b1=b1, wfc=wfc, bfc=bfc)


def check_padding_invariants(params, hidden_size=HIDDEN_SIZE):
    """Padded h/c lanes stay exactly 0 only if every padded weight/bias entry is 0."""
    wb = params["w_big"].astype(jnp.float32)
    assert float(jnp.abs(wb[hidden_size:HP, :]).max()) == 0.0          # padded h0 rows
    assert float(jnp.abs(wb[HP + hidden_size:, :]).max()) == 0.0       # padded h1 rows
    for k in range(8):                                                 # padded gate cols
        assert float(jnp.abs(wb[:, k * HP + hidden_size:(k + 1) * HP]).max()) == 0.0
    for name in ("b0", "b1"):
        b = params[name]
        for k in range(4):
            assert float(jnp.abs(b[:, k * HP + hidden_size:(k + 1) * HP]).max()) == 0.0


# ----------------------------------------------------------------------------- wrapper

@jax.jit
def lstm_model_forward(x, params):
    """x: (B, T, I) batch_first, like PyTorch. Returns (B, OUTPUT_SIZE)."""
    B, T, _ = x.shape
    B_pad = max(8, ((B + 7) // 8) * 8)                 # f32 sublane tile is 8
    x_tm = jnp.transpose(x, (1, 0, 2)).astype(jnp.float32)             # (T, B, I)
    x_tm = jnp.pad(x_tm, ((0, 0), (0, B_pad - B), (0, 0)))             # (T, B_pad, I)

    # Hoisted layer-0 input projection (+ summed bias), off the serial recurrence.
    # TODO(synk): for long sequences, skip this (T, B, 4*HP) materialization and instead
    # pass raw x, computing xp_t = x_t * wih0 + b0 in-kernel (I=1 -> one VPU broadcast-mul)
    # behind a time-chunked grid (weights with constant index_map, h/c carried in scratch),
    # so v7x's 64 MiB VMEM / 32 MiB scoped default is never exceeded.
    xproj = jnp.einsum("tbi,ig->tbg", x_tm, params["wih0"]) + params["b0"]  # (T, B_pad, 4HP)

    # Stage-input buffer for the 2-layer wavefront (T+1 stages): first half = xproj
    # (zero at the epilogue stage T, which has no layer-0 work); second half = layer-1
    # bias b1, folded here once instead of broadcast+add on every step inside the kernel.
    l0 = jnp.concatenate([xproj, jnp.zeros((1, B_pad, 4 * HP), jnp.float32)], axis=0)
    l1 = jnp.broadcast_to(params["b1"], (T + 1, B_pad, 4 * HP))
    xp_full = jnp.concatenate([l0, l1], axis=-1)                        # (T+1, B_pad, 8HP)

    vmem = pl.BlockSpec(memory_space=pltpu.MemorySpace.VMEM)
    # Single program: at B=2/T=8 everything is <1 MiB resident and the recurrence is
    # strictly serial, so a grid would only add per-step overhead (see TODO above for
    # the large-T / large-B variants).
    out_pad = pl.pallas_call(
        lstm_kernel,
        out_shape=jax.ShapeDtypeStruct((B_pad, OUT_PAD), jnp.float32),
        in_specs=[vmem] * 4,
        out_specs=vmem,
    )(xp_full, params["w_big"], params["wfc"], params["bfc"])
    return out_pad[:B, :OUTPUT_SIZE]


# ----------------------------------------------------------------------------- reference

def lstm_reference(x, raw, hidden_size=HIDDEN_SIZE):
    """Pure-JAX mirror of the PyTorch module (unpadded, unfused) for correctness checking."""
    B, T, _ = x.shape
    H = hidden_size

    def cell(x_t, h, c, w_ih, w_hh, b_ih, b_hh):
        gates = x_t @ w_ih.T + h @ w_hh.T + b_ih + b_hh
        i = jax.nn.sigmoid(gates[:, 0 * H:1 * H])
        f = jax.nn.sigmoid(gates[:, 1 * H:2 * H])
        g = jnp.tanh(gates[:, 2 * H:3 * H])
        o = jax.nn.sigmoid(gates[:, 3 * H:4 * H])
        c = f * c + i * g
        h = o * jnp.tanh(c)
        return h, c

    h0 = c0 = h1 = c1 = jnp.zeros((B, H), jnp.float32)
    for t in range(T):
        x_t = x[:, t, :]
        h0, c0 = cell(x_t, h0, c0, raw["w_ih_l0"], raw["w_hh_l0"],
                      raw["b_ih_l0"], raw["b_hh_l0"])
        h1, c1 = cell(h0, h1, c1, raw["w_ih_l1"], raw["w_hh_l1"],
                      raw["b_ih_l1"], raw["b_hh_l1"])
    return h1 @ raw["w_fc"].T + raw["b_fc"][None, :]


if __name__ == "__main__":
    key = jax.random.PRNGKey(0)
    k_x, k_p = jax.random.split(key)

    batch, seq_len = 2, 8
    x = jax.random.normal(k_x, (batch, seq_len, INPUT_SIZE), jnp.float32)
    raw = init_raw_params(k_p)
    params = pack_params(raw)
    check_padding_invariants(params)

    out = lstm_model_forward(x, params)
    jax.block_until_ready(out)
    assert out.shape == (batch, OUTPUT_SIZE)

    ref = lstm_reference(x, raw)
    # tolerance covers bf16 MXU operands + the 2*sigmoid(2x)-1 tanh identity vs f32 reference
    assert jnp.allclose(out, ref, rtol=3e-2, atol=3e-2), (out, ref)
    print("KERNEL_OK")
</pallas_src>

<mosaic_0001>
module attributes {stable_mosaic.version = 11 : i64} {
  func.func @lstm_kernel(%arg0: memref<9x8x1024xf32, #tpu.memory_space<vmem>>, %arg1: memref<256x1024xbf16, #tpu.memory_space<vmem>>, %arg2: memref<128x128xf32, #tpu.memory_space<vmem>>, %arg3: memref<1x128xf32, #tpu.memory_space<vmem>>, %arg4: memref<8x128xf32, #tpu.memory_space<vmem>>) attributes {dimension_semantics = [], scalar_prefetch = 0 : i64, scratch_operands = 0 : i64, tpu.core_type = #tpu.core_type<tc>} {
    %cst = arith.constant 0.000000e+00 : f32
    %0 = vector.broadcast %cst : f32 to vector<8x128xf32>
    %c0 = arith.constant 0 : index
    %c0_0 = arith.constant 0 : index
    %c0_1 = arith.constant 0 : index
    %1 = vector.load %arg0[%c0, %c0_0, %c0_1] : memref<9x8x1024xf32, #tpu.memory_space<vmem>>, vector<1x8x1024xf32>
    %2 = vector.shape_cast %1 : vector<1x8x1024xf32> to vector<8x1024xf32>
    %3 = arith.negf %2 : vector<8x1024xf32>
    %4 = math.exp %3 : vector<8x1024xf32>
    %cst_2 = arith.constant 1.000000e+00 : f32
    %5 = vector.broadcast %cst_2 : f32 to vector<8x1024xf32>
    %6 = arith.addf %5, %4 : vector<8x1024xf32>
    %7 = arith.divf %5, %6 : vector<8x1024xf32>
    %8 = vector.extract_strided_slice %7 {offsets = [0, 0], sizes = [8, 512], strides = [1, 1]} : vector<8x1024xf32> to vector<8x512xf32>
    %9 = vector.extract_strided_slice %8 {offsets = [0, 0], sizes = [8, 128], strides = [1, 1]} : vector<8x512xf32> to vector<8x128xf32>
    %10 = vector.extract_strided_slice %8 {offsets = [0, 128], sizes = [8, 128], strides = [1, 1]} : vector<8x512xf32> to vector<8x128xf32>
    %11 = vector.extract_strided_slice %8 {offsets = [0, 256], sizes = [8, 128], strides = [1, 1]} : vector<8x512xf32> to vector<8x128xf32>
    %cst_3 = arith.constant 2.000000e+00 : f32
    %12 = vector.broadcast %cst_3 : f32 to vector<8x128xf32>
    %13 = arith.mulf %12, %11 : vector<8x128xf32>
    %cst_4 = arith.constant 1.000000e+00 : f32
    %14 = vector.broadcast %cst_4 : f32 to vector<8x128xf32>
    %15 = arith.subf %13, %14 : vector<8x128xf32>
    %16 = vector.extract_strided_slice %8 {offsets = [0, 384], sizes = [8, 128], strides = [1, 1]} : vector<8x512xf32> to vector<8x128xf32>
    %17 = arith.mulf %10, %0 : vector<8x128xf32>
    %18 = arith.mulf %9, %15 : vector<8x128xf32>
    %19 = arith.addf %17, %18 : vector<8x128xf32>
    %20 = math.tanh %19 : vector<8x128xf32>
    %21 = arith.mulf %16, %20 : vector<8x128xf32>
    %c1 = arith.constant 1 : index
    %c0_5 = arith.constant 0 : index
    %c0_6 = arith.constant 0 : index
    %22 = vector.load %arg0[%c1, %c0_5, %c0_6] : memref<9x8x1024xf32, #tpu.memory_space<vmem>>, vector<1x8x1024xf32>
    %23 = vector.shape_cast %22 : vector<1x8x1024xf32> to vector<8x1024xf32>
    %24 = tpu.concatenate %21, %0 in 1 : vector<8x128xf32>, vector<8x128xf32> -> vector<8x256xf32>
    %25 = arith.truncf %24 : vector<8x256xf32> to vector<8x256xbf16>
    %c0_7 = arith.constant 0 : index
    %c0_8 = arith.constant 0 : index
    %26 = vector.load %arg1[%c0_7, %c0_8] : memref<256x1024xbf16, #tpu.memory_space<vmem>>, vector<256x1024xbf16>
    %cst_9 = arith.constant dense<0.000000e+00> : vector<8x1024xf32>
    %27 = tpu.matmul %25, %26, %cst_9 {dimension_numbers = #tpu.dot_dimension_numbers<[1], [0], [0], [1], [0, 0, 1, 1], [], []>} : vector<8x256xbf16>, vector<256x1024xbf16>, vector<8x1024xf32> -> vector<8x1024xf32>
    %28 = arith.addf %27, %23 : vector<8x1024xf32>
    %29 = arith.negf %28 : vector<8x1024xf32>
    %30 = math.exp %29 : vector<8x1024xf32>
    %cst_10 = arith.constant 1.000000e+00 : f32
    %31 = vector.broadcast %cst_10 : f32 to vector<8x1024xf32>
    %32 = arith.addf %31, %30 : vector<8x1024xf32>
    %33 = arith.divf %31, %32 : vector<8x1024xf32>
    %34 = vector.extract_strided_slice %33 {offsets = [0, 0], sizes = [8, 512], strides = [1, 1]} : vector<8x1024xf32> to vector<8x512xf32>
    %35 = vector.extract_strided_slice %34 {offsets = [0, 0], sizes = [8, 128], strides = [1, 1]} : vector<8x512xf32> to vector<8x128xf32>
    %36 = vector.extract_strided_slice %34 {offsets = [0, 128], sizes = [8, 128], strides = [1, 1]} : vector<8x512xf32> to vector<8x128xf32>
    %37 = vector.extract_strided_slice %34 {offsets = [0, 256], sizes = [8, 128], strides = [1, 1]} : vector<8x512xf32> to vector<8x128xf32>
    %cst_11 = arith.constant 2.000000e+00 : f32
    %38 = vector.broadcast %cst_11 : f32 to vector<8x128xf32>
    %39 = arith.mulf %38, %37 : vector<8x128xf32>
    %cst_12 = arith.constant 1.000000e+00 : f32
    %40 = vector.broadcast %cst_12 : f32 to vector<8x128xf32>
    %41 = arith.subf %39, %40 : vector<8x128xf32>
    %42 = vector.extract_strided_slice %34 {offsets = [0, 384], sizes = [8, 128], strides = [1, 1]} : vector<8x512xf32> to vector<8x128xf32>
    %43 = arith.mulf %36, %19 : vector<8x128xf32>
    %44 = arith.mulf %35, %41 : vector<8x128xf32>
    %45 = arith.addf %43, %44 : vector<8x128xf32>
    %46 = math.tanh %45 : vector<8x128xf32>
    %47 = arith.mulf %42, %46 : vector<8x128xf32>
    %48 = vector.extract_strided_slice %33 {offsets = [0, 512], sizes = [8, 512], strides = [1, 1]} : vector<8x1024xf32> to vector<8x512xf32>
    %49 = vector.extract_strided_slice %48 {offsets = [0, 0], sizes = [8, 128], strides = [1, 1]} : vector<8x512xf32> to vector<8x128xf32>
    %50 = vector.extract_strided_slice %48 {offsets = [0, 128], sizes = [8, 128], strides = [1, 1]} : vector<8x512xf32> to vector<8x128xf32>
    %51 = vector.extract_strided_slice %48 {offsets = [0, 256], sizes = [8, 128], strides = [1, 1]} : vector<8x512xf32> to vector<8x128xf32>
    %cst_13 = arith.constant 2.000000e+00 : f32
    %52 = vector.broadcast %cst_13 : f32 to vector<8x128xf32>
    %53 = arith.mulf %52, %51 : vector<8x128xf32>
    %cst_14 = arith.constant 1.000000e+00 : f32
    %54 = vector.broadcast %cst_14 : f32 to vector<8x128xf32>
    %55 = arith.subf %53, %54 : vector<8x128xf32>
    %56 = vector.extract_strided_slice %48 {offsets = [0, 384], sizes = [8, 128], strides = [1, 1]} : vector<8x512xf32> to vector<8x128xf32>
    %57 = arith.mulf %50, %0 : vector<8x128xf32>
    %58 = arith.mulf %49, %55 : vector<8x128xf32>
    %59 = arith.addf %57, %58 : vector<8x128xf32>
    %60 = math.tanh %59 : vector<8x128xf32>
    %61 = arith.mulf %56, %60 : vector<8x128xf32>
    %c2 = arith.constant 2 : index
    %c0_15 = arith.constant 0 : index
    %c0_16 = arith.constant 0 : index
    %62 = vector.load %arg0[%c2, %c0_15, %c0_16] : memref<9x8x1024xf32, #tpu.memory_space<vmem>>, vector<1x8x1024xf32>
    %63 = vector.shape_cast %62 : vector<1x8x1024xf32> to vector<8x1024xf32>
    %64 = tpu.concatenate %47, %61 in 1 : vector<8x128xf32>, vector<8x128xf32> -> vector<8x256xf32>
    %65 = arith.truncf %64 : vector<8x256xf32> to vector<8x256xbf16>
    %c0_17 = arith.constant 0 : index
    %c0_18 = arith.constant 0 : index
    %66 = vector.load %arg1[%c0_17, %c0_18] : memref<256x1024xbf16, #tpu.memory_space<vmem>>, vector<256x1024xbf16>
    %cst_19 = arith.constant dense<0.000000e+00> : vector<8x1024xf32>
    %67 = tpu.matmul %65, %66, %cst_19 {dimension_numbers = #tpu.dot_dimension_numbers<[1], [0], [0], [1], [0, 0, 1, 1], [], []>} : vector<8x256xbf16>, vector<256x1024xbf16>, vector<8x1024xf32> -> vector<8x1024xf32>
    %68 = arith.addf %67, %63 : vector<8x1024xf32>
    %69 = arith.negf %68 : vector<8x1024xf32>
    %70 = math.exp %69 : vector<8x1024xf32>
    %cst_20 = arith.constant 1.000000e+00 : f32
    %71 = vector.broadcast %cst_20 : f32 to vector<8x1024xf32>
    %72 = arith.addf %71, %70 : vector<8x1024xf32>
    %73 = arith.divf %71, %72 : vector<8x1024xf32>
    %74 = vector.extract_strided_slice %73 {offsets = [0, 0], sizes = [8, 512], strides = [1, 1]} : vector<8x1024xf32> to vector<8x512xf32>
    %75 = vector.extract_strided_slice %74 {offsets = [0, 0], sizes = [8, 128], strides = [1, 1]} : vector<8x512xf32> to vector<8x128xf32>
    %76 = vector.extract_strided_slice %74 {offsets = [0, 128], sizes = [8, 128], strides = [1, 1]} : vector<8x512xf32> to vector<8x128xf32>
    %77 = vector.extract_strided_slice %74 {offsets = [0, 256], sizes = [8, 128], strides = [1, 1]} : vector<8x512xf32> to vector<8x128xf32>
    %cst_21 = arith.constant 2.000000e+00 : f32
    %78 = vector.broadcast %cst_21 : f32 to vector<8x128xf32>
    %79 = arith.mulf %78, %77 : vector<8x128xf32>
    %cst_22 = arith.constant 1.000000e+00 : f32
    %80 = vector.broadcast %cst_22 : f32 to vector<8x128xf32>
    %81 = arith.subf %79, %80 : vector<8x128xf32>
    %82 = vector.extract_strided_slice %74 {offsets = [0, 384], sizes = [8, 128], strides = [1, 1]} : vector<8x512xf32> to vector<8x128xf32>
    %83 = arith.mulf %76, %45 : vector<8x128xf32>
    %84 = arith.mulf %75, %81 : vector<8x128xf32>
    %85 = arith.addf %83, %84 : vector<8x128xf32>
    %86 = math.tanh %85 : vector<8x128xf32>
    %87 = arith.mulf %82, %86 : vector<8x128xf32>
    %88 = vector.extract_strided_slice %73 {offsets = [0, 512], sizes = [8, 512], strides = [1, 1]} : vector<8x1024xf32> to vector<8x512xf32>
    %89 = vector.extract_strided_slice %88 {offsets = [0, 0], sizes = [8, 128], strides = [1, 1]} : vector<8x512xf32> to vector<8x128xf32>
    %90 = vector.extract_strided_slice %88 {offsets = [0, 128], sizes = [8, 128], strides = [1, 1]} : vector<8x512xf32> to vector<8x128xf32>
    %91 = vector.extract_strided_slice %88 {offsets = [0, 256], sizes = [8, 128], strides = [1, 1]} : vector<8x512xf32> to vector<8x128xf32>
    %cst_23 = arith.constant 2.000000e+00 : f32
    %92 = vector.broadcast %cst_23 : f32 to vector<8x128xf32>
    %93 = arith.mulf %92, %91 : vector<8x128xf32>
    %cst_24 = arith.constant 1.000000e+00 : f32
    %94 = vector.broadcast %cst_24 : f32 to vector<8x128xf32>
    %95 = arith.subf %93, %94 : vector<8x128xf32>
    %96 = vector.extract_strided_slice %88 {offsets = [0, 384], sizes = [8, 128], strides = [1, 1]} : vector<8x512xf32> to vector<8x128xf32>
    %97 = arith.mulf %90, %59 : vector<8x128xf32>
    %98 = arith.mulf %89, %95 : vector<8x128xf32>
    %99 = arith.addf %97, %98 : vector<8x128xf32>
    %100 = math.tanh %99 : vector<8x128xf32>
    %101 = arith.mulf %96, %100 : vector<8x128xf32>
    %c3 = arith.constant 3 : index
    %c0_25 = arith.constant 0 : index
    %c0_26 = arith.constant 0 : index
    %102 = vector.load %arg0[%c3, %c0_25, %c0_26] : memref<9x8x1024xf32, #tpu.memory_space<vmem>>, vector<1x8x1024xf32>
    %103 = vector.shape_cast %102 : vector<1x8x1024xf32> to vector<8x1024xf32>
    %104 = tpu.concatenate %87, %101 in 1 : vector<8x128xf32>, vector<8x128xf32> -> vector<8x256xf32>
    %105 = arith.truncf %104 : vector<8x256xf32> to vector<8x256xbf16>
    %c0_27 = arith.constant 0 : index
    %c0_28 = arith.constant 0 : index
    %106 = vector.load %arg1[%c0_27, %c0_28] : memref<256x1024xbf16, #tpu.memory_space<vmem>>, vector<256x1024xbf16>
    %cst_29 = arith.constant dense<0.000000e+00> : vector<8x1024xf32>
    %107 = tpu.matmul %105, %106, %cst_29 {dimension_numbers = #tpu.dot_dimension_numbers<[1], [0], [0], [1], [0, 0, 1, 1], [], []>} : vector<8x256xbf16>, vector<256x1024xbf16>, vector<8x1024xf32> -> vector<8x1024xf32>
    %108 = arith.addf %107, %103 : vector<8x1024xf32>
    %109 = arith.negf %108 : vector<8x1024xf32>
    %110 = math.exp %109 : vector<8x1024xf32>
    %cst_30 = arith.constant 1.000000e+00 : f32
    %111 = vector.broadcast %cst_30 : f32 to vector<8x1024xf32>
    %112 = arith.addf %111, %110 : vector<8x1024xf32>
    %113 = arith.divf %111, %112 : vector<8x1024xf32>
    %114 = vector.extract_strided_slice %113 {offsets = [0, 0], sizes = [8, 512], strides = [1, 1]} : vector<8x1024xf32> to vector<8x512xf32>
    %115 = vector.extract_strided_slice %114 {offsets = [0, 0], sizes = [8, 128], strides = [1, 1]} : vector<8x512xf32> to vector<8x128xf32>
    %116 = vector.extract_strided_slice %114 {offsets = [0, 128], sizes = [8, 128], strides = [1, 1]} : vector<8x512xf32> to vector<8x128xf32>
    %117 = vector.extract_strided_slice %114 {offsets = [0, 256], sizes = [8, 128], strides = [1, 1]} : vector<8x512xf32> to vector<8x128xf32>
    %cst_31 = arith.constant 2.000000e+00 : f32
    %118 = vector.broadcast %cst_31 : f32 to vector<8x128xf32>
    %119 = arith.mulf %118, %117 : vector<8x128xf32>
    %cst_32 = arith.constant 1.000000e+00 : f32
    %120 = vector.broadcast %cst_32 : f32 to vector<8x128xf32>
    %121 = arith.subf %119, %120 : vector<8x128xf32>
    %122 = vector.extract_strided_slice %114 {offsets = [0, 384], sizes = [8, 128], strides = [1, 1]} : vector<8x512xf32> to vector<8x128xf32>
    %123 = arith.mulf %116, %85 : vector<8x128xf32>
    %124 = arith.mulf %115, %121 : vector<8x128xf32>
    %125 = arith.addf %123, %124 : vector<8x128xf32>
    %126 = math.tanh %125 : vector<8x128xf32>
    %127 = arith.mulf %122, %126 : vector<8x128xf32>
    %128 = vector.extract_strided_slice %113 {offsets = [0, 512], sizes = [8, 512], strides = [1, 1]} : vector<8x1024xf32> to vector<8x512xf32>
    %129 = vector.extract_strided_slice %128 {offsets = [0, 0], sizes = [8, 128], strides = [1, 1]} : vector<8x512xf32> to vector<8x128xf32>
    %130 = vector.extract_strided_slice %128 {offsets = [0, 128], sizes = [8, 128], strides = [1, 1]} : vector<8x512xf32> to vector<8x128xf32>
    %131 = vector.extract_strided_slice %128 {offsets = [0, 256], sizes = [8, 128], strides = [1, 1]} : vector<8x512xf32> to vector<8x128xf32>
    %cst_33 = arith.constant 2.000000e+00 : f32
    %132 = vector.broadcast %cst_33 : f32 to vector<8x128xf32>
    %133 = arith.mulf %132, %131 : vector<8x128xf32>
    %cst_34 = arith.constant 1.000000e+00 : f32
    %134 = vector.broadcast %cst_34 : f32 to vector<8x128xf32>
    %135 = arith.subf %133, %134 : vector<8x128xf32>
    %136 = vector.extract_strided_slice %128 {offsets = [0, 384], sizes = [8, 128], strides = [1, 1]} : vector<8x512xf32> to vector<8x128xf32>
    %137 = arith.mulf %130, %99 : vector<8x128xf32>
    %138 = arith.mulf %129, %135 : vector<8x128xf32>
    %139 = arith.addf %137, %138 : vector<8x128xf32>
    %140 = math.tanh %139 : vector<8x128xf32>
    %141 = arith.mulf %136, %140 : vector<8x128xf32>
    %c4 = arith.constant 4 : index
    %c0_35 = arith.constant 0 : index
    %c0_36 = arith.constant 0 : index
    %142 = vector.load %arg0[%c4, %c0_35, %c0_36] : memref<9x8x1024xf32, #tpu.memory_space<vmem>>, vector<1x8x1024xf32>
    %143 = vector.shape_cast %142 : vector<1x8x1024xf32> to vector<8x1024xf32>
    %144 = tpu.concatenate %127, %141 in 1 : vector<8x128xf32>, vector<8x128xf32> -> vector<8x256xf32>
    %145 = arith.truncf %144 : vector<8x256xf32> to vector<8x256xbf16>
    %c0_37 = arith.constant 0 : index
    %c0_38 = arith.constant 0 : index
    %146 = vector.load %arg1[%c0_37, %c0_38] : memref<256x1024xbf16, #tpu.memory_space<vmem>>, vector<256x1024xbf16>
    %cst_39 = arith.constant dense<0.000000e+00> : vector<8x1024xf32>
    %147 = tpu.matmul %145, %146, %cst_39 {dimension_numbers = #tpu.dot_dimension_numbers<[1], [0], [0], [1], [0, 0, 1, 1], [], []>} : vector<8x256xbf16>, vector<256x1024xbf16>, vector<8x1024xf32> -> vector<8x1024xf32>
    %148 = arith.addf %147, %143 : vector<8x1024xf32>
    %149 = arith.negf %148 : vector<8x1024xf32>
    %150 = math.exp %149 : vector<8x1024xf32>
    %cst_40 = arith.constant 1.000000e+00 : f32
    %151 = vector.broadcast %cst_40 : f32 to vector<8x1024xf32>
    %152 = arith.addf %151, %150 : vector<8x1024xf32>
    %153 = arith.divf %151, %152 : vector<8x1024xf32>
    %154 = vector.extract_strided_slice %153 {offsets = [0, 0], sizes = [8, 512], strides = [1, 1]} : vector<8x1024xf32> to vector<8x512xf32>
    %155 = vector.extract_strided_slice %154 {offsets = [0, 0], sizes = [8, 128], strides = [1, 1]} : vector<8x512xf32> to vector<8x128xf32>
    %156 = vector.extract_strided_slice %154 {offsets = [0, 128], sizes = [8, 128], strides = [1, 1]} : vector<8x512xf32> to vector<8x128xf32>
    %157 = vector.extract_strided_slice %154 {offsets = [0, 256], sizes = [8, 128], strides = [1, 1]} : vector<8x512xf32> to vector<8x128xf32>
    %cst_41 = arith.constant 2.000000e+00 : f32
    %158 = vector.broadcast %cst_41 : f32 to vector<8x128xf32>
    %159 = arith.mulf %158, %157 : vector<8x128xf32>
    %cst_42 = arith.constant 1.000000e+00 : f32
    %160 = vector.broadcast %cst_42 : f32 to vector<8x128xf32>
    %161 = arith.subf %159, %160 : vector<8x128xf32>
    %162 = vector.extract_strided_slice %154 {offsets = [0, 384], sizes = [8, 128], strides = [1, 1]} : vector<8x512xf32> to vector<8x128xf32>
    %163 = arith.mulf %156, %125 : vector<8x128xf32>
    %164 = arith.mulf %155, %161 : vector<8x128xf32>
    %165 = arith.addf %163, %164 : vector<8x128xf32>
    %166 = math.tanh %165 : vector<8x128xf32>
    %167 = arith.mulf %162, %166 : vector<8x128xf32>
    %168 = vector.extract_strided_slice %153 {offsets = [0, 512], sizes = [8, 512], strides = [1, 1]} : vector<8x1024xf32> to vector<8x512xf32>
    %169 = vector.extract_strided_slice %168 {offsets = [0, 0], sizes = [8, 128], strides = [1, 1]} : vector<8x512xf32> to vector<8x128xf32>
    %170 = vector.extract_strided_slice %168 {offsets = [0, 128], sizes = [8, 128], strides = [1, 1]} : vector<8x512xf32> to vector<8x128xf32>
    %171 = vector.extract_strided_slice %168 {offsets = [0, 256], sizes = [8, 128], strides = [1, 1]} : vector<8x512xf32> to vector<8x128xf32>
    %cst_43 = arith.constant 2.000000e+00 : f32
    %172 = vector.broadcast %cst_43 : f32 to vector<8x128xf32>
    %173 = arith.mulf %172, %171 : vector<8x128xf32>
    %cst_44 = arith.constant 1.000000e+00 : f32
    %174 = vector.broadcast %cst_44 : f32 to vector<8x128xf32>
    %175 = arith.subf %173, %174 : vector<8x128xf32>
    %176 = vector.extract_strided_slice %168 {offsets = [0, 384], sizes = [8, 128], strides = [1, 1]} : vector<8x512xf32> to vector<8x128xf32>
    %177 = arith.mulf %170, %139 : vector<8x128xf32>
    %178 = arith.mulf %169, %175 : vector<8x128xf32>
    %179 = arith.addf %177, %178 : vector<8x128xf32>
    %180 = math.tanh %179 : vector<8x128xf32>
    %181 = arith.mulf %176, %180 : vector<8x128xf32>
    %c5 = arith.constant 5 : index
    %c0_45 = arith.constant 0 : index
    %c0_46 = arith.constant 0 : index
    %182 = vector.load %arg0[%c5, %c0_45, %c0_46] : memref<9x8x1024xf32, #tpu.memory_space<vmem>>, vector<1x8x1024xf32>
    %183 = vector.shape_cast %182 : vector<1x8x1024xf32> to vector<8x1024xf32>
    %184 = tpu.concatenate %167, %181 in 1 : vector<8x128xf32>, vector<8x128xf32> -> vector<8x256xf32>
    %185 = arith.truncf %184 : vector<8x256xf32> to vector<8x256xbf16>
    %c0_47 = arith.constant 0 : index
    %c0_48 = arith.constant 0 : index
    %186 = vector.load %arg1[%c0_47, %c0_48] : memref<256x1024xbf16, #tpu.memory_space<vmem>>, vector<256x1024xbf16>
    %cst_49 = arith.constant dense<0.000000e+00> : vector<8x1024xf32>
    %187 = tpu.matmul %185, %186, %cst_49 {dimension_numbers = #tpu.dot_dimension_numbers<[1], [0], [0], [1], [0, 0, 1, 1], [], []>} : vector<8x256xbf16>, vector<256x1024xbf16>, vector<8x1024xf32> -> vector<8x1024xf32>
    %188 = arith.addf %187, %183 : vector<8x1024xf32>
    %189 = arith.negf %188 : vector<8x1024xf32>
    %190 = math.exp %189 : vector<8x1024xf32>
    %cst_50 = arith.constant 1.000000e+00 : f32
    %191 = vector.broadcast %cst_50 : f32 to vector<8x1024xf32>
    %192 = arith.addf %191, %190 : vector<8x1024xf32>
    %193 = arith.divf %191, %192 : vector<8x1024xf32>
    %194 = vector.extract_strided_slice %193 {offsets = [0, 0], sizes = [8, 512], strides = [1, 1]} : vector<8x1024xf32> to vector<8x512xf32>
    %195 = vector.extract_strided_slice %194 {offsets = [0, 0], sizes = [8, 128], strides = [1, 1]} : vector<8x512xf32> to vector<8x128xf32>
    %196 = vector.extract_strided_slice %194 {offsets = [0, 128], sizes = [8, 128], strides = [1, 1]} : vector<8x512xf32> to vector<8x128xf32>
    %197 = vector.extract_strided_slice %194 {offsets = [0, 256], sizes = [8, 128], strides = [1, 1]} : vector<8x512xf32> to vector<8x128xf32>
    %cst_51 = arith.constant 2.000000e+00 : f32
    %198 = vector.broadcast %cst_51 : f32 to vector<8x128xf32>
    %199 = arith.mulf %198, %197 : vector<8x128xf32>
    %cst_52 = arith.constant 1.000000e+00 : f32
    %200 = vector.broadcast %cst_52 : f32 to vector<8x128xf32>
    %201 = arith.subf %199, %200 : vector<8x128xf32>
    %202 = vector.extract_strided_slice %194 {offsets = [0, 384], sizes = [8, 128], strides = [1, 1]} : vector<8x512xf32> to vector<8x128xf32>
    %203 = arith.mulf %196, %165 : vector<8x128xf32>
    %204 = arith.mulf %195, %201 : vector<8x128xf32>
    %205 = arith.addf %203, %204 : vector<8x128xf32>
    %206 = math.tanh %205 : vector<8x128xf32>
    %207 = arith.mulf %202, %206 : vector<8x128xf32>
    %208 = vector.extract_strided_slice %193 {offsets = [0, 512], sizes = [8, 512], strides = [1, 1]} : vector<8x1024xf32> to vector<8x512xf32>
    %209 = vector.extract_strided_slice %208 {offsets = [0, 0], sizes = [8, 128], strides = [1, 1]} : vector<8x512xf32> to vector<8x128xf32>
    %210 = vector.extract_strided_slice %208 {offsets = [0, 128], sizes = [8, 128], strides = [1, 1]} : vector<8x512xf32> to vector<8x128xf32>
    %211 = vector.extract_strided_slice %208 {offsets = [0, 256], sizes = [8, 128], strides = [1, 1]} : vector<8x512xf32> to vector<8x128xf32>
    %cst_53 = arith.constant 2.000000e+00 : f32
    %212 = vector.broadcast %cst_53 : f32 to vector<8x128xf32>
    %213 = arith.mulf %212, %211 : vector<8x128xf32>
    %cst_54 = arith.constant 1.000000e+00 : f32
    %214 = vector.broadcast %cst_54 : f32 to vector<8x128xf32>
    %215 = arith.subf %213, %214 : vector<8x128xf32>
    %216 = vector.extract_strided_slice %208 {offsets = [0, 384], sizes = [8, 128], strides = [1, 1]} : vector<8x512xf32> to vector<8x128xf32>
    %217 = arith.mulf %210, %179 : vector<8x128xf32>
    %218 = arith.mulf %209, %215 : vector<8x128xf32>
    %219 = arith.addf %217, %218 : vector<8x128xf32>
    %220 = math.tanh %219 : vector<8x128xf32>
    %221 = arith.mulf %216, %220 : vector<8x128xf32>
    %c6 = arith.constant 6 : index
    %c0_55 = arith.constant 0 : index
    %c0_56 = arith.constant 0 : index
    %222 = vector.load %arg0[%c6, %c0_55, %c0_56] : memref<9x8x1024xf32, #tpu.memory_space<vmem>>, vector<1x8x1024xf32>
    %223 = vector.shape_cast %222 : vector<1x8x1024xf32> to vector<8x1024xf32>
    %224 = tpu.concatenate %207, %221 in 1 : vector<8x128xf32>, vector<8x128xf32> -> vector<8x256xf32>
    %225 = arith.truncf %224 : vector<8x256xf32> to vector<8x256xbf16>
    %c0_57 = arith.constant 0 : index
    %c0_58 = arith.constant 0 : index
    %226 = vector.load %arg1[%c0_57, %c0_58] : memref<256x1024xbf16, #tpu.memory_space<vmem>>, vector<256x1024xbf16>
    %cst_59 = arith.constant dense<0.000000e+00> : vector<8x1024xf32>
    %227 = tpu.matmul %225, %226, %cst_59 {dimension_numbers = #tpu.dot_dimension_numbers<[1], [0], [0], [1], [0, 0, 1, 1], [], []>} : vector<8x256xbf16>, vector<256x1024xbf16>, vector<8x1024xf32> -> vector<8x1024xf32>
    %228 = arith.addf %227, %223 : vector<8x1024xf32>
    %229 = arith.negf %228 : vector<8x1024xf32>
    %230 = math.exp %229 : vector<8x1024xf32>
    %cst_60 = arith.constant 1.000000e+00 : f32
    %231 = vector.broadcast %cst_60 : f32 to vector<8x1024xf32>
    %232 = arith.addf %231, %230 : vector<8x1024xf32>
    %233 = arith.divf %231, %232 : vector<8x1024xf32>
    %234 = vector.extract_strided_slice %233 {offsets = [0, 0], sizes = [8, 512], strides = [1, 1]} : vector<8x1024xf32> to vector<8x512xf32>
    %235 = vector.extract_strided_slice %234 {offsets = [0, 0], sizes = [8, 128], strides = [1, 1]} : vector<8x512xf32> to vector<8x128xf32>
    %236 = vector.extract_strided_slice %234 {offsets = [0, 128], sizes = [8, 128], strides = [1, 1]} : vector<8x512xf32> to vector<8x128xf32>
    %237 = vector.extract_strided_slice %234 {offsets = [0, 256], sizes = [8, 128], strides = [1, 1]} : vector<8x512xf32> to vector<8x128xf32>
    %cst_61 = arith.constant 2.000000e+00 : f32
    %238 = vector.broadcast %cst_61 : f32 to vector<8x128xf32>
    %239 = arith.mulf %238, %237 : vector<8x128xf32>
    %cst_62 = arith.constant 1.000000e+00 : f32
    %240 = vector.broadcast %cst_62 : f32 to vector<8x128xf32>
    %241 = arith.subf %239, %240 : vector<8x128xf32>
    %242 = vector.extract_strided_slice %234 {offsets = [0, 384], sizes = [8, 128], strides = [1, 1]} : vector<8x512xf32> to vector<8x128xf32>
    %243 = arith.mulf %236, %205 : vector<8x128xf32>
    %244 = arith.mulf %235, %241 : vector<8x128xf32>
    %245 = arith.addf %243, %244 : vector<8x128xf32>
    %246 = math.tanh %245 : vector<8x128xf32>
    %247 = arith.mulf %242, %246 : vector<8x128xf32>
    %248 = vector.extract_strided_slice %233 {offsets = [0, 512], sizes = [8, 512], strides = [1, 1]} : vector<8x1024xf32> to vector<8x512xf32>
    %249 = vector.extract_strided_slice %248 {offsets = [0, 0], sizes = [8, 128], strides = [1, 1]} : vector<8x512xf32> to vector<8x128xf32>
    %250 = vector.extract_strided_slice %248 {offsets = [0, 128], sizes = [8, 128], strides = [1, 1]} : vector<8x512xf32> to vector<8x128xf32>
    %251 = vector.extract_strided_slice %248 {offsets = [0, 256], sizes = [8, 128], strides = [1, 1]} : vector<8x512xf32> to vector<8x128xf32>
    %cst_63 = arith.constant 2.000000e+00 : f32
    %252 = vector.broadcast %cst_63 : f32 to vector<8x128xf32>
    %253 = arith.mulf %252, %251 : vector<8x128xf32>
    %cst_64 = arith.constant 1.000000e+00 : f32
    %254 = vector.broadcast %cst_64 : f32 to vector<8x128xf32>
    %255 = arith.subf %253, %254 : vector<8x128xf32>
    %256 = vector.extract_strided_slice %248 {offsets = [0, 384], sizes = [8, 128], strides = [1, 1]} : vector<8x512xf32> to vector<8x128xf32>
    %257 = arith.mulf %250, %219 : vector<8x128xf32>
    %258 = arith.mulf %249, %255 : vector<8x128xf32>
    %259 = arith.addf %257, %258 : vector<8x128xf32>
    %260 = math.tanh %259 : vector<8x128xf32>
    %261 = arith.mulf %256, %260 : vector<8x128xf32>
    %c7 = arith.constant 7 : index
    %c0_65 = arith.constant 0 : index
    %c0_66 = arith.constant 0 : index
    %262 = vector.load %arg0[%c7, %c0_65, %c0_66] : memref<9x8x1024xf32, #tpu.memory_space<vmem>>, vector<1x8x1024xf32>
    %263 = vector.shape_cast %262 : vector<1x8x1024xf32> to vector<8x1024xf32>
    %264 = tpu.concatenate %247, %261 in 1 : vector<8x128xf32>, vector<8x128xf32> -> vector<8x256xf32>
    %265 = arith.truncf %264 : vector<8x256xf32> to vector<8x256xbf16>
    %c0_67 = arith.constant 0 : index
    %c0_68 = arith.constant 0 : index
    %266 = vector.load %arg1[%c0_67, %c0_68] : memref<256x1024xbf16, #tpu.memory_space<vmem>>, vector<256x1024xbf16>
    %cst_69 = arith.constant dense<0.000000e+00> : vector<8x1024xf32>
    %267 = tpu.matmul %265, %266, %cst_69 {dimension_numbers = #tpu.dot_dimension_numbers<[1], [0], [0], [1], [0, 0, 1, 1], [], []>} : vector<8x256xbf16>, vector<256x1024xbf16>, vector<8x1024xf32> -> vector<8x1024xf32>
    %268 = arith.addf %267, %263 : vector<8x1024xf32>
    %269 = arith.negf %268 : vector<8x1024xf32>
    %270 = math.exp %269 : vector<8x1024xf32>
    %cst_70 = arith.constant 1.000000e+00 : f32
    %271 = vector.broadcast %cst_70 : f32 to vector<8x1024xf32>
    %272 = arith.addf %271, %270 : vector<8x1024xf32>
    %273 = arith.divf %271, %272 : vector<8x1024xf32>
    %274 = vector.extract_strided_slice %273 {offsets = [0, 0], sizes = [8, 512], strides = [1, 1]} : vector<8x1024xf32> to vector<8x512xf32>
    %275 = vector.extract_strided_slice %274 {offsets = [0, 0], sizes = [8, 128], strides = [1, 1]} : vector<8x512xf32> to vector<8x128xf32>
    %276 = vector.extract_strided_slice %274 {offsets = [0, 128], sizes = [8, 128], strides = [1, 1]} : vector<8x512xf32> to vector<8x128xf32>
    %277 = vector.extract_strided_slice %274 {offsets = [0, 256], sizes = [8, 128], strides = [1, 1]} : vector<8x512xf32> to vector<8x128xf32>
    %cst_71 = arith.constant 2.000000e+00 : f32
    %278 = vector.broadcast %cst_71 : f32 to vector<8x128xf32>
    %279 = arith.mulf %278, %277 : vector<8x128xf32>
    %cst_72 = arith.constant 1.000000e+00 : f32
    %280 = vector.broadcast %cst_72 : f32 to vector<8x128xf32>
    %281 = arith.subf %279, %280 : vector<8x128xf32>
    %282 = vector.extract_strided_slice %274 {offsets = [0, 384], sizes = [8, 128], strides = [1, 1]} : vector<8x512xf32> to vector<8x128xf32>
    %283 = arith.mulf %276, %245 : vector<8x128xf32>
    %284 = arith.mulf %275, %281 : vector<8x128xf32>
    %285 = arith.addf %283, %284 : vector<8x128xf32>
    %286 = math.tanh %285 : vector<8x128xf32>
    %287 = arith.mulf %282, %286 : vector<8x128xf32>
    %288 = vector.extract_strided_slice %273 {offsets = [0, 512], sizes = [8, 512], strides = [1, 1]} : vector<8x1024xf32> to vector<8x512xf32>
    %289 = vector.extract_strided_slice %288 {offsets = [0, 0], sizes = [8, 128], strides = [1, 1]} : vector<8x512xf32> to vector<8x128xf32>
    %290 = vector.extract_strided_slice %288 {offsets = [0, 128], sizes = [8, 128], strides = [1, 1]} : vector<8x512xf32> to vector<8x128xf32>
    %291 = vector.extract_strided_slice %288 {offsets = [0, 256], sizes = [8, 128], strides = [1, 1]} : vector<8x512xf32> to vector<8x128xf32>
    %cst_73 = arith.constant 2.000000e+00 : f32
    %292 = vector.broadcast %cst_73 : f32 to vector<8x128xf32>
    %293 = arith.mulf %292, %291 : vector<8x128xf32>
    %cst_74 = arith.constant 1.000000e+00 : f32
    %294 = vector.broadcast %cst_74 : f32 to vector<8x128xf32>
    %295 = arith.subf %293, %294 : vector<8x128xf32>
    %296 = vector.extract_strided_slice %288 {offsets = [0, 384], sizes = [8, 128], strides = [1, 1]} : vector<8x512xf32> to vector<8x128xf32>
    %297 = arith.mulf %290, %259 : vector<8x128xf32>
    %298 = arith.mulf %289, %295 : vector<8x128xf32>
    %299 = arith.addf %297, %298 : vector<8x128xf32>
    %300 = math.tanh %299 : vector<8x128xf32>
    %301 = arith.mulf %296, %300 : vector<8x128xf32>
    %c8 = arith.constant 8 : index
    %c0_75 = arith.constant 0 : index
    %c0_76 = arith.constant 0 : index
    %302 = vector.load %arg0[%c8, %c0_75, %c0_76] : memref<9x8x1024xf32, #tpu.memory_space<vmem>>, vector<1x8x1024xf32>
    %303 = vector.shape_cast %302 : vector<1x8x1024xf32> to vector<8x1024xf32>
    %304 = tpu.concatenate %287, %301 in 1 : vector<8x128xf32>, vector<8x128xf32> -> vector<8x256xf32>
    %305 = arith.truncf %304 : vector<8x256xf32> to vector<8x256xbf16>
    %c0_77 = arith.constant 0 : index
    %c0_78 = arith.constant 0 : index
    %306 = vector.load %arg1[%c0_77, %c0_78] : memref<256x1024xbf16, #tpu.memory_space<vmem>>, vector<256x1024xbf16>
    %cst_79 = arith.constant dense<0.000000e+00> : vector<8x1024xf32>
    %307 = tpu.matmul %305, %306, %cst_79 {dimension_numbers = #tpu.dot_dimension_numbers<[1], [0], [0], [1], [0, 0, 1, 1], [], []>} : vector<8x256xbf16>, vector<256x1024xbf16>, vector<8x1024xf32> -> vector<8x1024xf32>
    %308 = arith.addf %307, %303 : vector<8x1024xf32>
    %309 = arith.negf %308 : vector<8x1024xf32>
    %310 = math.exp %309 : vector<8x1024xf32>
    %cst_80 = arith.constant 1.000000e+00 : f32
    %311 = vector.broadcast %cst_80 : f32 to vector<8x1024xf32>
    %312 = arith.addf %311, %310 : vector<8x1024xf32>
    %313 = arith.divf %311, %312 : vector<8x1024xf32>
    %314 = vector.extract_strided_slice %313 {offsets = [0, 512], sizes = [8, 512], strides = [1, 1]} : vector<8x1024xf32> to vector<8x512xf32>
    %315 = vector.extract_strided_slice %314 {offsets = [0, 0], sizes = [8, 128], strides = [1, 1]} : vector<8x512xf32> to vector<8x128xf32>
    %316 = vector.extract_strided_slice %314 {offsets = [0, 128], sizes = [8, 128], strides = [1, 1]} : vector<8x512xf32> to vector<8x128xf32>
    %317 = vector.extract_strided_slice %314 {offsets = [0, 256], sizes = [8, 128], strides = [1, 1]} : vector<8x512xf32> to vector<8x128xf32>
    %cst_81 = arith.constant 2.000000e+00 : f32
    %318 = vector.broadcast %cst_81 : f32 to vector<8x128xf32>
    %319 = arith.mulf %318, %317 : vector<8x128xf32>
    %cst_82 = arith.constant 1.000000e+00 : f32
    %320 = vector.broadcast %cst_82 : f32 to vector<8x128xf32>
    %321 = arith.subf %319, %320 : vector<8x128xf32>
    %322 = vector.extract_strided_slice %314 {offsets = [0, 384], sizes = [8, 128], strides = [1, 1]} : vector<8x512xf32> to vector<8x128xf32>
    %323 = arith.mulf %316, %299 : vector<8x128xf32>
    %324 = arith.mulf %315, %321 : vector<8x128xf32>
    %325 = arith.addf %323, %324 : vector<8x128xf32>
    %326 = math.tanh %325 : vector<8x128xf32>
    %327 = arith.mulf %322, %326 : vector<8x128xf32>
    %c0_83 = arith.constant 0 : index
    %c0_84 = arith.constant 0 : index
    %328 = vector.load %arg2[%c0_83, %c0_84] : memref<128x128xf32, #tpu.memory_space<vmem>>, vector<128x128xf32>
    %cst_85 = arith.constant dense<0.000000e+00> : vector<8x128xf32>
    %329 = tpu.matmul %327, %328, %cst_85 {dimension_numbers = #tpu.dot_dimension_numbers<[1], [0], [0], [1], [0, 0, 1, 1], [], []>} : vector<8x128xf32>, vector<128x128xf32>, vector<8x128xf32> -> vector<8x128xf32>
    %c0_86 = arith.constant 0 : index
    %c0_87 = arith.constant 0 : index
    %330 = vector.load %arg3[%c0_86, %c0_87] : memref<1x128xf32, #tpu.memory_space<vmem>>, vector<1x128xf32>
    %331 = vector.broadcast %330 : vector<1x128xf32> to vector<8x128xf32>
    %332 = arith.addf %329, %331 : vector<8x128xf32>
    %c0_88 = arith.constant 0 : index
    %c0_89 = arith.constant 0 : index
    %333 = vector.load %arg4[%c0_88, %c0_89] : memref<8x128xf32, #tpu.memory_space<vmem>>, vector<8x128xf32>
    tpu.vector_store %arg4[%c0_88, %c0_89], %332 {strides = array<i32>} : memref<8x128xf32, #tpu.memory_space<vmem>>, vector<8x128xf32>,
    return
  }
}

</mosaic_0001>

<bundles_post_ra>
// kernel: lstm_model_forward.1
= control target key start
LH: loop header
LB: loop body
LE: loop exit
PB: predicated region body
PF: predicated region fallthrough
CT: control target
= control target key end

     0   :  { %v5322_v3 = vmov 0.0|0.0   ;;  %vm3334_vm0 = vmmov 0   ;;  %s5317_s1 = inlined_call_operand.vmem [shape: bf16[256,1024], index: 1, kind: input, shape index: {}]   ;;  %s5318_s0 = inlined_call_operand.vmem [shape: f32[9,8,1024], index: 0, kind: input, shape index: {}]   ;;  %s5319_s2 = inlined_call_operand.vmem [shape: f32[128,128], index: 2, kind: input, shape index: {}]   ;;  %s5320_s3 = inlined_call_operand.vmem [shape: f32[1,128], index: 3, kind: input, shape index: {}]   ;;  %s5321_s4 = inlined_call_operand.vmem [shape: f32[8,128], index: 4, kind: output, shape index: {}]  }
   0x1   :  { %v63_v0 = vld [vmem:[%s5317_s1] sm:$0xff]  ;;  %v64_v2 = vld [vmem:[%s5317_s1 + $0x8] sm:$0xff]  ;;  %904 = vmatprep.mubr.bf16.mxu1 %v5322_v3  ;;  %863 = vmatprep.mubr.bf16.mxu0 %v5322_v3  ;;  %v19_v59 = vld [vmem:[%s5318_s0 + $0x10] sm:$0xff] }
   0x2   :  { %v67_v1 = vld [vmem:[%s5317_s1 + $0x20] sm:$0xff]  ;;  %v68_v5 = vld [vmem:[%s5317_s1 + $0x28] sm:$0xff] }
   0x3   :  { %v3372_v4 = vcombine.high %v63_v0, %v67_v1  ;;  %v3377_v6 = vcombine.low %v63_v0, %v67_v1  ;;  %v71_v7 = vld [vmem:[%s5317_s1 + $0x40] sm:$0xff]  ;;  %v3385_v9 = vcombine.high %v64_v2, %v68_v5  ;;  %v3387_v10 = vcombine.low %v64_v2, %v68_v5  ;;  %v72_v12 = vld [vmem:[%s5317_s1 + $0x48] sm:$0xff] }
   0x4   :  { %v75_v8 = vld [vmem:[%s5317_s1 + $0x60] sm:$0xff]  ;;  %v76_v13 = vld [vmem:[%s5317_s1 + $0x68] sm:$0xff]  ;;  %v2699_v0 = vmul.f32 -1.442695, %v19_v59 }
   0x5   :  { %5597 = vst [vmem:[#allocation2_spill] sm:$0xff] %v3372_v4  ;;  %5598 = vst [vmem:[#allocation3_spill] sm:$0xff] %v3377_v6  ;;  %v3389_v11 = vcombine.high %v71_v7, %v75_v8  ;;  %v79_v14 = vld [vmem:[%s5317_s1 + $0x80] sm:$0xff]  ;;  %831 = vmatprep.subr.bf16.mxu0 %v3372_v4  ;;  %v3401_v15 = vcombine.high %v72_v12, %v76_v13  ;;  %v80_v17 = vld [vmem:[%s5317_s1 + $0x88] sm:$0xff]  ;;  %872 = vmatprep.subr.bf16.mxu1 %v3385_v9 }
   0x6   :  { %5599 = vst [vmem:[#allocation4_spill] sm:$0xff] %v3385_v9  ;;  %5600 = vst [vmem:[#allocation5_spill] sm:$0xff] %v3387_v10  ;;  %v83_v16 = vld [vmem:[%s5317_s1 + $0xa0] sm:$0xff]  ;;  %v84_v18 = vld [vmem:[%s5317_s1 + $0xa8] sm:$0xff]  ;;  %832 = vmatpush1.bf16.msra.mxu0 %v3377_v6  ;;  %v3414_v19 = vcombine.low %v71_v7, %v75_v8  ;;  %873 = vmatpush1.bf16.msra.mxu1 %v3387_v10  ;;  %v3418_v20 = vcombine.low %v72_v12, %v76_v13 }
   0x7   :  { %5601 = vst [vmem:[#allocation6_spill] sm:$0xff] %v3389_v11  ;;  %5602 = vst [vmem:[#allocation7_spill] sm:$0xff] %v3401_v15  ;;  %833 = vmatprep.subr.bf16.mxu0 %v3389_v11  ;;  %v3420_v21 = vcombine.high %v79_v14, %v83_v16  ;;  %874 = vmatprep.subr.bf16.mxu1 %v3401_v15  ;;  %v3423_v22 = vcombine.high %v80_v17, %v84_v18  ;;  %v87_v23 = vld [vmem:[%s5317_s1 + $0xc0] sm:$0xff]  ;;  %v88_v25 = vld [vmem:[%s5317_s1 + $0xc8] sm:$0xff] }
   0x8   :  { %5603 = vst [vmem:[#allocation8_spill] sm:$0xff] %v3414_v19  ;;  %5604 = vst [vmem:[#allocation9_spill] sm:$0xff] %v3418_v20  ;;  %v91_v24 = vld [vmem:[%s5317_s1 + $0xe0] sm:$0xff]  ;;  %v92_v26 = vld [vmem:[%s5317_s1 + $0xe8] sm:$0xff]  ;;  %v3438_v27 = vcombine.low %v79_v14, %v83_v16  ;;  %v3442_v28 = vcombine.low %v80_v17, %v84_v18 }
   0x9   :  { %5605 = vst [vmem:[#allocation10_spill] sm:$0xff] %v3420_v21  ;;  %5606 = vst [vmem:[#allocation11_spill] sm:$0xff] %v3423_v22  ;;  %v3444_v29 = vcombine.high %v87_v23, %v91_v24  ;;  %v3447_v30 = vcombine.high %v88_v25, %v92_v26  ;;  %v95_v31 = vld [vmem:[%s5317_s1 + $0x100] sm:$0xff]  ;;  %v96_v33 = vld [vmem:[%s5317_s1 + $0x108] sm:$0xff]  ;;  %v3462_v35 = vcombine.low %v87_v23, %v91_v24 }
   0xa   :  { %834 = vmatpush1.bf16.msra.mxu0 %v3414_v19  ;;  %5607 = vst [vmem:[#allocation12_spill] sm:$0xff] %v3438_v27  ;;  %875 = vmatpush1.bf16.msra.mxu1 %v3418_v20  ;;  %5608 = vst [vmem:[#allocation13_spill] sm:$0xff] %v3442_v28  ;;  %v99_v32 = vld [vmem:[%s5317_s1 + $0x120] sm:$0xff]  ;;  %v100_v34 = vld [vmem:[%s5317_s1 + $0x128] sm:$0xff]  ;;  %v3466_v36 = vcombine.low %v88_v25, %v92_v26 }
   0xb   :  { %835 = vmatprep.subr.bf16.mxu0 %v3420_v21  ;;  %5609 = vst [vmem:[#allocation14_spill] sm:$0xff] %v3444_v29  ;;  %876 = vmatprep.subr.bf16.mxu1 %v3423_v22  ;;  %5610 = vst [vmem:[#allocation15_spill] sm:$0xff] %v3447_v30  ;;  %v3468_v37 = vcombine.high %v95_v31, %v99_v32  ;;  %v3471_v38 = vcombine.high %v96_v33, %v100_v34  ;;  %v103_v39 = vld [vmem:[%s5317_s1 + $0x140] sm:$0xff]  ;;  %v104_v41 = vld [vmem:[%s5317_s1 + $0x148] sm:$0xff] }
   0xc   :  { %5611 = vst [vmem:[#allocation16_spill] sm:$0xff] %v3462_v35  ;;  %5612 = vst [vmem:[#allocation17_spill] sm:$0xff] %v3466_v36  ;;  %v107_v40 = vld [vmem:[%s5317_s1 + $0x160] sm:$0xff]  ;;  %v108_v42 = vld [vmem:[%s5317_s1 + $0x168] sm:$0xff]  ;;  %v3486_v43 = vcombine.low %v95_v31, %v99_v32  ;;  %v3490_v44 = vcombine.low %v96_v33, %v100_v34 }
   0xd   :  { %5613 = vst [vmem:[#allocation18_spill] sm:$0xff] %v3468_v37  ;;  %5614 = vst [vmem:[#allocation19_spill] sm:$0xff] %v3471_v38  ;;  %v3492_v45 = vcombine.high %v103_v39, %v107_v40  ;;  %v3495_v46 = vcombine.high %v104_v41, %v108_v42  ;;  %v111_v47 = vld [vmem:[%s5317_s1 + $0x180] sm:$0xff]  ;;  %v112_v49 = vld [vmem:[%s5317_s1 + $0x188] sm:$0xff]  ;;  %v3510_v51 = vcombine.low %v103_v39, %v107_v40 }
   0xe   :  { %836 = vmatpush1.bf16.msra.mxu0 %v3438_v27  ;;  %877 = vmatpush1.bf16.msra.mxu1 %v3442_v28  ;;  %5615 = vst [vmem:[#allocation20_spill] sm:$0xff] %v3486_v43  ;;  %5616 = vst [vmem:[#allocation21_spill] sm:$0xff] %v3490_v44  ;;  %v115_v48 = vld [vmem:[%s5317_s1 + $0x1a0] sm:$0xff]  ;;  %v116_v50 = vld [vmem:[%s5317_s1 + $0x1a8] sm:$0xff]  ;;  %v3514_v52 = vcombine.low %v104_v41, %v108_v42 }
   0xf   :  { %837 = vmatprep.subr.bf16.mxu0 %v3444_v29  ;;  %878 = vmatprep.subr.bf16.mxu1 %v3447_v30  ;;  %5617 = vst [vmem:[#allocation22_spill] sm:$0xff] %v3492_v45  ;;  %5618 = vst [vmem:[#allocation23_spill] sm:$0xff] %v3495_v46  ;;  %v3516_v53 = vcombine.high %v111_v47, %v115_v48  ;;  %v119_v54 = vld [vmem:[%s5317_s1 + $0x1c0] sm:$0xff]  ;;  %v18_v56 = vld [vmem:[%s5318_s0 + $0x8] sm:$0xff]  ;;  %v3528_v57 = vcombine.high %v112_v49, %v116_v50 }
  0x10   :  { %5619 = vst [vmem:[#allocation24_spill] sm:$0xff] %v3510_v51  ;;  %5620 = vst [vmem:[#allocation25_spill] sm:$0xff] %v3514_v52  ;;  %v17_v55 = vld [vmem:[%s5318_s0] sm:$0xff]  ;;  %v2698_v61 = vmul.f32 -1.442695, %v18_v56  ;;  %v120_v62 = vld [vmem:[%s5317_s1 + $0x1c8] sm:$0xff]  ;;  %v3543_v1 = vcombine.low %v111_v47, %v115_v48  ;;  %v3547_v2 = vcombine.low %v112_v49, %v116_v50 }
  0x11   :  { %5621 = vst [vmem:[#allocation26_spill] sm:$0xff] %v3516_v53  ;;  %5622 = vst [vmem:[#allocation27_spill] sm:$0xff] %v3528_v57  ;;  %v123_v58 = vld [vmem:[%s5317_s1 + $0x1e0] sm:$0xff]  ;;  %v2697_v60 = vmul.f32 -1.442695, %v17_v55  ;;  %v124_v63 = vld [vmem:[%s5317_s1 + $0x1e8] sm:$0xff] }
  0x12   :  { %838 = vmatpush1.bf16.msra.mxu0 %v3462_v35  ;;  %879 = vmatpush1.bf16.msra.mxu1 %v3466_v36  ;;  %5623 = vst [vmem:[#allocation28_spill] sm:$0xff] %v3543_v1  ;;  %5624 = vst [vmem:[#allocation29_spill] sm:$0xff] %v3547_v2  ;;  %v3549_v5 = vcombine.high %v119_v54, %v123_v58  ;;  %v3552_v7 = vcombine.high %v120_v62, %v124_v63  ;;  %v127_v8 = vld [vmem:[%s5317_s1 + $0x200] sm:$0xff]  ;;  %v128_v13 = vld [vmem:[%s5317_s1 + $0x208] sm:$0xff] }
  0x13   :  { %839 = vmatprep.subr.bf16.mxu0 %v3468_v37  ;;  %880 = vmatprep.subr.bf16.mxu1 %v3471_v38  ;;  %3045 = vpow2.f32 %v2697_v60  ;;  %v131_v12 = vld [vmem:[%s5317_s1 + $0x220] sm:$0xff]  ;;  %v132_v14 = vld [vmem:[%s5317_s1 + $0x228] sm:$0xff]  ;;  %v3567_v16 = vcombine.low %v119_v54, %v123_v58  ;;  %v3571_v17 = vcombine.low %v120_v62, %v124_v63  ;;  %v20_v26 = vld [vmem:[%s5318_s0 + $0x18] sm:$0xff] }
  0x14   :  { %5625 = vst [vmem:[#allocation30_spill] sm:$0xff] %v3549_v5  ;;  %3047 = vpow2.f32 %v2698_v61  ;;  %5626 = vst [vmem:[#allocation31_spill] sm:$0xff] %v3552_v7  ;;  %v3573_v18 = vcombine.high %v127_v8, %v131_v12  ;;  %v3576_v23 = vcombine.high %v128_v13, %v132_v14  ;;  %v135_v24 = vld [vmem:[%s5317_s1 + $0x240] sm:$0xff]  ;;  %v136_v31 = vld [vmem:[%s5317_s1 + $0x248] sm:$0xff]  ;;  %v3594_v33 = vcombine.low %v127_v8, %v131_v12 }
  0x15   :  { %3049 = vpow2.f32 %v2699_v0  ;;  %5627 = vst [vmem:[#allocation32_spill] sm:$0xff] %v3567_v16  ;;  %5628 = vst [vmem:[#allocation33_spill] sm:$0xff] %v3571_v17  ;;  %v139_v25 = vld [vmem:[%s5317_s1 + $0x260] sm:$0xff]  ;;  %v140_v32 = vld [vmem:[%s5317_s1 + $0x268] sm:$0xff]  ;;  %v3598_v34 = vcombine.low %v128_v13, %v132_v14  ;;  %v2700_v40 = vmul.f32 -1.442695, %v20_v26 }
  0x16   :  { %840 = vmatpush1.bf16.msra.mxu0 %v3486_v43  ;;  %881 = vmatpush1.bf16.msra.mxu1 %v3490_v44  ;;  %5629 = vst [vmem:[#allocation34_spill] sm:$0xff] %v3573_v18  ;;  %5630 = vst [vmem:[#allocation35_spill] sm:$0xff] %v3576_v23  ;;  %v3600_v39 = vcombine.high %v135_v24, %v139_v25  ;;  %v3603_v42 = vcombine.high %v136_v31, %v140_v32  ;;  %v143_v47 = vld [vmem:[%s5317_s1 + $0x280] sm:$0xff]  ;;  %v144_v50 = vld [vmem:[%s5317_s1 + $0x288] sm:$0xff] }
  0x17   :  { %841 = vmatprep.subr.bf16.mxu0 %v3492_v45  ;;  %882 = vmatprep.subr.bf16.mxu1 %v3495_v46  ;;  %5631 = vst [vmem:[#allocation36_spill] sm:$0xff] %v3594_v33  ;;  %5632 = vst [vmem:[#allocation37_spill] sm:$0xff] %v3598_v34  ;;  %v147_v48 = vld [vmem:[%s5317_s1 + $0x2a0] sm:$0xff]  ;;  %v148_v54 = vld [vmem:[%s5317_s1 + $0x2a8] sm:$0xff]  ;;  %v3618_v56 = vcombine.low %v135_v24, %v139_v25  ;;  %v3620_v58 = vcombine.low %v136_v31, %v140_v32  ;;  %3051 = vpow2.f32 %v2700_v40 }
  0x18   :  { %5633 = vst [vmem:[#allocation38_spill] sm:$0xff] %v3600_v39  ;;  %5634 = vst [vmem:[#allocation39_spill] sm:$0xff] %v3603_v42  ;;  %v3624_v60 = vcombine.high %v143_v47, %v147_v48  ;;  %v3627_v63 = vcombine.high %v144_v50, %v148_v54  ;;  %v151_v0 = vld [vmem:[%s5317_s1 + $0x2c0] sm:$0xff]  ;;  %v152_v12 = vld [vmem:[%s5317_s1 + $0x2c8] sm:$0xff]  ;;  %v3642_v14 = vcombine.low %v143_v47, %v147_v48 }
  0x19   :  { %5635 = vst [vmem:[#allocation40_spill] sm:$0xff] %v3618_v56  ;;  %5636 = vst [vmem:[#allocation41_spill] sm:$0xff] %v3620_v58  ;;  %v155_v8 = vld [vmem:[%s5317_s1 + $0x2e0] sm:$0xff]  ;;  %v156_v13 = vld [vmem:[%s5317_s1 + $0x2e8] sm:$0xff]  ;;  %v3646_v24 = vcombine.low %v144_v50, %v148_v54 }
  0x1a   :  { %842 = vmatpush1.bf16.msra.mxu0 %v3510_v51  ;;  %883 = vmatpush1.bf16.msra.mxu1 %v3514_v52  ;;  %5637 = vst [vmem:[#allocation42_spill] sm:$0xff] %v3624_v60  ;;  %5638 = vst [vmem:[#allocation43_spill] sm:$0xff] %v3627_v63  ;;  %v3648_v25 = vcombine.high %v151_v0, %v155_v8  ;;  %v3651_v26 = vcombine.high %v152_v12, %v156_v13  ;;  %v159_v31 = vld [vmem:[%s5317_s1 + $0x300] sm:$0xff]  ;;  %v160_v40 = vld [vmem:[%s5317_s1 + $0x308] sm:$0xff] }
  0x1b   :  { %843 = vmatprep.subr.bf16.mxu0 %v3516_v53  ;;  %884 = vmatprep.subr.bf16.mxu1 %v3528_v57  ;;  %5639 = vst [vmem:[#allocation44_spill] sm:$0xff] %v3642_v14  ;;  %5640 = vst [vmem:[#allocation45_spill] sm:$0xff] %v3646_v24  ;;  %v163_v32 = vld [vmem:[%s5317_s1 + $0x320] sm:$0xff]  ;;  %v3666_v47 = vcombine.low %v151_v0, %v155_v8  ;;  %v3670_v48 = vcombine.low %v152_v12, %v156_v13 }
  0x1c   :  { %5641 = vst [vmem:[#allocation46_spill] sm:$0xff] %v3648_v25  ;;  %5642 = vst [vmem:[#allocation47_spill] sm:$0xff] %v3651_v26  ;;  %v167_v54 = vld [vmem:[%s5317_s1 + $0x340] sm:$0xff]  ;;  %v3690_v8 = vcombine.low %v159_v31, %v163_v32 }
  0x1d   :  { %v3046_v41 = vpop.eup %3045  ;;  %5643 = vst [vmem:[#allocation48_spill] sm:$0xff] %v3666_v47  ;;  %5644 = vst [vmem:[#allocation49_spill] sm:$0xff] %v3670_v48 }
  0x1e   :  { %844 = vmatpush1.bf16.msra.mxu0 %v3543_v1  ;;  %885 = vmatpush1.bf16.msra.mxu1 %v3547_v2  ;;  %v3048_v49 = vpop.eup %3047  ;;  %v33_v61 = vadd.f32 1.0, %v3046_v41  ;;  %v164_v41 = vld [vmem:[%s5317_s1 + $0x328] sm:$0xff]  ;;  %5647 = vst [vmem:[#allocation52_spill] sm:$0xff] %v3690_v8 }
  0x1f   :  { %845 = vmatprep.subr.bf16.mxu0 %v3549_v5  ;;  %886 = vmatprep.subr.bf16.mxu1 %v3552_v7  ;;  %v3050_v55 = vpop.eup %3049  ;;  %v34_v59 = vadd.f32 1.0, %v3048_v49  ;;  %v3672_v49 = vcombine.high %v159_v31, %v163_v32  ;;  %v3675_v50 = vcombine.high %v160_v40, %v164_v41  ;;  %v3694_v13 = vcombine.low %v160_v40, %v164_v41  ;;  %v179_v31 = vld [vmem:[%s5317_s1 + $0x3a0] sm:$0xff]  ;;  %v176_v40 = vld [vmem:[%s5317_s1 + $0x388] sm:$0xff] }
  0x20   :  { %v35_v62 = vadd.f32 1.0, %v3050_v55  ;;  %v171_v55 = vld [vmem:[%s5317_s1 + $0x360] sm:$0xff]  ;;  %v180_v41 = vld [vmem:[%s5317_s1 + $0x3a8] sm:$0xff] }
  0x21   :  { %3053 = vrcp.f32 %v34_v59  ;;  %5645 = vst [vmem:[#allocation50_spill] sm:$0xff] %v3672_v49  ;;  %5646 = vst [vmem:[#allocation51_spill] sm:$0xff] %v3675_v50  ;;  %v3052_v59 = vpop.eup %3051  ;;  %v3696_v3 = vcombine.high %v167_v54, %v171_v55 }
  0x22   :  { %846 = vmatpush1.bf16.msra.mxu0 %v3567_v16  ;;  %887 = vmatpush1.bf16.msra.mxu1 %v3571_v17  ;;  %3055 = vrcp.f32 %v35_v62  ;;  %v172_v62 = vld [vmem:[%s5317_s1 + $0x368] sm:$0xff]  ;;  %5648 = vst [vmem:[#allocation53_spill] sm:$0xff] %v3694_v13 }
  0x23   :  { %847 = vmatprep.subr.bf16.mxu0 %v3573_v18  ;;  %888 = vmatprep.subr.bf16.mxu1 %v3576_v23  ;;  %3057 = vrcp.f32 %v33_v61  ;;  %v168_v61 = vld [vmem:[%s5317_s1 + $0x348] sm:$0xff]  ;;  %5649 = vst [vmem:[#allocation54_spill] sm:$0xff] %v3696_v3 }
  0x26   :  { %848 = vmatpush1.bf16.msra.mxu0 %v3594_v33  ;;  %889 = vmatpush1.bf16.msra.mxu1 %v3598_v34 }
  0x27   :  { %849 = vmatprep.subr.bf16.mxu0 %v3600_v39  ;;  %890 = vmatprep.subr.bf16.mxu1 %v3603_v42 }
  0x2a   :  { %850 = vmatpush1.bf16.msra.mxu0 %v3618_v56  ;;  %891 = vmatpush1.bf16.msra.mxu1 %v3620_v58 }
  0x2b   :  { %851 = vmatprep.subr.bf16.mxu0 %v3624_v60  ;;  %892 = vmatprep.subr.bf16.mxu1 %v3627_v63  ;;  %v3054_v0 = vpop.eup %3053  ;;  %v3723_v63 = vcombine.high %v176_v40, %v180_v41 }
  0x2c   :  { %v3056_v12 = vpop.eup %3055 }
  0x2d   :  { %v45_v32 = vmul.f32 2.0, %v3056_v12  ;;  %v3718_v12 = vcombine.low %v168_v61, %v172_v62  ;;  %5654 = vst [vmem:[#allocation59_spill] sm:$0xff] %v3723_v63 }
  0x2e   :  { %852 = vmatpush1.bf16.msra.mxu0 %v3642_v14  ;;  %893 = vmatpush1.bf16.msra.mxu1 %v3646_v24  ;;  %v47_v24 = vmul.f32 0.0, %v3054_v0 }
  0x2f   :  { %853 = vmatprep.subr.bf16.mxu0 %v3648_v25  ;;  %894 = vmatprep.subr.bf16.mxu1 %v3651_v26  ;;  %v3699_v26 = vcombine.high %v168_v61, %v172_v62  ;;  %v175_v25 = vld [vmem:[%s5317_s1 + $0x380] sm:$0xff]  ;;  %5652 = vst [vmem:[#allocation57_spill] sm:$0xff] %v3718_v12  ;;  %v184_v61 = vld [vmem:[%s5317_s1 + $0x3c8] sm:$0xff] }
  0x30   :  { %v3720_v14 = vcombine.high %v175_v25, %v179_v31  ;;  %v188_v62 = vld [vmem:[%s5317_s1 + $0x3e8] sm:$0xff]  ;;  %v3738_v0 = vcombine.low %v175_v25, %v179_v31  ;;  %v65_v25 = vld [vmem:[%s5317_s1 + $0x10] sm:$0xff]  ;;  %v70_v31 = vld [vmem:[%s5317_s1 + $0x38] sm:$0xff] }
  0x31   :  { %5650 = vst [vmem:[#allocation55_spill] sm:$0xff] %v3699_v26 }
  0x32   :  { %854 = vmatpush1.bf16.msra.mxu0 %v3666_v47  ;;  %895 = vmatpush1.bf16.msra.mxu1 %v3670_v48  ;;  %v3058_v48 = vpop.eup %3057  ;;  %v2701_v47 = vadd.f32 -1.0, %v45_v32  ;;  %5653 = vst [vmem:[#allocation58_spill] sm:$0xff] %v3720_v14  ;;  %5655 = vst [vmem:[#allocation60_spill] sm:$0xff] %v3738_v0 }
  0x33   :  { %855 = vmatprep.subr.bf16.mxu0 %v3672_v49  ;;  %896 = vmatprep.subr.bf16.mxu1 %v3675_v50  ;;  %v3714_v50 = vcombine.low %v167_v54, %v171_v55  ;;  %v36_v49 = vadd.f32 1.0, %v3052_v59  ;;  %v183_v54 = vld [vmem:[%s5317_s1 + $0x3c0] sm:$0xff] }
  0x34   :  { %v187_v55 = vld [vmem:[%s5317_s1 + $0x3e0] sm:$0xff]  ;;  %v48_v59 = vmul.f32 %v3058_v48, %v2701_v47  ;;  %v3744_v47 = vcombine.low %v176_v40, %v180_v41  ;;  %v3769_v41 = vcombine.low %v184_v61, %v188_v62 }
  0x35   :  { %5651 = vst [vmem:[#allocation56_spill] sm:$0xff] %v3714_v50  ;;  %3059 = vrcp.f32 %v36_v49  ;;  %v3746_v48 = vcombine.high %v183_v54, %v187_v55  ;;  %v66_v49 = vld [vmem:[%s5317_s1 + $0x18] sm:$0xff]  ;;  %v3765_v40 = vcombine.low %v183_v54, %v187_v55  ;;  %v73_v55 = vld [vmem:[%s5317_s1 + $0x50] sm:$0xff] }
  0x36   :  { %856 = vmatpush1.bf16.msra.mxu0 %v3690_v8  ;;  %897 = vmatpush1.bf16.msra.mxu1 %v3694_v13  ;;  %v3740_v32 = vadd.f32 %v48_v59, %v47_v24  ;;  %5657 = vst [vmem:[#allocation62_spill] sm:$0xff] %v3744_v47  ;;  %v69_v24 = vld [vmem:[%s5317_s1 + $0x30] sm:$0xff]  ;;  %5661 = vst [vmem:[#allocation66_spill] sm:$0xff] %v3769_v41 }
  0x37   :  { %857 = vmatprep.subr.bf16.mxu0 %v3696_v3  ;;  %898 = vmatprep.subr.bf16.mxu1 %v3699_v26  ;;  %5658 = vst [vmem:[#allocation63_spill] sm:$0xff] %v3746_v48  ;;  %v3749_v26 = vcombine.high %v184_v61, %v188_v62  ;;  %5660 = vst [vmem:[#allocation65_spill] sm:$0xff] %v3765_v40  ;;  %v3771_v59 = vcombine.high %v65_v25, %v69_v24  ;;  %v77_v62 = vld [vmem:[%s5317_s1 + $0x70] sm:$0xff] }
  0x38   :  { %5656 = vst [vmem:[#allocation61_spill] sm:$0xff] %v3740_v32  ;;  %3061 = vtanh.f32 %v3740_v32  ;;  %v3774_v32 = vcombine.high %v66_v49, %v70_v31 }
  0x39   :  { %5659 = vst [vmem:[#allocation64_spill] sm:$0xff] %v3749_v26  ;;  %5662 = vst [vmem:[#allocation67_spill] sm:$0xff] %v3771_v59 }
  0x3a   :  { %858 = vmatpush1.bf16.msra.mxu0 %v3714_v50  ;;  %899 = vmatpush1.bf16.msra.mxu1 %v3718_v12  ;;  %5663 = vst [vmem:[#allocation68_spill] sm:$0xff] %v3774_v32 }
  0x3b   :  { %859 = vmatprep.subr.bf16.mxu0 %v3720_v14  ;;  %900 = vmatprep.subr.bf16.mxu1 %v3723_v63  ;;  %v81_v63 = vld [vmem:[%s5317_s1 + $0x90] sm:$0xff] }
  0x3c   :  { %v85_v14 = vld [vmem:[%s5317_s1 + $0xb0] sm:$0xff] }
  0x3e   :  { %860 = vmatpush1.bf16.msra.mxu0 %v3738_v0  ;;  %901 = vmatpush1.bf16.msra.mxu1 %v3744_v47  ;;  %v3798_v47 = vcombine.high %v73_v55, %v77_v62 }
  0x3f   :  { %861 = vmatprep.subr.bf16.mxu0 %v3746_v48  ;;  %902 = vmatprep.subr.bf16.mxu1 %v3749_v26  ;;  %v3060_v54 = vpop.eup %3059  ;;  %v3792_v26 = vcombine.low %v65_v25, %v69_v24  ;;  %v82_v25 = vld [vmem:[%s5317_s1 + $0x98] sm:$0xff] }
  0x40   :  { %5666 = vst [vmem:[#allocation71_spill] sm:$0xff] %v3798_v47  ;;  %v86_v24 = vld [vmem:[%s5317_s1 + $0xb8] sm:$0xff] }
  0x41   :  { %5664 = vst [vmem:[#allocation69_spill] sm:$0xff] %v3792_v26 }
  0x42   :  { %862 = vmatpush1.bf16.msra.mxu0 %v3765_v40  ;;  %903 = vmatpush1.bf16.msra.mxu1 %v3769_v41  ;;  %v3062_v61 = vpop.eup %3061  ;;  %v74_v40 = vld [vmem:[%s5317_s1 + $0x58] sm:$0xff] }
  0x43   :  { %913 = vmatprep.subr.bf16.mxu0 %v3771_v59  ;;  %954 = vmatprep.subr.bf16.mxu1 %v3774_v32  ;;  %v78_v59 = vld [vmem:[%s5317_s1 + $0x78] sm:$0xff]  ;;  %v51_v41 = vmul.f32 %v3062_v61, %v3060_v54  ;;  %v3794_v32 = vcombine.low %v66_v49, %v70_v31  ;;  %v3818_v49 = vcombine.low %v73_v55, %v77_v62  ;;  %v89_v61 = vld [vmem:[%s5317_s1 + $0xd0] sm:$0xff]  ;;  %v5672_v55 = vmov 0.0|0.0  }
  0x44   :  { %v3800_v0 = vcombine.high %v74_v40, %v78_v59  ;;  %v3820_v31 = vcombine.low %v74_v40, %v78_v59  ;;  %v3826_v54 = vcombine.high %v82_v25, %v86_v24  ;;  %v90_v40 = vld [vmem:[%s5317_s1 + $0xd8] sm:$0xff]  ;;  %v3844_v62 = vcombine.low %v81_v63, %v85_v14 }
  0x45   :  { %5665 = vst [vmem:[#allocation70_spill] sm:$0xff] %v3794_v32  ;;  %v3796_v48 = vpack.c.bf16 %v51_v41, %v51_v41  ;;  %5668 = vst [vmem:[#allocation73_spill] sm:$0xff] %v3818_v49  ;;  %v3824_v41 = vcombine.high %v81_v63, %v85_v14  ;;  %v94_v59 = vld [vmem:[%s5317_s1 + $0xf8] sm:$0xff] }
  0x46   :  { %5667 = vst [vmem:[#allocation72_spill] sm:$0xff] %v3800_v0  ;;  %5669 = vst [vmem:[#allocation74_spill] sm:$0xff] %v3820_v31  ;;  %v98_v63 = vld [vmem:[%s5317_s1 + $0x118] sm:$0xff] }
  0x47   :  { %905 = vmatmul.mubr.bf16.vlgmr.msra.gmra.mrb[0].mxu1 %v3796_v48  ;;  %864 = vmatmul.mubr.bf16.vlgmr.msra.gmra.mrb[0].mxu0 %v3796_v48  ;;  %5670 = vst [vmem:[#allocation75_spill] sm:$0xff] %v3824_v41  ;;  %5671 = vst [vmem:[#allocation76_spill] sm:$0xff] %v3826_v54  ;;  %v102_v14 = vld [vmem:[%s5317_s1 + $0x138] sm:$0xff] }
  0x48   :  { %914 = vmatpush1.bf16.msra.mxu0 %v3792_v26  ;;  %955 = vmatpush1.bf16.msra.mxu1 %v3794_v32  ;;  %v93_v32 = vld [vmem:[%s5317_s1 + $0xf0] sm:$0xff]  ;;  %5673 = vst [vmem:[#allocation77_spill] sm:$0xff] %v3844_v62  ;;  %v3852_v26 = vcombine.high %v90_v40, %v94_v59 }
  0x49   :  { %915 = vmatprep.subr.bf16.mxu0 %v3798_v47  ;;  %956 = vmatprep.subr.bf16.mxu1 %v3800_v0  ;;  %v3846_v0 = vcombine.low %v82_v25, %v86_v24  ;;  %v3850_v47 = vcombine.high %v89_v61, %v93_v32  ;;  %v3868_v25 = vcombine.low %v89_v61, %v93_v32  ;;  %v106_v32 = vld [vmem:[%s5317_s1 + $0x158] sm:$0xff] }
  0x4a   :  { %945 = vmatprep.mubr.bf16.mxu0 %v5672_v55  ;;  %986 = vmatprep.mubr.bf16.mxu1 %v5672_v55  ;;  %5676 = vst [vmem:[#allocation80_spill] sm:$0xff] %v3852_v26  ;;  %v97_v55 = vld [vmem:[%s5317_s1 + $0x110] sm:$0xff]  ;;  %v3870_v24 = vcombine.low %v90_v40, %v94_v59  ;;  %v110_v61 = vld [vmem:[%s5317_s1 + $0x178] sm:$0xff]  ;;  %v3894_v59 = vcombine.low %v98_v63, %v102_v14 }
  0x4b   :  { %5674 = vst [vmem:[#allocation78_spill] sm:$0xff] %v3846_v0  ;;  %5675 = vst [vmem:[#allocation79_spill] sm:$0xff] %v3850_v47 }
  0x4c   :  { %916 = vmatpush1.bf16.msra.mxu0 %v3818_v49  ;;  %957 = vmatpush1.bf16.msra.mxu1 %v3820_v31  ;;  %v101_v31 = vld [vmem:[%s5317_s1 + $0x130] sm:$0xff]  ;;  %5677 = vst [vmem:[#allocation81_spill] sm:$0xff] %v3868_v25  ;;  %5678 = vst [vmem:[#allocation82_spill] sm:$0xff] %v3870_v24 }
  0x4d   :  { %917 = vmatprep.subr.bf16.mxu0 %v3824_v41  ;;  %958 = vmatprep.subr.bf16.mxu1 %v3826_v54  ;;  %v3874_v54 = vcombine.high %v97_v55, %v101_v31  ;;  %v3876_v41 = vcombine.high %v98_v63, %v102_v14  ;;  %v105_v49 = vld [vmem:[%s5317_s1 + $0x150] sm:$0xff]  ;;  %v3892_v40 = vcombine.low %v97_v55, %v101_v31  ;;  %v114_v31 = vld [vmem:[%s5317_s1 + $0x198] sm:$0xff] }
  0x4e   :  { %5682 = vst [vmem:[#allocation86_spill] sm:$0xff] %v3894_v59  ;;  %v118_v55 = vld [vmem:[%s5317_s1 + $0x1b8] sm:$0xff]  ;;  %v3918_v14 = vcombine.low %v106_v32, %v110_v61 }
  0x4f   :  { %5679 = vst [vmem:[#allocation83_spill] sm:$0xff] %v3874_v54  ;;  %5680 = vst [vmem:[#allocation84_spill] sm:$0xff] %v3876_v41 }
  0x50   :  { %918 = vmatpush1.bf16.msra.mxu0 %v3844_v62  ;;  %959 = vmatpush1.bf16.msra.mxu1 %v3846_v0  ;;  %v109_v0 = vld [vmem:[%s5317_s1 + $0x170] sm:$0xff]  ;;  %5681 = vst [vmem:[#allocation85_spill] sm:$0xff] %v3892_v40  ;;  %5686 = vst [vmem:[#allocation90_spill] sm:$0xff] %v3918_v14 }
  0x51   :  { %919 = vmatprep.subr.bf16.mxu0 %v3850_v47  ;;  %960 = vmatprep.subr.bf16.mxu1 %v3852_v26  ;;  %v3898_v26 = vcombine.high %v105_v49, %v109_v0  ;;  %v3900_v47 = vcombine.high %v106_v32, %v110_v61  ;;  %v113_v62 = vld [vmem:[%s5317_s1 + $0x190] sm:$0xff]  ;;  %v3916_v63 = vcombine.low %v105_v49, %v109_v0  ;;  %v122_v0 = vld [vmem:[%s5317_s1 + $0x1d8] sm:$0xff] }
  0x52   :  { %v126_v49 = vld [vmem:[%s5317_s1 + $0x1f8] sm:$0xff]  ;;  %v3942_v61 = vcombine.low %v114_v31, %v118_v55 }
  0x53   :  { %5683 = vst [vmem:[#allocation87_spill] sm:$0xff] %v3898_v26  ;;  %5684 = vst [vmem:[#allocation88_spill] sm:$0xff] %v3900_v47 }
  0x54   :  { %920 = vmatpush1.bf16.msra.mxu0 %v3868_v25  ;;  %961 = vmatpush1.bf16.msra.mxu1 %v3870_v24  ;;  %v117_v24 = vld [vmem:[%s5317_s1 + $0x1b0] sm:$0xff]  ;;  %5685 = vst [vmem:[#allocation89_spill] sm:$0xff] %v3916_v63  ;;  %5690 = vst [vmem:[#allocation94_spill] sm:$0xff] %v3942_v61 }
  0x55   :  { %921 = vmatprep.subr.bf16.mxu0 %v3874_v54  ;;  %962 = vmatprep.subr.bf16.mxu1 %v3876_v41  ;;  %v3922_v41 = vcombine.high %v113_v62, %v117_v24  ;;  %v3924_v54 = vcombine.high %v114_v31, %v118_v55  ;;  %v121_v25 = vld [vmem:[%s5317_s1 + $0x1d0] sm:$0xff]  ;;  %v3940_v32 = vcombine.low %v113_v62, %v117_v24  ;;  %v130_v62 = vld [vmem:[%s5317_s1 + $0x218] sm:$0xff] }
  0x56   :  { %v134_v24 = vld [vmem:[%s5317_s1 + $0x238] sm:$0xff]  ;;  %v3966_v55 = vcombine.low %v122_v0, %v126_v49 }
  0x57   :  { %5687 = vst [vmem:[#allocation91_spill] sm:$0xff] %v3922_v41  ;;  %5688 = vst [vmem:[#allocation92_spill] sm:$0xff] %v3924_v54 }
  0x58   :  { %922 = vmatpush1.bf16.msra.mxu0 %v3892_v40  ;;  %963 = vmatpush1.bf16.msra.mxu1 %v3894_v59  ;;  %v125_v59 = vld [vmem:[%s5317_s1 + $0x1f0] sm:$0xff]  ;;  %5689 = vst [vmem:[#allocation93_spill] sm:$0xff] %v3940_v32  ;;  %5694 = vst [vmem:[#allocation98_spill] sm:$0xff] %v3966_v55 }
  0x59   :  { %923 = vmatprep.subr.bf16.mxu0 %v3898_v26  ;;  %964 = vmatprep.subr.bf16.mxu1 %v3900_v47  ;;  %v3946_v47 = vcombine.high %v121_v25, %v125_v59  ;;  %v3948_v26 = vcombine.high %v122_v0, %v126_v49  ;;  %v129_v40 = vld [vmem:[%s5317_s1 + $0x210] sm:$0xff]  ;;  %v3964_v31 = vcombine.low %v121_v25, %v125_v59  ;;  %v138_v25 = vld [vmem:[%s5317_s1 + $0x258] sm:$0xff] }
  0x5a   :  { %v142_v59 = vld [vmem:[%s5317_s1 + $0x278] sm:$0xff]  ;;  %v3990_v49 = vcombine.low %v130_v62, %v134_v24 }
  0x5b   :  { %5691 = vst [vmem:[#allocation95_spill] sm:$0xff] %v3946_v47  ;;  %5692 = vst [vmem:[#allocation96_spill] sm:$0xff] %v3948_v26 }
  0x5c   :  { %924 = vmatpush1.bf16.msra.mxu0 %v3916_v63  ;;  %965 = vmatpush1.bf16.msra.mxu1 %v3918_v14  ;;  %v133_v14 = vld [vmem:[%s5317_s1 + $0x230] sm:$0xff]  ;;  %5693 = vst [vmem:[#allocation97_spill] sm:$0xff] %v3964_v31  ;;  %5698 = vst [vmem:[#allocation102_spill] sm:$0xff] %v3990_v49 }
  0x5d   :  { %925 = vmatprep.subr.bf16.mxu0 %v3922_v41  ;;  %966 = vmatprep.subr.bf16.mxu1 %v3924_v54  ;;  %v3970_v54 = vcombine.high %v129_v40, %v133_v14  ;;  %v3972_v41 = vcombine.high %v130_v62, %v134_v24  ;;  %v137_v63 = vld [vmem:[%s5317_s1 + $0x250] sm:$0xff]  ;;  %v3988_v0 = vcombine.low %v129_v40, %v133_v14  ;;  %v146_v40 = vld [vmem:[%s5317_s1 + $0x298] sm:$0xff] }
  0x5e   :  { %v150_v14 = vld [vmem:[%s5317_s1 + $0x2b8] sm:$0xff]  ;;  %v4014_v24 = vcombine.low %v138_v25, %v142_v59 }
  0x5f   :  { %5695 = vst [vmem:[#allocation99_spill] sm:$0xff] %v3970_v54  ;;  %5696 = vst [vmem:[#allocation100_spill] sm:$0xff] %v3972_v41 }
  0x60   :  { %926 = vmatpush1.bf16.msra.mxu0 %v3940_v32  ;;  %967 = vmatpush1.bf16.msra.mxu1 %v3942_v61  ;;  %v141_v61 = vld [vmem:[%s5317_s1 + $0x270] sm:$0xff]  ;;  %5697 = vst [vmem:[#allocation101_spill] sm:$0xff] %v3988_v0  ;;  %5702 = vst [vmem:[#allocation106_spill] sm:$0xff] %v4014_v24 }
  0x61   :  { %927 = vmatprep.subr.bf16.mxu0 %v3946_v47  ;;  %968 = vmatprep.subr.bf16.mxu1 %v3948_v26  ;;  %v3994_v26 = vcombine.high %v137_v63, %v141_v61  ;;  %v3996_v47 = vcombine.high %v138_v25, %v142_v59  ;;  %v145_v32 = vld [vmem:[%s5317_s1 + $0x290] sm:$0xff]  ;;  %v4012_v62 = vcombine.low %v137_v63, %v141_v61  ;;  %v154_v63 = vld [vmem:[%s5317_s1 + $0x2d8] sm:$0xff] }
  0x62   :  { %v158_v61 = vld [vmem:[%s5317_s1 + $0x2f8] sm:$0xff]  ;;  %v4038_v59 = vcombine.low %v146_v40, %v150_v14 }
  0x63   :  { %5699 = vst [vmem:[#allocation103_spill] sm:$0xff] %v3994_v26  ;;  %5700 = vst [vmem:[#allocation104_spill] sm:$0xff] %v3996_v47 }
  0x64   :  { %928 = vmatpush1.bf16.msra.mxu0 %v3964_v31  ;;  %969 = vmatpush1.bf16.msra.mxu1 %v3966_v55  ;;  %v149_v55 = vld [vmem:[%s5317_s1 + $0x2b0] sm:$0xff]  ;;  %5701 = vst [vmem:[#allocation105_spill] sm:$0xff] %v4012_v62  ;;  %5706 = vst [vmem:[#allocation110_spill] sm:$0xff] %v4038_v59 }
  0x65   :  { %929 = vmatprep.subr.bf16.mxu0 %v3970_v54  ;;  %970 = vmatprep.subr.bf16.mxu1 %v3972_v41  ;;  %v4018_v41 = vcombine.high %v145_v32, %v149_v55  ;;  %v4020_v54 = vcombine.high %v146_v40, %v150_v14  ;;  %v153_v31 = vld [vmem:[%s5317_s1 + $0x2d0] sm:$0xff]  ;;  %v4036_v25 = vcombine.low %v145_v32, %v149_v55  ;;  %v162_v32 = vld [vmem:[%s5317_s1 + $0x318] sm:$0xff] }
  0x66   :  { %v166_v55 = vld [vmem:[%s5317_s1 + $0x338] sm:$0xff]  ;;  %v4062_v14 = vcombine.low %v154_v63, %v158_v61 }
  0x67   :  { %5703 = vst [vmem:[#allocation107_spill] sm:$0xff] %v4018_v41  ;;  %5704 = vst [vmem:[#allocation108_spill] sm:$0xff] %v4020_v54 }
  0x68   :  { %930 = vmatpush1.bf16.msra.mxu0 %v3988_v0  ;;  %971 = vmatpush1.bf16.msra.mxu1 %v3990_v49  ;;  %v157_v49 = vld [vmem:[%s5317_s1 + $0x2f0] sm:$0xff]  ;;  %5705 = vst [vmem:[#allocation109_spill] sm:$0xff] %v4036_v25  ;;  %5710 = vst [vmem:[#allocation114_spill] sm:$0xff] %v4062_v14 }
  0x69   :  { %931 = vmatprep.subr.bf16.mxu0 %v3994_v26  ;;  %972 = vmatprep.subr.bf16.mxu1 %v3996_v47  ;;  %v4042_v47 = vcombine.high %v153_v31, %v157_v49  ;;  %v4044_v26 = vcombine.high %v154_v63, %v158_v61  ;;  %v161_v0 = vld [vmem:[%s5317_s1 + $0x310] sm:$0xff]  ;;  %v4060_v40 = vcombine.low %v153_v31, %v157_v49  ;;  %v170_v31 = vld [vmem:[%s5317_s1 + $0x358] sm:$0xff] }
  0x6a   :  { %v174_v49 = vld [vmem:[%s5317_s1 + $0x378] sm:$0xff]  ;;  %v4086_v61 = vcombine.low %v162_v32, %v166_v55 }
  0x6b   :  { %5707 = vst [vmem:[#allocation111_spill] sm:$0xff] %v4042_v47  ;;  %5708 = vst [vmem:[#allocation112_spill] sm:$0xff] %v4044_v26 }
  0x6c   :  { %932 = vmatpush1.bf16.msra.mxu0 %v4012_v62  ;;  %973 = vmatpush1.bf16.msra.mxu1 %v4014_v24  ;;  %v165_v24 = vld [vmem:[%s5317_s1 + $0x330] sm:$0xff]  ;;  %5709 = vst [vmem:[#allocation113_spill] sm:$0xff] %v4060_v40  ;;  %5714 = vst [vmem:[#allocation118_spill] sm:$0xff] %v4086_v61 }
  0x6d   :  { %933 = vmatprep.subr.bf16.mxu0 %v4018_v41  ;;  %974 = vmatprep.subr.bf16.mxu1 %v4020_v54  ;;  %v4066_v54 = vcombine.high %v161_v0, %v165_v24  ;;  %v4068_v41 = vcombine.high %v162_v32, %v166_v55  ;;  %v169_v62 = vld [vmem:[%s5317_s1 + $0x350] sm:$0xff]  ;;  %v4084_v63 = vcombine.low %v161_v0, %v165_v24  ;;  %v178_v0 = vld [vmem:[%s5317_s1 + $0x398] sm:$0xff] }
  0x6e   :  { %v182_v24 = vld [vmem:[%s5317_s1 + $0x3b8] sm:$0xff]  ;;  %v4110_v55 = vcombine.low %v170_v31, %v174_v49 }
  0x6f   :  { %5711 = vst [vmem:[#allocation115_spill] sm:$0xff] %v4066_v54  ;;  %5712 = vst [vmem:[#allocation116_spill] sm:$0xff] %v4068_v41 }
  0x70   :  { %934 = vmatpush1.bf16.msra.mxu0 %v4036_v25  ;;  %975 = vmatpush1.bf16.msra.mxu1 %v4038_v59  ;;  %v173_v59 = vld [vmem:[%s5317_s1 + $0x370] sm:$0xff]  ;;  %5713 = vst [vmem:[#allocation117_spill] sm:$0xff] %v4084_v63  ;;  %5718 = vst [vmem:[#allocation122_spill] sm:$0xff] %v4110_v55 }
  0x71   :  { %935 = vmatprep.subr.bf16.mxu0 %v4042_v47  ;;  %976 = vmatprep.subr.bf16.mxu1 %v4044_v26  ;;  %v4090_v26 = vcombine.high %v169_v62, %v173_v59  ;;  %v4092_v47 = vcombine.high %v170_v31, %v174_v49  ;;  %v177_v25 = vld [vmem:[%s5317_s1 + $0x390] sm:$0xff]  ;;  %v4108_v32 = vcombine.low %v169_v62, %v173_v59  ;;  %v186_v62 = vld [vmem:[%s5317_s1 + $0x3d8] sm:$0xff] }
  0x72   :  { %v190_v59 = vld [vmem:[%s5317_s1 + $0x3f8] sm:$0xff]  ;;  %v4134_v49 = vcombine.low %v178_v0, %v182_v24 }
  0x73   :  { %5715 = vst [vmem:[#allocation119_spill] sm:$0xff] %v4090_v26  ;;  %5716 = vst [vmem:[#allocation120_spill] sm:$0xff] %v4092_v47 }
  0x74   :  { %936 = vmatpush1.bf16.msra.mxu0 %v4060_v40  ;;  %977 = vmatpush1.bf16.msra.mxu1 %v4062_v14  ;;  %v181_v14 = vld [vmem:[%s5317_s1 + $0x3b0] sm:$0xff]  ;;  %5717 = vst [vmem:[#allocation121_spill] sm:$0xff] %v4108_v32  ;;  %5722 = vst [vmem:[#allocation126_spill] sm:$0xff] %v4134_v49 }
  0x75   :  { %937 = vmatprep.subr.bf16.mxu0 %v4066_v54  ;;  %978 = vmatprep.subr.bf16.mxu1 %v4068_v41  ;;  %v4114_v41 = vcombine.high %v177_v25, %v181_v14  ;;  %v4116_v54 = vcombine.high %v178_v0, %v182_v24  ;;  %v185_v40 = vld [vmem:[%s5317_s1 + $0x3d0] sm:$0xff]  ;;  %v4132_v31 = vcombine.low %v177_v25, %v181_v14  ;;  %v5730_v14 = vld [vmem:[#allocation46_spill] sm:$0xff]  ;;  %v5733_v24 = vld [vmem:[#allocation49_spill] sm:$0xff] }
  0x76   :  { %v5728_v25 = vld [vmem:[#allocation44_spill] sm:$0xff] }
  0x77   :  { %5719 = vst [vmem:[#allocation123_spill] sm:$0xff] %v4114_v41  ;;  %5720 = vst [vmem:[#allocation124_spill] sm:$0xff] %v4116_v54  ;;  %v5732_v0 = vld [vmem:[#allocation48_spill] sm:$0xff] }
  0x78   :  { %938 = vmatpush1.bf16.msra.mxu0 %v4084_v63  ;;  %979 = vmatpush1.bf16.msra.mxu1 %v4086_v61  ;;  %v189_v61 = vld [vmem:[%s5317_s1 + $0x3f0] sm:$0xff]  ;;  %5721 = vst [vmem:[#allocation125_spill] sm:$0xff] %v4132_v31 }
  0x79   :  { %939 = vmatprep.subr.bf16.mxu0 %v4090_v26  ;;  %980 = vmatprep.subr.bf16.mxu1 %v4092_v47  ;;  %v4138_v47 = vcombine.high %v185_v40, %v189_v61  ;;  %v4140_v26 = vcombine.high %v186_v62, %v190_v59  ;;  %v4144_v63 = vcombine.low %v185_v40, %v189_v61  ;;  %v5729_v40 = vld [vmem:[#allocation45_spill] sm:$0xff]  ;;  %v5731_v61 = vld [vmem:[#allocation47_spill] sm:$0xff] }
  0x7b   :  { %5723 = vst [vmem:[#allocation127_spill] sm:$0xff] %v4138_v47  ;;  %5724 = vst [vmem:[#allocation128_spill] sm:$0xff] %v4140_v26 }
  0x7c   :  { %940 = vmatpush1.bf16.msra.mxu0 %v4108_v32  ;;  %981 = vmatpush1.bf16.msra.mxu1 %v4110_v55  ;;  %5725 = vst [vmem:[#allocation129_spill] sm:$0xff] %v4144_v63  ;;  %v4146_v32 = vcombine.low %v186_v62, %v190_v59  ;;  %v5734_v62 = vld [vmem:[#allocation50_spill] sm:$0xff]  ;;  %v5735_v59 = vld [vmem:[#allocation51_spill] sm:$0xff] }
  0x7d   :  { %941 = vmatprep.subr.bf16.mxu0 %v4114_v41  ;;  %982 = vmatprep.subr.bf16.mxu1 %v4116_v54 }
  0x7e   :  { %5726 = vst [vmem:[#allocation130_spill] sm:$0xff] %v4146_v32 }
  0x80   :  { %942 = vmatpush1.bf16.msra.mxu0 %v4132_v31  ;;  %983 = vmatpush1.bf16.msra.mxu1 %v4134_v49 }
  0x81   :  { %943 = vmatprep.subr.bf16.mxu0 %v4138_v47  ;;  %984 = vmatprep.subr.bf16.mxu1 %v4140_v26 }
  0x84   :  { %944 = vmatpush1.bf16.msra.mxu0 %v4144_v63  ;;  %985 = vmatpush1.bf16.msra.mxu1 %v4146_v32 }
  0x85   :  { %1068 = vmatprep.subr.bf16.mxu0 %v3372_v4  ;;  %1109 = vmatprep.subr.bf16.mxu1 %v3385_v9 }
  0x87   :  { %946 = vmatmul.mubr.bf16.vlgmr.msra.gmra.mrb[4].mxu0 %v3796_v48  ;;  %987 = vmatmul.mubr.bf16.vlgmr.msra.gmra.mrb[4].mxu1 %v3796_v48  ;;  %v5727_v48 = vld [vmem:[#allocation43_spill] sm:$0xff] }
  0x88   :  { %1069 = vmatpush1.bf16.msra.mxu0 %v3377_v6  ;;  %1110 = vmatpush1.bf16.msra.mxu1 %v3387_v10 }
  0x89   :  { %1070 = vmatprep.subr.bf16.mxu0 %v3389_v11  ;;  %1111 = vmatprep.subr.bf16.mxu1 %v3401_v15 }
  0x8c   :  { %1071 = vmatpush1.bf16.msra.mxu0 %v3414_v19  ;;  %1112 = vmatpush1.bf16.msra.mxu1 %v3418_v20 }
  0x8d   :  { %1072 = vmatprep.subr.bf16.mxu0 %v3420_v21  ;;  %1113 = vmatprep.subr.bf16.mxu1 %v3423_v22 }
  0x90   :  { %1073 = vmatpush1.bf16.msra.mxu0 %v3438_v27  ;;  %1114 = vmatpush1.bf16.msra.mxu1 %v3442_v28 }
  0x91   :  { %1074 = vmatprep.subr.bf16.mxu0 %v3444_v29  ;;  %1115 = vmatprep.subr.bf16.mxu1 %v3447_v30 }
  0x94   :  { %1075 = vmatpush1.bf16.msra.mxu0 %v3462_v35  ;;  %1116 = vmatpush1.bf16.msra.mxu1 %v3466_v36 }
  0x95   :  { %1076 = vmatprep.subr.bf16.mxu0 %v3468_v37  ;;  %1117 = vmatprep.subr.bf16.mxu1 %v3471_v38 }
  0x98   :  { %1077 = vmatpush1.bf16.msra.mxu0 %v3486_v43  ;;  %1118 = vmatpush1.bf16.msra.mxu1 %v3490_v44 }
  0x99   :  { %1078 = vmatprep.subr.bf16.mxu0 %v3492_v45  ;;  %1119 = vmatprep.subr.bf16.mxu1 %v3495_v46 }
  0x9c   :  { %1079 = vmatpush1.bf16.msra.mxu0 %v3510_v51  ;;  %1120 = vmatpush1.bf16.msra.mxu1 %v3514_v52 }
  0x9d   :  { %1080 = vmatprep.subr.bf16.mxu0 %v3516_v53  ;;  %1121 = vmatprep.subr.bf16.mxu1 %v3528_v57 }
  0xa0   :  { %1081 = vmatpush1.bf16.msra.mxu0 %v3543_v1  ;;  %1122 = vmatpush1.bf16.msra.mxu1 %v3547_v2 }
  0xa1   :  { %1082 = vmatprep.subr.bf16.mxu0 %v3549_v5  ;;  %1123 = vmatprep.subr.bf16.mxu1 %v3552_v7 }
  0xa4   :  { %1083 = vmatpush1.bf16.msra.mxu0 %v3567_v16  ;;  %1124 = vmatpush1.bf16.msra.mxu1 %v3571_v17 }
  0xa5   :  { %1084 = vmatprep.subr.bf16.mxu0 %v3573_v18  ;;  %1125 = vmatprep.subr.bf16.mxu1 %v3576_v23 }
  0xa8   :  { %1085 = vmatpush1.bf16.msra.mxu0 %v3594_v33  ;;  %1126 = vmatpush1.bf16.msra.mxu1 %v3598_v34 }
  0xa9   :  { %1086 = vmatprep.subr.bf16.mxu0 %v3600_v39  ;;  %1127 = vmatprep.subr.bf16.mxu1 %v3603_v42 }
  0xac   :  { %1087 = vmatpush1.bf16.msra.mxu0 %v3618_v56  ;;  %1128 = vmatpush1.bf16.msra.mxu1 %v3620_v58 }
  0xad   :  { %1088 = vmatprep.subr.bf16.mxu0 %v3624_v60  ;;  %1129 = vmatprep.subr.bf16.mxu1 %v5727_v48 }
  0xb0   :  { %1089 = vmatpush1.bf16.msra.mxu0 %v5728_v25  ;;  %1130 = vmatpush1.bf16.msra.mxu1 %v5729_v40  ;;  %v5736_v25 = vld [vmem:[#allocation55_spill] sm:$0xff] }
  0xb1   :  { %1090 = vmatprep.subr.bf16.mxu0 %v5730_v14  ;;  %1131 = vmatprep.subr.bf16.mxu1 %v5731_v61  ;;  %v5737_v61 = vld [vmem:[#allocation58_spill] sm:$0xff] }
  0xb4   :  { %1091 = vmatpush1.bf16.msra.mxu0 %v5732_v0  ;;  %1132 = vmatpush1.bf16.msra.mxu1 %v5733_v24  ;;  %v5738_v0 = vld [vmem:[#allocation59_spill] sm:$0xff]  ;;  %v5739_v24 = vld [vmem:[#allocation60_spill] sm:$0xff] }
  0xb5   :  { %1092 = vmatprep.subr.bf16.mxu0 %v5734_v62  ;;  %1133 = vmatprep.subr.bf16.mxu1 %v5735_v59  ;;  %v5740_v62 = vld [vmem:[#allocation62_spill] sm:$0xff]  ;;  %v5741_v59 = vld [vmem:[#allocation63_spill] sm:$0xff] }
  0xb8   :  { %1093 = vmatpush1.bf16.msra.mxu0 %v3690_v8  ;;  %1134 = vmatpush1.bf16.msra.mxu1 %v3694_v13  ;;  %v5742_v8 = vld [vmem:[#allocation64_spill] sm:$0xff]  ;;  %v5743_v13 = vld [vmem:[#allocation65_spill] sm:$0xff] }
  0xb9   :  { %1094 = vmatprep.subr.bf16.mxu0 %v3696_v3  ;;  %1135 = vmatprep.subr.bf16.mxu1 %v5736_v25  ;;  %v5744_v3 = vld [vmem:[#allocation66_spill] sm:$0xff]  ;;  %v5745_v25 = vld [vmem:[#allocation67_spill] sm:$0xff] }
  0xbc   :  { %1095 = vmatpush1.bf16.msra.mxu0 %v3714_v50  ;;  %1136 = vmatpush1.bf16.msra.mxu1 %v3718_v12  ;;  %v5746_v50 = vld [vmem:[#allocation68_spill] sm:$0xff] }
  0xbd   :  { %1096 = vmatprep.subr.bf16.mxu0 %v5737_v61  ;;  %1137 = vmatprep.subr.bf16.mxu1 %v5738_v0  ;;  %v2704_v0 = vld [vmem:[%s5318_s0 + $0x50] sm:$0xff] }
  0xc0   :  { %1097 = vmatpush1.bf16.msra.mxu0 %v5739_v24  ;;  %1138 = vmatpush1.bf16.msra.mxu1 %v5740_v62  ;;  %v2702_v62 = vld [vmem:[%s5318_s0 + $0x40] sm:$0xff] }
  0xc1   :  { %1098 = vmatprep.subr.bf16.mxu0 %v5741_v59  ;;  %1139 = vmatprep.subr.bf16.mxu1 %v5742_v8  ;;  %v2703_v8 = vld [vmem:[%s5318_s0 + $0x48] sm:$0xff] }
  0xc4   :  { %1099 = vmatpush1.bf16.msra.mxu0 %v5743_v13  ;;  %1140 = vmatpush1.bf16.msra.mxu1 %v5744_v3 }
  0xc5   :  { %1150 = vmatprep.subr.bf16.mxu0 %v5745_v25  ;;  %1191 = vmatprep.subr.bf16.mxu1 %v5746_v50 }
 0x11a   :  { %v906_v59 = vpop.f32.mrb[0].mxu1  ;;  %v865_v13 = vpop.f32.mrb[0].mxu0 }
 0x11b   :  { %v907_v24 = vadd.f32 %v2704_v0, %v906_v59  ;;  %v866_v3 = vadd.f32 %v2702_v62, %v865_v13  ;;  %v908_v61 = vpop.f32.mrb[1].mxu1  ;;  %v867_v25 = vpop.f32.mrb[1].mxu0 }
 0x11c   :  { %v868_v12 = vadd.f32 %v2703_v8, %v867_v25  ;;  %v910_v50 = vpop.f32.mrb[2].mxu1  ;;  %v869_v14 = vpop.f32.mrb[2].mxu0 }
 0x11d   :  { %v2840_v40 = vmul.f32 -1.442695, %v907_v24  ;;  %v2838_v48 = vmul.f32 -1.442695, %v866_v3  ;;  %v911_v60 = vpop.f32.mrb[3].mxu1  ;;  %v870_v58 = vpop.f32.mrb[3].mxu0 }
 0x11e   :  { %v2839_v56 = vmul.f32 -1.442695, %v868_v12  ;;  %v5747_v60 = vld [vmem:[#allocation61_spill] sm:$0xff] }
 0x11f   :  { %3063 = vpow2.f32 %v2840_v40 }
 0x120   :  { %3065 = vpow2.f32 %v2838_v48 }
 0x121   :  { %3067 = vpow2.f32 %v2839_v56 }
 0x129   :  { %v3064_v42 = vpop.eup %3063 }
 0x12a   :  { %v3066_v39 = vpop.eup %3065  ;;  %v1021_v34 = vadd.f32 1.0, %v3064_v42  ;;  %v2706_v42 = vld [vmem:[%s5318_s0 + $0x60] sm:$0xff] }
 0x12b   :  { %v1019_v33 = vadd.f32 1.0, %v3066_v39  ;;  %v3068_v23 = vpop.eup %3067 }
 0x12c   :  { %3069 = vrcp.f32 %v1021_v34  ;;  %v1020_v13 = vadd.f32 1.0, %v3068_v23  ;;  %v2708_v23 = vld [vmem:[%s5318_s0 + $0x70] sm:$0xff] }
 0x12d   :  { %3071 = vrcp.f32 %v1019_v33  ;;  %v2707_v33 = vld [vmem:[%s5318_s0 + $0x68] sm:$0xff] }
 0x12e   :  { %3073 = vrcp.f32 %v1020_v13 }
 0x136   :  { %v3070_v8 = vpop.eup %3069 }
 0x137   :  { %v1043_v50 = vmul.f32 2.0, %v3070_v8  ;;  %v3072_v25 = vpop.eup %3071 }
 0x138   :  { %v3074_v14 = vpop.eup %3073 }
 0x139   :  { %v2846_v3 = vadd.f32 -1.0, %v1043_v50  ;;  %v1045_v58 = vmul.f32 %v3074_v14, %v5747_v60  ;;  %v2705_v60 = vld [vmem:[%s5318_s0 + $0x58] sm:$0xff] }
 0x13b   :  { %v1046_v12 = vmul.f32 %v3072_v25, %v2846_v3 }
 0x13d   :  { %v4230_v40 = vadd.f32 %v1046_v12, %v1045_v58  ;;  %v2709_v58 = vld [vmem:[%s5318_s0 + $0x78] sm:$0xff]  ;;  %v909_v12 = vadd.f32 %v2705_v60, %v908_v61 }
 0x15a   :  { %v947_v34 = vpop.f32.mrb[4].mxu0  ;;  %v988_v39 = vpop.f32.mrb[4].mxu1 }
 0x15b   :  { %v948_v56 = vadd.f32 %v2706_v42, %v947_v34  ;;  %v989_v48 = vadd.f32 %v2708_v23, %v988_v39  ;;  %v949_v0 = vpop.f32.mrb[5].mxu0  ;;  %v990_v24 = vpop.f32.mrb[5].mxu1  ;;  %v2841_v23 = vmul.f32 -1.442695, %v909_v12 }
 0x15c   :  { %v950_v62 = vadd.f32 %v2707_v33, %v949_v0  ;;  %v951_v59 = vpop.f32.mrb[6].mxu0  ;;  %v992_v13 = vpop.f32.mrb[6].mxu1  ;;  %v991_v42 = vadd.f32 %v2709_v58, %v990_v24 }
 0x15d   :  { %v2842_v8 = vmul.f32 -1.442695, %v948_v56  ;;  %v2844_v50 = vmul.f32 -1.442695, %v989_v48  ;;  %v952_v25 = vpop.f32.mrb[7].mxu0  ;;  %v993_v14 = vpop.f32.mrb[7].mxu1 }
 0x15e   :  { %v2843_v3 = vmul.f32 -1.442695, %v950_v62  ;;  %v2845_v33 = vmul.f32 -1.442695, %v991_v42 }
 0x15f   :  { %3075 = vpow2.f32 %v2842_v8 }
 0x160   :  { %3077 = vpow2.f32 %v2844_v50 }
 0x161   :  { %3079 = vpow2.f32 %v2843_v3 }
 0x162   :  { %3081 = vpow2.f32 %v2841_v23 }
 0x163   :  { %3083 = vpow2.f32 %v2845_v33 }
 0x169   :  { %v3076_v34 = vpop.eup %3075 }
 0x16a   :  { %v3078_v39 = vpop.eup %3077  ;;  %v1023_v48 = vadd.f32 1.0, %v3076_v34 }
 0x16b   :  { %v3080_v56 = vpop.eup %3079  ;;  %v1025_v0 = vadd.f32 1.0, %v3078_v39 }
 0x16c   :  { %v1024_v62 = vadd.f32 1.0, %v3080_v56  ;;  %v3082_v59 = vpop.eup %3081 }
 0x16d   :  { %3085 = vrcp.f32 %v1025_v0  ;;  %v3084_v13 = vpop.eup %3083  ;;  %v1022_v24 = vadd.f32 1.0, %v3082_v59  ;;  %v5749_v59 = vld [vmem:[#allocation70_spill] sm:$0xff] }
 0x16e   :  { %3087 = vrcp.f32 %v1024_v62  ;;  %v1026_v60 = vadd.f32 1.0, %v3084_v13  ;;  %v5748_v62 = vld [vmem:[#allocation69_spill] sm:$0xff]  ;;  %v5750_v13 = vld [vmem:[#allocation71_spill] sm:$0xff] }
 0x16f   :  { %3089 = vrcp.f32 %v1023_v48 }
 0x170   :  { %3091 = vtanh.f32 %v4230_v40 }
 0x171   :  { %3093 = vrcp.f32 %v1022_v24  ;;  %v5755_v24 = vld [vmem:[#allocation76_spill] sm:$0xff] }
 0x172   :  { %3095 = vrcp.f32 %v1026_v60  ;;  %v5758_v60 = vld [vmem:[#allocation79_spill] sm:$0xff] }
 0x177   :  { %v3086_v8 = vpop.eup %3085 }
 0x178   :  { %v3088_v50 = vpop.eup %3087  ;;  %v1050_v25 = vmul.f32 2.0, %v3086_v8  ;;  %v5751_v8 = vld [vmem:[#allocation72_spill] sm:$0xff] }
 0x179   :  { %v3090_v61 = vpop.eup %3089  ;;  %v1052_v3 = vmul.f32 0.0, %v3088_v50  ;;  %v5752_v50 = vld [vmem:[#allocation73_spill] sm:$0xff] }
 0x17a   :  { %v2847_v14 = vadd.f32 -1.0, %v1050_v25  ;;  %v3092_v42 = vpop.eup %3091  ;;  %v5753_v25 = vld [vmem:[#allocation74_spill] sm:$0xff] }
 0x17b   :  { %v3094_v23 = vpop.eup %3093 }
 0x17c   :  { %v1053_v58 = vmul.f32 %v3090_v61, %v2847_v14  ;;  %v3096_v33 = vpop.eup %3095  ;;  %v1049_v39 = vmul.f32 %v3094_v23, %v3092_v42  ;;  %v5754_v61 = vld [vmem:[#allocation75_spill] sm:$0xff]  ;;  %v5756_v14 = vld [vmem:[#allocation77_spill] sm:$0xff]  ;;  %v5761_v23 = vld [vmem:[#allocation82_spill] sm:$0xff] }
 0x17d   :  { %v5760_v42 = vld [vmem:[#allocation81_spill] sm:$0xff] }
 0x17e   :  { %v4248_v12 = vadd.f32 %v1053_v58, %v1052_v3  ;;  %v4251_v0 = vpack.c.bf16 %v1049_v39, %v1049_v39  ;;  %v5757_v3 = vld [vmem:[#allocation78_spill] sm:$0xff]  ;;  %v5759_v58 = vld [vmem:[#allocation80_spill] sm:$0xff]  ;;  %v5764_v39 = vld [vmem:[#allocation85_spill] sm:$0xff] }
 0x180   :  { %3097 = vtanh.f32 %v4248_v12 }
 0x18a   :  { %v3098_v34 = vpop.eup %3097 }
 0x18b   :  { %v1056_v56 = vmul.f32 %v3098_v34, %v3096_v33  ;;  %v5762_v33 = vld [vmem:[#allocation83_spill] sm:$0xff]  ;;  %v5763_v34 = vld [vmem:[#allocation84_spill] sm:$0xff] }
 0x18d   :  { %v1067_v48 = vpack.c.bf16 %v1056_v56, %v1056_v56  ;;  %v5765_v56 = vld [vmem:[#allocation86_spill] sm:$0xff] }
 0x18f   :  { %1100 = vmatprep.mubr.bf16.mxu0 %v1067_v48  ;;  %1141 = vmatprep.mubr.bf16.mxu1 %v1067_v48 }
 0x190   :  { %1101 = vmatmul.mubr.bf16.vlgmr.msra.gmra.mrb[8].mxu0 %v4251_v0  ;;  %1142 = vmatmul.mubr.bf16.vlgmr.msra.gmra.mrb[8].mxu1 %v4251_v0 }
 0x191   :  { %1151 = vmatpush1.bf16.msra.mxu0 %v5748_v62  ;;  %1192 = vmatpush1.bf16.msra.mxu1 %v5749_v59 }
 0x192   :  { %1182 = vmatprep.mubr.bf16.mxu0 %v1067_v48  ;;  %1223 = vmatprep.mubr.bf16.mxu1 %v1067_v48  ;;  %v5766_v48 = vld [vmem:[#allocation87_spill] sm:$0xff] }
 0x193   :  { %1152 = vmatprep.subr.bf16.mxu0 %v5750_v13  ;;  %1193 = vmatprep.subr.bf16.mxu1 %v5751_v8 }
 0x195   :  { %1153 = vmatpush1.bf16.msra.mxu0 %v5752_v50  ;;  %1194 = vmatpush1.bf16.msra.mxu1 %v5753_v25 }
 0x196   :  { %1154 = vmatprep.subr.bf16.mxu0 %v5754_v61  ;;  %1195 = vmatprep.subr.bf16.mxu1 %v5755_v24 }
 0x199   :  { %1155 = vmatpush1.bf16.msra.mxu0 %v5756_v14  ;;  %1196 = vmatpush1.bf16.msra.mxu1 %v5757_v3  ;;  %v5767_v14 = vld [vmem:[#allocation88_spill] sm:$0xff]  ;;  %v5768_v3 = vld [vmem:[#allocation89_spill] sm:$0xff] }
 0x19a   :  { %1156 = vmatprep.subr.bf16.mxu0 %v5758_v60  ;;  %1197 = vmatprep.subr.bf16.mxu1 %v5759_v58  ;;  %v5769_v60 = vld [vmem:[#allocation90_spill] sm:$0xff]  ;;  %v5770_v58 = vld [vmem:[#allocation91_spill] sm:$0xff] }
 0x19d   :  { %1157 = vmatpush1.bf16.msra.mxu0 %v5760_v42  ;;  %1198 = vmatpush1.bf16.msra.mxu1 %v5761_v23  ;;  %v5771_v42 = vld [vmem:[#allocation92_spill] sm:$0xff]  ;;  %v5772_v23 = vld [vmem:[#allocation93_spill] sm:$0xff] }
 0x19e   :  { %1158 = vmatprep.subr.bf16.mxu0 %v5762_v33  ;;  %1199 = vmatprep.subr.bf16.mxu1 %v5763_v34  ;;  %v5773_v33 = vld [vmem:[#allocation94_spill] sm:$0xff]  ;;  %v5774_v34 = vld [vmem:[#allocation95_spill] sm:$0xff] }
 0x1a1   :  { %1159 = vmatpush1.bf16.msra.mxu0 %v5764_v39  ;;  %1200 = vmatpush1.bf16.msra.mxu1 %v5765_v56  ;;  %v5775_v39 = vld [vmem:[#allocation96_spill] sm:$0xff]  ;;  %v5776_v56 = vld [vmem:[#allocation97_spill] sm:$0xff] }
 0x1a2   :  { %1160 = vmatprep.subr.bf16.mxu0 %v5766_v48  ;;  %1201 = vmatprep.subr.bf16.mxu1 %v5767_v14  ;;  %v5777_v48 = vld [vmem:[#allocation98_spill] sm:$0xff]  ;;  %v5778_v14 = vld [vmem:[#allocation99_spill] sm:$0xff] }
 0x1a5   :  { %1161 = vmatpush1.bf16.msra.mxu0 %v5768_v3  ;;  %1202 = vmatpush1.bf16.msra.mxu1 %v5769_v60  ;;  %v5779_v3 = vld [vmem:[#allocation100_spill] sm:$0xff]  ;;  %v5780_v60 = vld [vmem:[#allocation101_spill] sm:$0xff] }
 0x1a6   :  { %1162 = vmatprep.subr.bf16.mxu0 %v5770_v58  ;;  %1203 = vmatprep.subr.bf16.mxu1 %v5771_v42  ;;  %v5781_v58 = vld [vmem:[#allocation102_spill] sm:$0xff]  ;;  %v5782_v42 = vld [vmem:[#allocation103_spill] sm:$0xff] }
 0x1a9   :  { %1163 = vmatpush1.bf16.msra.mxu0 %v5772_v23  ;;  %1204 = vmatpush1.bf16.msra.mxu1 %v5773_v33  ;;  %v5783_v23 = vld [vmem:[#allocation104_spill] sm:$0xff]  ;;  %v5784_v33 = vld [vmem:[#allocation105_spill] sm:$0xff] }
 0x1aa   :  { %1164 = vmatprep.subr.bf16.mxu0 %v5774_v34  ;;  %1205 = vmatprep.subr.bf16.mxu1 %v5775_v39  ;;  %v5785_v34 = vld [vmem:[#allocation106_spill] sm:$0xff]  ;;  %v5786_v39 = vld [vmem:[#allocation107_spill] sm:$0xff] }
 0x1ad   :  { %1165 = vmatpush1.bf16.msra.mxu0 %v5776_v56  ;;  %1206 = vmatpush1.bf16.msra.mxu1 %v5777_v48  ;;  %v5787_v56 = vld [vmem:[#allocation108_spill] sm:$0xff]  ;;  %v5788_v48 = vld [vmem:[#allocation109_spill] sm:$0xff] }
 0x1ae   :  { %1166 = vmatprep.subr.bf16.mxu0 %v5778_v14  ;;  %1207 = vmatprep.subr.bf16.mxu1 %v5779_v3  ;;  %v5789_v14 = vld [vmem:[#allocation110_spill] sm:$0xff]  ;;  %v5790_v3 = vld [vmem:[#allocation111_spill] sm:$0xff] }
 0x1b1   :  { %1167 = vmatpush1.bf16.msra.mxu0 %v5780_v60  ;;  %1208 = vmatpush1.bf16.msra.mxu1 %v5781_v58  ;;  %v5791_v60 = vld [vmem:[#allocation112_spill] sm:$0xff]  ;;  %v5792_v58 = vld [vmem:[#allocation113_spill] sm:$0xff] }
 0x1b2   :  { %1168 = vmatprep.subr.bf16.mxu0 %v5782_v42  ;;  %1209 = vmatprep.subr.bf16.mxu1 %v5783_v23  ;;  %v5793_v42 = vld [vmem:[#allocation114_spill] sm:$0xff]  ;;  %v5794_v23 = vld [vmem:[#allocation115_spill] sm:$0xff] }
 0x1b5   :  { %1169 = vmatpush1.bf16.msra.mxu0 %v5784_v33  ;;  %1210 = vmatpush1.bf16.msra.mxu1 %v5785_v34  ;;  %v5795_v33 = vld [vmem:[#allocation116_spill] sm:$0xff]  ;;  %v5796_v34 = vld [vmem:[#allocation117_spill] sm:$0xff] }
 0x1b6   :  { %1170 = vmatprep.subr.bf16.mxu0 %v5786_v39  ;;  %1211 = vmatprep.subr.bf16.mxu1 %v5787_v56  ;;  %v5797_v39 = vld [vmem:[#allocation118_spill] sm:$0xff]  ;;  %v5798_v56 = vld [vmem:[#allocation119_spill] sm:$0xff] }
 0x1b9   :  { %1171 = vmatpush1.bf16.msra.mxu0 %v5788_v48  ;;  %1212 = vmatpush1.bf16.msra.mxu1 %v5789_v14  ;;  %v5799_v48 = vld [vmem:[#allocation120_spill] sm:$0xff]  ;;  %v5800_v14 = vld [vmem:[#allocation121_spill] sm:$0xff] }
 0x1ba   :  { %1172 = vmatprep.subr.bf16.mxu0 %v5790_v3  ;;  %1213 = vmatprep.subr.bf16.mxu1 %v5791_v60 }
 0x1bd   :  { %1173 = vmatpush1.bf16.msra.mxu0 %v5792_v58  ;;  %1214 = vmatpush1.bf16.msra.mxu1 %v5793_v42 }
 0x1be   :  { %1174 = vmatprep.subr.bf16.mxu0 %v5794_v23  ;;  %1215 = vmatprep.subr.bf16.mxu1 %v5795_v33 }
 0x1c1   :  { %1175 = vmatpush1.bf16.msra.mxu0 %v5796_v34  ;;  %1216 = vmatpush1.bf16.msra.mxu1 %v5797_v39 }
 0x1c2   :  { %1176 = vmatprep.subr.bf16.mxu0 %v5798_v56  ;;  %1217 = vmatprep.subr.bf16.mxu1 %v5799_v48 }
 0x1c5   :  { %1177 = vmatpush1.bf16.msra.mxu0 %v5800_v14  ;;  %1218 = vmatpush1.bf16.msra.mxu1 %v4110_v55 }
 0x1c6   :  { %1178 = vmatprep.subr.bf16.mxu0 %v4114_v41  ;;  %1219 = vmatprep.subr.bf16.mxu1 %v4116_v54 }
 0x1c9   :  { %1179 = vmatpush1.bf16.msra.mxu0 %v4132_v31  ;;  %1220 = vmatpush1.bf16.msra.mxu1 %v4134_v49 }
 0x1ca   :  { %1180 = vmatprep.subr.bf16.mxu0 %v4138_v47  ;;  %1221 = vmatprep.subr.bf16.mxu1 %v4140_v26 }
 0x1cd   :  { %1181 = vmatpush1.bf16.msra.mxu0 %v4144_v63  ;;  %1222 = vmatpush1.bf16.msra.mxu1 %v4146_v32 }
 0x1ce   :  { %1305 = vmatprep.subr.bf16.mxu0 %v3372_v4  ;;  %1346 = vmatprep.subr.bf16.mxu1 %v3385_v9 }
 0x1d0   :  { %1183 = vmatmul.mubr.bf16.vlgmr.msra.gmra.mrb[12].mxu0 %v4251_v0  ;;  %1224 = vmatmul.mubr.bf16.vlgmr.msra.gmra.mrb[12].mxu1 %v4251_v0  ;;  %v5801_v0 = vld [vmem:[#allocation35_spill] sm:$0xff] }
 0x1d1   :  { %1306 = vmatpush1.bf16.msra.mxu0 %v3377_v6  ;;  %1347 = vmatpush1.bf16.msra.mxu1 %v3387_v10 }
 0x1d2   :  { %1307 = vmatprep.subr.bf16.mxu0 %v3389_v11  ;;  %1348 = vmatprep.subr.bf16.mxu1 %v3401_v15 }
 0x1d5   :  { %1308 = vmatpush1.bf16.msra.mxu0 %v3414_v19  ;;  %1349 = vmatpush1.bf16.msra.mxu1 %v3418_v20 }
 0x1d6   :  { %1309 = vmatprep.subr.bf16.mxu0 %v3420_v21  ;;  %1350 = vmatprep.subr.bf16.mxu1 %v3423_v22 }
 0x1d9   :  { %1310 = vmatpush1.bf16.msra.mxu0 %v3438_v27  ;;  %1351 = vmatpush1.bf16.msra.mxu1 %v3442_v28 }
 0x1da   :  { %1311 = vmatprep.subr.bf16.mxu0 %v3444_v29  ;;  %1352 = vmatprep.subr.bf16.mxu1 %v3447_v30 }
 0x1dd   :  { %1312 = vmatpush1.bf16.msra.mxu0 %v3462_v35  ;;  %1353 = vmatpush1.bf16.msra.mxu1 %v3466_v36 }
 0x1de   :  { %1313 = vmatprep.subr.bf16.mxu0 %v3468_v37  ;;  %1354 = vmatprep.subr.bf16.mxu1 %v3471_v38 }
 0x1e1   :  { %1314 = vmatpush1.bf16.msra.mxu0 %v3486_v43  ;;  %1355 = vmatpush1.bf16.msra.mxu1 %v3490_v44 }
 0x1e2   :  { %1315 = vmatprep.subr.bf16.mxu0 %v3492_v45  ;;  %1356 = vmatprep.subr.bf16.mxu1 %v3495_v46 }
 0x1e5   :  { %1316 = vmatpush1.bf16.msra.mxu0 %v3510_v51  ;;  %1357 = vmatpush1.bf16.msra.mxu1 %v3514_v52  ;;  %v5802_v52 = vld [vmem:[#allocation36_spill] sm:$0xff] }
 0x1e6   :  { %1317 = vmatprep.subr.bf16.mxu0 %v3516_v53  ;;  %1358 = vmatprep.subr.bf16.mxu1 %v3528_v57  ;;  %v5803_v53 = vld [vmem:[#allocation37_spill] sm:$0xff]  ;;  %v5804_v57 = vld [vmem:[#allocation38_spill] sm:$0xff] }
 0x1e9   :  { %1318 = vmatpush1.bf16.msra.mxu0 %v3543_v1  ;;  %1359 = vmatpush1.bf16.msra.mxu1 %v3547_v2  ;;  %v5805_v1 = vld [vmem:[#allocation39_spill] sm:$0xff]  ;;  %v5806_v2 = vld [vmem:[#allocation40_spill] sm:$0xff] }
 0x1ea   :  { %1319 = vmatprep.subr.bf16.mxu0 %v3549_v5  ;;  %1360 = vmatprep.subr.bf16.mxu1 %v3552_v7  ;;  %v5807_v5 = vld [vmem:[#allocation41_spill] sm:$0xff]  ;;  %v5808_v7 = vld [vmem:[#allocation42_spill] sm:$0xff] }
 0x1ed   :  { %1320 = vmatpush1.bf16.msra.mxu0 %v3567_v16  ;;  %1361 = vmatpush1.bf16.msra.mxu1 %v3571_v17  ;;  %v5809_v16 = vld [vmem:[#allocation43_spill] sm:$0xff]  ;;  %v5810_v17 = vld [vmem:[#allocation44_spill] sm:$0xff] }
 0x1ee   :  { %1321 = vmatprep.subr.bf16.mxu0 %v3573_v18  ;;  %1362 = vmatprep.subr.bf16.mxu1 %v5801_v0  ;;  %v5811_v18 = vld [vmem:[#allocation45_spill] sm:$0xff]  ;;  %v5812_v0 = vld [vmem:[#allocation46_spill] sm:$0xff] }
 0x1f1   :  { %1322 = vmatpush1.bf16.msra.mxu0 %v5802_v52  ;;  %1363 = vmatpush1.bf16.msra.mxu1 %v5803_v53  ;;  %v5813_v52 = vld [vmem:[#allocation47_spill] sm:$0xff]  ;;  %v5814_v53 = vld [vmem:[#allocation48_spill] sm:$0xff] }
 0x1f2   :  { %1323 = vmatprep.subr.bf16.mxu0 %v5804_v57  ;;  %1364 = vmatprep.subr.bf16.mxu1 %v5805_v1  ;;  %v5815_v57 = vld [vmem:[#allocation49_spill] sm:$0xff]  ;;  %v5816_v1 = vld [vmem:[#allocation50_spill] sm:$0xff] }
 0x1f5   :  { %1324 = vmatpush1.bf16.msra.mxu0 %v5806_v2  ;;  %1365 = vmatpush1.bf16.msra.mxu1 %v5807_v5  ;;  %v5817_v2 = vld [vmem:[#allocation51_spill] sm:$0xff]  ;;  %v5818_v5 = vld [vmem:[#allocation52_spill] sm:$0xff] }
 0x1f6   :  { %1325 = vmatprep.subr.bf16.mxu0 %v5808_v7  ;;  %1366 = vmatprep.subr.bf16.mxu1 %v5809_v16  ;;  %v5819_v7 = vld [vmem:[#allocation53_spill] sm:$0xff]  ;;  %v5820_v16 = vld [vmem:[#allocation54_spill] sm:$0xff] }
 0x1f9   :  { %1326 = vmatpush1.bf16.msra.mxu0 %v5810_v17  ;;  %1367 = vmatpush1.bf16.msra.mxu1 %v5811_v18  ;;  %v5821_v17 = vld [vmem:[#allocation55_spill] sm:$0xff]  ;;  %v5822_v18 = vld [vmem:[#allocation56_spill] sm:$0xff] }
 0x1fa   :  { %1327 = vmatprep.subr.bf16.mxu0 %v5812_v0  ;;  %1368 = vmatprep.subr.bf16.mxu1 %v5813_v52  ;;  %v5823_v0 = vld [vmem:[#allocation57_spill] sm:$0xff]  ;;  %v5824_v52 = vld [vmem:[#allocation58_spill] sm:$0xff] }
 0x1fd   :  { %1328 = vmatpush1.bf16.msra.mxu0 %v5814_v53  ;;  %1369 = vmatpush1.bf16.msra.mxu1 %v5815_v57  ;;  %v5825_v53 = vld [vmem:[#allocation59_spill] sm:$0xff]  ;;  %v5826_v57 = vld [vmem:[#allocation60_spill] sm:$0xff] }
 0x1fe   :  { %1329 = vmatprep.subr.bf16.mxu0 %v5816_v1  ;;  %1370 = vmatprep.subr.bf16.mxu1 %v5817_v2  ;;  %v5827_v1 = vld [vmem:[#allocation62_spill] sm:$0xff]  ;;  %v5828_v2 = vld [vmem:[#allocation63_spill] sm:$0xff] }
 0x201   :  { %1330 = vmatpush1.bf16.msra.mxu0 %v5818_v5  ;;  %1371 = vmatpush1.bf16.msra.mxu1 %v5819_v7  ;;  %v5829_v5 = vld [vmem:[#allocation64_spill] sm:$0xff]  ;;  %v5830_v7 = vld [vmem:[#allocation65_spill] sm:$0xff] }
 0x202   :  { %1331 = vmatprep.subr.bf16.mxu0 %v5820_v16  ;;  %1372 = vmatprep.subr.bf16.mxu1 %v5821_v17  ;;  %v5831_v16 = vld [vmem:[#allocation66_spill] sm:$0xff]  ;;  %v5832_v17 = vld [vmem:[#allocation67_spill] sm:$0xff] }
 0x205   :  { %1332 = vmatpush1.bf16.msra.mxu0 %v5822_v18  ;;  %1373 = vmatpush1.bf16.msra.mxu1 %v5823_v0  ;;  %v5833_v18 = vld [vmem:[#allocation68_spill] sm:$0xff] }
 0x206   :  { %1333 = vmatprep.subr.bf16.mxu0 %v5824_v52  ;;  %1374 = vmatprep.subr.bf16.mxu1 %v5825_v53  ;;  %v2848_v53 = vld [vmem:[%s5318_s0 + $0x80] sm:$0xff] }
 0x209   :  { %1334 = vmatpush1.bf16.msra.mxu0 %v5826_v57  ;;  %1375 = vmatpush1.bf16.msra.mxu1 %v5827_v1  ;;  %v2850_v1 = vld [vmem:[%s5318_s0 + $0x90] sm:$0xff] }
 0x20a   :  { %1335 = vmatprep.subr.bf16.mxu0 %v5828_v2  ;;  %1376 = vmatprep.subr.bf16.mxu1 %v5829_v5  ;;  %v2849_v5 = vld [vmem:[%s5318_s0 + $0x88] sm:$0xff] }
 0x20d   :  { %1336 = vmatpush1.bf16.msra.mxu0 %v5830_v7  ;;  %1377 = vmatpush1.bf16.msra.mxu1 %v5831_v16 }
 0x20e   :  { %1387 = vmatprep.subr.bf16.mxu0 %v5832_v17  ;;  %1428 = vmatprep.subr.bf16.mxu1 %v5833_v18 }
 0x263   :  { %v1102_v2 = vpop.f32.mrb[8].mxu0  ;;  %v1143_v7 = vpop.f32.mrb[8].mxu1 }
 0x264   :  { %v1103_v57 = vadd.f32 %v2848_v53, %v1102_v2  ;;  %v1144_v16 = vadd.f32 %v2850_v1, %v1143_v7  ;;  %v1104_v52 = vpop.f32.mrb[9].mxu0  ;;  %v1145_v17 = vpop.f32.mrb[9].mxu1 }
 0x265   :  { %v1105_v0 = vadd.f32 %v2849_v5, %v1104_v52  ;;  %v1106_v18 = vpop.f32.mrb[10].mxu0  ;;  %v1147_v51 = vpop.f32.mrb[10].mxu1 }
 0x266   :  { %v2856_v46 = vmul.f32 -1.442695, %v1103_v57  ;;  %v2858_v45 = vmul.f32 -1.442695, %v1144_v16  ;;  %v1107_v44 = vpop.f32.mrb[11].mxu0  ;;  %v1148_v43 = vpop.f32.mrb[11].mxu1 }
 0x267   :  { %v2857_v38 = vmul.f32 -1.442695, %v1105_v0 }
 0x268   :  { %3099 = vpow2.f32 %v2856_v46 }
 0x269   :  { %3101 = vpow2.f32 %v2858_v45 }
 0x26a   :  { %3103 = vpow2.f32 %v2857_v38  ;;  %v2852_v38 = vld [vmem:[%s5318_s0 + $0xa0] sm:$0xff] }
 0x272   :  { %v3100_v37 = vpop.eup %3099 }
 0x273   :  { %v3102_v36 = vpop.eup %3101  ;;  %v1256_v53 = vadd.f32 1.0, %v3100_v37 }
 0x274   :  { %v3104_v35 = vpop.eup %3103  ;;  %v1258_v30 = vadd.f32 1.0, %v3102_v36 }
 0x275   :  { %v1257_v29 = vadd.f32 1.0, %v3104_v35 }
 0x276   :  { %3105 = vrcp.f32 %v1258_v30  ;;  %v2854_v30 = vld [vmem:[%s5318_s0 + $0xb0] sm:$0xff] }
 0x277   :  { %3107 = vrcp.f32 %v1257_v29  ;;  %v2853_v29 = vld [vmem:[%s5318_s0 + $0xa8] sm:$0xff] }
 0x278   :  { %3109 = vrcp.f32 %v1256_v53 }
 0x280   :  { %v3106_v52 = vpop.eup %3105 }
 0x281   :  { %v1280_v1 = vmul.f32 2.0, %v3106_v52  ;;  %v3108_v51 = vpop.eup %3107 }
 0x282   :  { %v3110_v2 = vpop.eup %3109  ;;  %v1282_v43 = vmul.f32 %v3108_v51, %v4230_v40 }
 0x283   :  { %v2864_v57 = vadd.f32 -1.0, %v1280_v1 }
 0x285   :  { %v1283_v44 = vmul.f32 %v3110_v2, %v2864_v57  ;;  %v2851_v57 = vld [vmem:[%s5318_s0 + $0x98] sm:$0xff] }
 0x286   :  { %v2855_v2 = vld [vmem:[%s5318_s0 + $0xb8] sm:$0xff] }
 0x287   :  { %v4395_v46 = vadd.f32 %v1283_v44, %v1282_v43  ;;  %v1146_v44 = vadd.f32 %v2851_v57, %v1145_v17 }
 0x2a3   :  { %v1184_v35 = vpop.f32.mrb[12].mxu0  ;;  %v1225_v36 = vpop.f32.mrb[12].mxu1 }
 0x2a4   :  { %v1185_v37 = vadd.f32 %v2852_v38, %v1184_v35  ;;  %v1226_v45 = vadd.f32 %v2854_v30, %v1225_v36  ;;  %v1186_v5 = vpop.f32.mrb[13].mxu0  ;;  %v1227_v7 = vpop.f32.mrb[13].mxu1  ;;  %v2859_v38 = vmul.f32 -1.442695, %v1146_v44 }
 0x2a5   :  { %v1187_v16 = vadd.f32 %v2853_v29, %v1186_v5  ;;  %v1188_v18 = vpop.f32.mrb[14].mxu0  ;;  %v1229_v40 = vpop.f32.mrb[14].mxu1  ;;  %v1228_v43 = vadd.f32 %v2855_v2, %v1227_v7 }
 0x2a6   :  { %v2860_v0 = vmul.f32 -1.442695, %v1185_v37  ;;  %v2862_v53 = vmul.f32 -1.442695, %v1226_v45  ;;  %v1189_v52 = vpop.f32.mrb[15].mxu0  ;;  %v1230_v1 = vpop.f32.mrb[15].mxu1 }
 0x2a7   :  { %v2861_v51 = vmul.f32 -1.442695, %v1187_v16  ;;  %v2863_v35 = vmul.f32 -1.442695, %v1228_v43 }
 0x2a8   :  { %3111 = vpow2.f32 %v2860_v0 }
 0x2a9   :  { %3113 = vpow2.f32 %v2862_v53 }
 0x2aa   :  { %3115 = vpow2.f32 %v2861_v51 }
 0x2ab   :  { %3117 = vpow2.f32 %v2859_v38 }
 0x2b2   :  { %v3112_v30 = vpop.eup %3111 }
 0x2b3   :  { %v3114_v29 = vpop.eup %3113  ;;  %v1260_v5 = vadd.f32 1.0, %v3112_v30 }
 0x2b4   :  { %v3116_v36 = vpop.eup %3115  ;;  %v1262_v37 = vadd.f32 1.0, %v3114_v29 }
 0x2b5   :  { %v1261_v45 = vadd.f32 1.0, %v3116_v36  ;;  %v3118_v16 = vpop.eup %3117 }
 0x2b6   :  { %3119 = vrcp.f32 %v1262_v37  ;;  %v1259_v17 = vadd.f32 1.0, %v3118_v16  ;;  %v5837_v16 = vld [vmem:[#allocation80_spill] sm:$0xff] }
 0x2b7   :  { %3121 = vpow2.f32 %v2863_v35 }
 0x2b8   :  { %3123 = vrcp.f32 %v1261_v45  ;;  %v5835_v45 = vld [vmem:[#allocation78_spill] sm:$0xff] }
 0x2b9   :  { %3125 = vrcp.f32 %v1260_v5  ;;  %v5836_v5 = vld [vmem:[#allocation79_spill] sm:$0xff] }
 0x2ba   :  { %3127 = vtanh.f32 %v4395_v46 }
 0x2bb   :  { %3129 = vrcp.f32 %v1259_v17  ;;  %v5842_v17 = vld [vmem:[#allocation85_spill] sm:$0xff] }
 0x2c0   :  { %v3120_v18 = vpop.eup %3119 }
 0x2c1   :  { %v3122_v40 = vpop.eup %3121  ;;  %v1287_v0 = vmul.f32 2.0, %v3120_v18  ;;  %v5838_v18 = vld [vmem:[#allocation81_spill] sm:$0xff] }
 0x2c2   :  { %v3124_v53 = vpop.eup %3123  ;;  %v1263_v1 = vadd.f32 1.0, %v3122_v40  ;;  %v5839_v40 = vld [vmem:[#allocation82_spill] sm:$0xff] }
 0x2c3   :  { %v2865_v7 = vadd.f32 -1.0, %v1287_v0  ;;  %v3126_v52 = vpop.eup %3125  ;;  %v1289_v57 = vmul.f32 %v3124_v53, %v4248_v12  ;;  %v5834_v12 = vld [vmem:[#allocation77_spill] sm:$0xff]  ;;  %v5840_v0 = vld [vmem:[#allocation83_spill] sm:$0xff]  ;;  %v5841_v53 = vld [vmem:[#allocation84_spill] sm:$0xff] }
 0x2c4   :  { %3131 = vrcp.f32 %v1263_v1  ;;  %v3128_v44 = vpop.eup %3127  ;;  %v5845_v1 = vld [vmem:[#allocation88_spill] sm:$0xff] }
 0x2c5   :  { %v1290_v51 = vmul.f32 %v3126_v52, %v2865_v7  ;;  %v3130_v43 = vpop.eup %3129  ;;  %v5843_v7 = vld [vmem:[#allocation86_spill] sm:$0xff]  ;;  %v5844_v52 = vld [vmem:[#allocation87_spill] sm:$0xff] }
 0x2c6   :  { %v1286_v29 = vmul.f32 %v3130_v43, %v3128_v44  ;;  %v5848_v44 = vld [vmem:[#allocation91_spill] sm:$0xff]  ;;  %v5849_v43 = vld [vmem:[#allocation92_spill] sm:$0xff] }
 0x2c7   :  { %v4414_v2 = vadd.f32 %v1290_v51, %v1289_v57  ;;  %v5846_v51 = vld [vmem:[#allocation89_spill] sm:$0xff]  ;;  %v5847_v57 = vld [vmem:[#allocation90_spill] sm:$0xff] }
 0x2c8   :  { %v4417_v37 = vpack.c.bf16 %v1286_v29, %v1286_v29  ;;  %v5852_v29 = vld [vmem:[#allocation95_spill] sm:$0xff] }
 0x2c9   :  { %3133 = vtanh.f32 %v4414_v2 }
 0x2ce   :  { %v3132_v38 = vpop.eup %3131 }
 0x2d3   :  { %v3134_v30 = vpop.eup %3133 }
 0x2d4   :  { %v1293_v35 = vmul.f32 %v3134_v30, %v3132_v38  ;;  %v5850_v38 = vld [vmem:[#allocation93_spill] sm:$0xff]  ;;  %v5851_v30 = vld [vmem:[#allocation94_spill] sm:$0xff] }
 0x2d6   :  { %v1304_v36 = vpack.c.bf16 %v1293_v35, %v1293_v35  ;;  %v5853_v35 = vld [vmem:[#allocation96_spill] sm:$0xff] }
 0x2d8   :  { %1337 = vmatprep.mubr.bf16.mxu0 %v1304_v36  ;;  %1378 = vmatprep.mubr.bf16.mxu1 %v1304_v36 }
 0x2d9   :  { %1338 = vmatmul.mubr.bf16.vlgmr.msra.gmra.mrb[16].mxu0 %v4417_v37  ;;  %1379 = vmatmul.mubr.bf16.vlgmr.msra.gmra.mrb[16].mxu1 %v4417_v37 }
 0x2da   :  { %1388 = vmatpush1.bf16.msra.mxu0 %v5748_v62  ;;  %1429 = vmatpush1.bf16.msra.mxu1 %v5749_v59 }
 0x2db   :  { %1419 = vmatprep.mubr.bf16.mxu0 %v1304_v36  ;;  %1460 = vmatprep.mubr.bf16.mxu1 %v1304_v36  ;;  %v5854_v36 = vld [vmem:[#allocation97_spill] sm:$0xff] }
 0x2dc   :  { %1389 = vmatprep.subr.bf16.mxu0 %v5750_v13  ;;  %1430 = vmatprep.subr.bf16.mxu1 %v5751_v8 }
 0x2de   :  { %1390 = vmatpush1.bf16.msra.mxu0 %v5752_v50  ;;  %1431 = vmatpush1.bf16.msra.mxu1 %v5753_v25 }
 0x2df   :  { %1391 = vmatprep.subr.bf16.mxu0 %v5754_v61  ;;  %1432 = vmatprep.subr.bf16.mxu1 %v5755_v24 }
 0x2e2   :  { %1392 = vmatpush1.bf16.msra.mxu0 %v5834_v12  ;;  %1433 = vmatpush1.bf16.msra.mxu1 %v5835_v45 }
 0x2e3   :  { %1393 = vmatprep.subr.bf16.mxu0 %v5836_v5  ;;  %1434 = vmatprep.subr.bf16.mxu1 %v5837_v16 }
 0x2e6   :  { %1394 = vmatpush1.bf16.msra.mxu0 %v5838_v18  ;;  %1435 = vmatpush1.bf16.msra.mxu1 %v5839_v40 }
 0x2e7   :  { %1395 = vmatprep.subr.bf16.mxu0 %v5840_v0  ;;  %1436 = vmatprep.subr.bf16.mxu1 %v5841_v53 }
 0x2ea   :  { %1396 = vmatpush1.bf16.msra.mxu0 %v5842_v17  ;;  %1437 = vmatpush1.bf16.msra.mxu1 %v5843_v7 }
 0x2eb   :  { %1397 = vmatprep.subr.bf16.mxu0 %v5844_v52  ;;  %1438 = vmatprep.subr.bf16.mxu1 %v5845_v1  ;;  %v5855_v52 = vld [vmem:[#allocation98_spill] sm:$0xff]  ;;  %v5856_v1 = vld [vmem:[#allocation99_spill] sm:$0xff] }
 0x2ee   :  { %1398 = vmatpush1.bf16.msra.mxu0 %v5846_v51  ;;  %1439 = vmatpush1.bf16.msra.mxu1 %v5847_v57  ;;  %v5857_v51 = vld [vmem:[#allocation100_spill] sm:$0xff]  ;;  %v5858_v57 = vld [vmem:[#allocation101_spill] sm:$0xff] }
 0x2ef   :  { %1399 = vmatprep.subr.bf16.mxu0 %v5848_v44  ;;  %1440 = vmatprep.subr.bf16.mxu1 %v5849_v43  ;;  %v5859_v44 = vld [vmem:[#allocation102_spill] sm:$0xff]  ;;  %v5860_v43 = vld [vmem:[#allocation103_spill] sm:$0xff] }
 0x2f2   :  { %1400 = vmatpush1.bf16.msra.mxu0 %v5850_v38  ;;  %1441 = vmatpush1.bf16.msra.mxu1 %v5851_v30  ;;  %v5861_v38 = vld [vmem:[#allocation104_spill] sm:$0xff]  ;;  %v5862_v30 = vld [vmem:[#allocation105_spill] sm:$0xff] }
 0x2f3   :  { %1401 = vmatprep.subr.bf16.mxu0 %v5852_v29  ;;  %1442 = vmatprep.subr.bf16.mxu1 %v5853_v35  ;;  %v5863_v29 = vld [vmem:[#allocation106_spill] sm:$0xff]  ;;  %v5864_v35 = vld [vmem:[#allocation107_spill] sm:$0xff] }
 0x2f6   :  { %1402 = vmatpush1.bf16.msra.mxu0 %v5854_v36  ;;  %1443 = vmatpush1.bf16.msra.mxu1 %v5855_v52  ;;  %v5865_v36 = vld [vmem:[#allocation108_spill] sm:$0xff]  ;;  %v5866_v52 = vld [vmem:[#allocation109_spill] sm:$0xff] }
 0x2f7   :  { %1403 = vmatprep.subr.bf16.mxu0 %v5856_v1  ;;  %1444 = vmatprep.subr.bf16.mxu1 %v5857_v51  ;;  %v5867_v1 = vld [vmem:[#allocation110_spill] sm:$0xff] }
 0x2fa   :  { %1404 = vmatpush1.bf16.msra.mxu0 %v5858_v57  ;;  %1445 = vmatpush1.bf16.msra.mxu1 %v5859_v44 }
 0x2fb   :  { %1405 = vmatprep.subr.bf16.mxu0 %v5860_v43  ;;  %1446 = vmatprep.subr.bf16.mxu1 %v5861_v38 }
 0x2fe   :  { %1406 = vmatpush1.bf16.msra.mxu0 %v5862_v30  ;;  %1447 = vmatpush1.bf16.msra.mxu1 %v5863_v29 }
 0x2ff   :  { %1407 = vmatprep.subr.bf16.mxu0 %v5864_v35  ;;  %1448 = vmatprep.subr.bf16.mxu1 %v5865_v36 }
 0x302   :  { %1408 = vmatpush1.bf16.msra.mxu0 %v5866_v52  ;;  %1449 = vmatpush1.bf16.msra.mxu1 %v5867_v1 }
 0x303   :  { %1409 = vmatprep.subr.bf16.mxu0 %v5790_v3  ;;  %1450 = vmatprep.subr.bf16.mxu1 %v5791_v60 }
 0x306   :  { %1410 = vmatpush1.bf16.msra.mxu0 %v5792_v58  ;;  %1451 = vmatpush1.bf16.msra.mxu1 %v5793_v42 }
 0x307   :  { %1411 = vmatprep.subr.bf16.mxu0 %v5794_v23  ;;  %1452 = vmatprep.subr.bf16.mxu1 %v5795_v33 }
 0x30a   :  { %1412 = vmatpush1.bf16.msra.mxu0 %v5796_v34  ;;  %1453 = vmatpush1.bf16.msra.mxu1 %v5797_v39 }
 0x30b   :  { %1413 = vmatprep.subr.bf16.mxu0 %v5798_v56  ;;  %1454 = vmatprep.subr.bf16.mxu1 %v5799_v48 }
 0x30e   :  { %1414 = vmatpush1.bf16.msra.mxu0 %v5800_v14  ;;  %1455 = vmatpush1.bf16.msra.mxu1 %v4110_v55 }
 0x30f   :  { %1415 = vmatprep.subr.bf16.mxu0 %v4114_v41  ;;  %1456 = vmatprep.subr.bf16.mxu1 %v4116_v54 }
 0x312   :  { %1416 = vmatpush1.bf16.msra.mxu0 %v4132_v31  ;;  %1457 = vmatpush1.bf16.msra.mxu1 %v4134_v49 }
 0x313   :  { %1417 = vmatprep.subr.bf16.mxu0 %v4138_v47  ;;  %1458 = vmatprep.subr.bf16.mxu1 %v4140_v26 }
 0x316   :  { %1418 = vmatpush1.bf16.msra.mxu0 %v4144_v63  ;;  %1459 = vmatpush1.bf16.msra.mxu1 %v4146_v32 }
 0x317   :  { %1542 = vmatprep.subr.bf16.mxu0 %v3372_v4  ;;  %1583 = vmatprep.subr.bf16.mxu1 %v3385_v9 }
 0x319   :  { %1420 = vmatmul.mubr.bf16.vlgmr.msra.gmra.mrb[20].mxu0 %v4417_v37  ;;  %1461 = vmatmul.mubr.bf16.vlgmr.msra.gmra.mrb[20].mxu1 %v4417_v37  ;;  %v5868_v37 = vld [vmem:[#allocation14_spill] sm:$0xff] }
 0x31a   :  { %1543 = vmatpush1.bf16.msra.mxu0 %v3377_v6  ;;  %1584 = vmatpush1.bf16.msra.mxu1 %v3387_v10  ;;  %v5869_v6 = vld [vmem:[#allocation15_spill] sm:$0xff]  ;;  %v5870_v10 = vld [vmem:[#allocation16_spill] sm:$0xff] }
 0x31b   :  { %1544 = vmatprep.subr.bf16.mxu0 %v3389_v11  ;;  %1585 = vmatprep.subr.bf16.mxu1 %v3401_v15  ;;  %v5871_v11 = vld [vmem:[#allocation17_spill] sm:$0xff]  ;;  %v5872_v15 = vld [vmem:[#allocation18_spill] sm:$0xff] }
 0x31e   :  { %1545 = vmatpush1.bf16.msra.mxu0 %v3414_v19  ;;  %1586 = vmatpush1.bf16.msra.mxu1 %v3418_v20  ;;  %v5873_v19 = vld [vmem:[#allocation19_spill] sm:$0xff]  ;;  %v5874_v20 = vld [vmem:[#allocation20_spill] sm:$0xff] }
 0x31f   :  { %1546 = vmatprep.subr.bf16.mxu0 %v3420_v21  ;;  %1587 = vmatprep.subr.bf16.mxu1 %v3423_v22  ;;  %v5875_v21 = vld [vmem:[#allocation21_spill] sm:$0xff]  ;;  %v5876_v22 = vld [vmem:[#allocation22_spill] sm:$0xff] }
 0x322   :  { %1547 = vmatpush1.bf16.msra.mxu0 %v3438_v27  ;;  %1588 = vmatpush1.bf16.msra.mxu1 %v3442_v28  ;;  %v5877_v27 = vld [vmem:[#allocation23_spill] sm:$0xff]  ;;  %v5878_v28 = vld [vmem:[#allocation24_spill] sm:$0xff] }
 0x323   :  { %1548 = vmatprep.subr.bf16.mxu0 %v5868_v37  ;;  %1589 = vmatprep.subr.bf16.mxu1 %v5869_v6  ;;  %v5879_v37 = vld [vmem:[#allocation25_spill] sm:$0xff]  ;;  %v5880_v6 = vld [vmem:[#allocation26_spill] sm:$0xff] }
 0x326   :  { %1549 = vmatpush1.bf16.msra.mxu0 %v5870_v10  ;;  %1590 = vmatpush1.bf16.msra.mxu1 %v5871_v11  ;;  %v5881_v10 = vld [vmem:[#allocation27_spill] sm:$0xff]  ;;  %v5882_v11 = vld [vmem:[#allocation28_spill] sm:$0xff] }
 0x327   :  { %1550 = vmatprep.subr.bf16.mxu0 %v5872_v15  ;;  %1591 = vmatprep.subr.bf16.mxu1 %v5873_v19  ;;  %v5883_v15 = vld [vmem:[#allocation29_spill] sm:$0xff]  ;;  %v5884_v19 = vld [vmem:[#allocation30_spill] sm:$0xff] }
 0x32a   :  { %1551 = vmatpush1.bf16.msra.mxu0 %v5874_v20  ;;  %1592 = vmatpush1.bf16.msra.mxu1 %v5875_v21  ;;  %v5885_v20 = vld [vmem:[#allocation31_spill] sm:$0xff]  ;;  %v5886_v21 = vld [vmem:[#allocation32_spill] sm:$0xff] }
 0x32b   :  { %1552 = vmatprep.subr.bf16.mxu0 %v5876_v22  ;;  %1593 = vmatprep.subr.bf16.mxu1 %v5877_v27  ;;  %v5887_v22 = vld [vmem:[#allocation33_spill] sm:$0xff]  ;;  %v5888_v27 = vld [vmem:[#allocation34_spill] sm:$0xff] }
 0x32e   :  { %1553 = vmatpush1.bf16.msra.mxu0 %v5878_v28  ;;  %1594 = vmatpush1.bf16.msra.mxu1 %v5879_v37  ;;  %v5889_v28 = vld [vmem:[#allocation35_spill] sm:$0xff]  ;;  %v5890_v37 = vld [vmem:[#allocation36_spill] sm:$0xff] }
 0x32f   :  { %1554 = vmatprep.subr.bf16.mxu0 %v5880_v6  ;;  %1595 = vmatprep.subr.bf16.mxu1 %v5881_v10  ;;  %v5891_v6 = vld [vmem:[#allocation37_spill] sm:$0xff]  ;;  %v5892_v10 = vld [vmem:[#allocation38_spill] sm:$0xff] }
 0x332   :  { %1555 = vmatpush1.bf16.msra.mxu0 %v5882_v11  ;;  %1596 = vmatpush1.bf16.msra.mxu1 %v5883_v15  ;;  %v5893_v11 = vld [vmem:[#allocation39_spill] sm:$0xff]  ;;  %v5894_v15 = vld [vmem:[#allocation40_spill] sm:$0xff] }
 0x333   :  { %1556 = vmatprep.subr.bf16.mxu0 %v5884_v19  ;;  %1597 = vmatprep.subr.bf16.mxu1 %v5885_v20  ;;  %v5895_v19 = vld [vmem:[#allocation41_spill] sm:$0xff]  ;;  %v5896_v20 = vld [vmem:[#allocation42_spill] sm:$0xff] }
 0x336   :  { %1557 = vmatpush1.bf16.msra.mxu0 %v5886_v21  ;;  %1598 = vmatpush1.bf16.msra.mxu1 %v5887_v22  ;;  %v5897_v21 = vld [vmem:[#allocation43_spill] sm:$0xff]  ;;  %v5898_v22 = vld [vmem:[#allocation44_spill] sm:$0xff] }
 0x337   :  { %1558 = vmatprep.subr.bf16.mxu0 %v5888_v27  ;;  %1599 = vmatprep.subr.bf16.mxu1 %v5889_v28  ;;  %v5899_v27 = vld [vmem:[#allocation45_spill] sm:$0xff]  ;;  %v5900_v28 = vld [vmem:[#allocation46_spill] sm:$0xff] }
 0x33a   :  { %1559 = vmatpush1.bf16.msra.mxu0 %v5890_v37  ;;  %1600 = vmatpush1.bf16.msra.mxu1 %v5891_v6  ;;  %v5901_v37 = vld [vmem:[#allocation47_spill] sm:$0xff]  ;;  %v5902_v6 = vld [vmem:[#allocation48_spill] sm:$0xff] }
 0x33b   :  { %1560 = vmatprep.subr.bf16.mxu0 %v5892_v10  ;;  %1601 = vmatprep.subr.bf16.mxu1 %v5893_v11  ;;  %v5903_v10 = vld [vmem:[#allocation49_spill] sm:$0xff]  ;;  %v5904_v11 = vld [vmem:[#allocation50_spill] sm:$0xff] }
 0x33e   :  { %1561 = vmatpush1.bf16.msra.mxu0 %v5894_v15  ;;  %1602 = vmatpush1.bf16.msra.mxu1 %v5895_v19  ;;  %v5905_v15 = vld [vmem:[#allocation51_spill] sm:$0xff]  ;;  %v5906_v19 = vld [vmem:[#allocation52_spill] sm:$0xff] }
 0x33f   :  { %1562 = vmatprep.subr.bf16.mxu0 %v5896_v20  ;;  %1603 = vmatprep.subr.bf16.mxu1 %v5897_v21  ;;  %v5907_v20 = vld [vmem:[#allocation53_spill] sm:$0xff]  ;;  %v5908_v21 = vld [vmem:[#allocation54_spill] sm:$0xff] }
 0x342   :  { %1563 = vmatpush1.bf16.msra.mxu0 %v5898_v22  ;;  %1604 = vmatpush1.bf16.msra.mxu1 %v5899_v27  ;;  %v5909_v22 = vld [vmem:[#allocation55_spill] sm:$0xff]  ;;  %v5910_v27 = vld [vmem:[#allocation56_spill] sm:$0xff] }
 0x343   :  { %1564 = vmatprep.subr.bf16.mxu0 %v5900_v28  ;;  %1605 = vmatprep.subr.bf16.mxu1 %v5901_v37  ;;  %v5911_v28 = vld [vmem:[#allocation57_spill] sm:$0xff]  ;;  %v5912_v37 = vld [vmem:[#allocation58_spill] sm:$0xff] }
 0x346   :  { %1565 = vmatpush1.bf16.msra.mxu0 %v5902_v6  ;;  %1606 = vmatpush1.bf16.msra.mxu1 %v5903_v10  ;;  %v5913_v6 = vld [vmem:[#allocation59_spill] sm:$0xff]  ;;  %v5914_v10 = vld [vmem:[#allocation60_spill] sm:$0xff] }
 0x347   :  { %1566 = vmatprep.subr.bf16.mxu0 %v5904_v11  ;;  %1607 = vmatprep.subr.bf16.mxu1 %v5905_v15  ;;  %v5915_v11 = vld [vmem:[#allocation62_spill] sm:$0xff]  ;;  %v5916_v15 = vld [vmem:[#allocation63_spill] sm:$0xff] }
 0x34a   :  { %1567 = vmatpush1.bf16.msra.mxu0 %v5906_v19  ;;  %1608 = vmatpush1.bf16.msra.mxu1 %v5907_v20  ;;  %v5917_v19 = vld [vmem:[#allocation64_spill] sm:$0xff]  ;;  %v5918_v20 = vld [vmem:[#allocation65_spill] sm:$0xff] }
 0x34b   :  { %1568 = vmatprep.subr.bf16.mxu0 %v5908_v21  ;;  %1609 = vmatprep.subr.bf16.mxu1 %v5909_v22  ;;  %v5919_v21 = vld [vmem:[#allocation66_spill] sm:$0xff]  ;;  %v5920_v22 = vld [vmem:[#allocation67_spill] sm:$0xff] }
 0x34e   :  { %1569 = vmatpush1.bf16.msra.mxu0 %v5910_v27  ;;  %1610 = vmatpush1.bf16.msra.mxu1 %v5911_v28  ;;  %v5921_v27 = vld [vmem:[#allocation68_spill] sm:$0xff] }
 0x34f   :  { %1570 = vmatprep.subr.bf16.mxu0 %v5912_v37  ;;  %1611 = vmatprep.subr.bf16.mxu1 %v5913_v6  ;;  %v2866_v6 = vld [vmem:[%s5318_s0 + $0xc0] sm:$0xff] }
 0x352   :  { %1571 = vmatpush1.bf16.msra.mxu0 %v5914_v10  ;;  %1612 = vmatpush1.bf16.msra.mxu1 %v5915_v11  ;;  %v2868_v11 = vld [vmem:[%s5318_s0 + $0xd0] sm:$0xff] }
 0x353   :  { %1572 = vmatprep.subr.bf16.mxu0 %v5916_v15  ;;  %1613 = vmatprep.subr.bf16.mxu1 %v5917_v19  ;;  %v2867_v19 = vld [vmem:[%s5318_s0 + $0xc8] sm:$0xff] }
 0x356   :  { %1573 = vmatpush1.bf16.msra.mxu0 %v5918_v20  ;;  %1614 = vmatpush1.bf16.msra.mxu1 %v5919_v21 }
 0x357   :  { %1624 = vmatprep.subr.bf16.mxu0 %v5920_v22  ;;  %1665 = vmatprep.subr.bf16.mxu1 %v5921_v27 }
 0x3ac   :  { %v1339_v15 = vpop.f32.mrb[16].mxu0  ;;  %v1380_v20 = vpop.f32.mrb[16].mxu1 }
 0x3ad   :  { %v1340_v10 = vadd.f32 %v2866_v6, %v1339_v15  ;;  %v1381_v21 = vadd.f32 %v2868_v11, %v1380_v20  ;;  %v1341_v37 = vpop.f32.mrb[17].mxu0  ;;  %v1382_v22 = vpop.f32.mrb[17].mxu1 }
 0x3ae   :  { %v1342_v28 = vadd.f32 %v2867_v19, %v1341_v37  ;;  %v1343_v27 = vpop.f32.mrb[18].mxu0  ;;  %v1384_v9 = vpop.f32.mrb[18].mxu1 }
 0x3af   :  { %v2874_v4 = vmul.f32 -1.442695, %v1340_v10  ;;  %v2876_v32 = vmul.f32 -1.442695, %v1381_v21  ;;  %v1344_v63 = vpop.f32.mrb[19].mxu0  ;;  %v1385_v26 = vpop.f32.mrb[19].mxu1 }
 0x3b0   :  { %v2875_v47 = vmul.f32 -1.442695, %v1342_v28  ;;  %v2870_v27 = vld [vmem:[%s5318_s0 + $0xe0] sm:$0xff]  ;;  %v2872_v28 = vld [vmem:[%s5318_s0 + $0xf0] sm:$0xff]  ;;  %v2871_v26 = vld [vmem:[%s5318_s0 + $0xe8] sm:$0xff] }
 0x3b1   :  { %3135 = vpow2.f32 %v2874_v4 }
 0x3b2   :  { %3137 = vpow2.f32 %v2876_v32 }
 0x3b3   :  { %3139 = vpow2.f32 %v2875_v47 }
 0x3bb   :  { %v3136_v49 = vpop.eup %3135 }
 0x3bc   :  { %v3138_v31 = vpop.eup %3137  ;;  %v1493_v6 = vadd.f32 1.0, %v3136_v49 }
 0x3bd   :  { %v3140_v54 = vpop.eup %3139  ;;  %v1495_v41 = vadd.f32 1.0, %v3138_v31 }
 0x3be   :  { %v1494_v55 = vadd.f32 1.0, %v3140_v54 }
 0x3bf   :  { %3141 = vrcp.f32 %v1495_v41 }
 0x3c0   :  { %3143 = vrcp.f32 %v1494_v55 }
 0x3c1   :  { %3145 = vrcp.f32 %v1493_v6 }
 0x3c9   :  { %v3142_v11 = vpop.eup %3141 }
 0x3ca   :  { %v1517_v15 = vmul.f32 2.0, %v3142_v11  ;;  %v3144_v9 = vpop.eup %3143 }
 0x3cb   :  { %v3146_v19 = vpop.eup %3145  ;;  %v1519_v21 = vmul.f32 %v3144_v9, %v4395_v46 }
 0x3cc   :  { %v2882_v10 = vadd.f32 -1.0, %v1517_v15 }
 0x3ce   :  { %v1520_v20 = vmul.f32 %v3146_v19, %v2882_v10  ;;  %v2869_v10 = vld [vmem:[%s5318_s0 + $0xd8] sm:$0xff] }
 0x3cf   :  { %v2873_v19 = vld [vmem:[%s5318_s0 + $0xf8] sm:$0xff] }
 0x3d0   :  { %v4561_v4 = vadd.f32 %v1520_v20, %v1519_v21  ;;  %v1383_v20 = vadd.f32 %v2869_v10, %v1382_v22 }
 0x3ec   :  { %v1421_v47 = vpop.f32.mrb[20].mxu0  ;;  %v1462_v41 = vpop.f32.mrb[20].mxu1 }
 0x3ed   :  { %v1422_v54 = vadd.f32 %v2870_v27, %v1421_v47  ;;  %v1463_v63 = vadd.f32 %v2872_v28, %v1462_v41  ;;  %v1423_v32 = vpop.f32.mrb[21].mxu0  ;;  %v1464_v55 = vpop.f32.mrb[21].mxu1  ;;  %v2877_v27 = vmul.f32 -1.442695, %v1383_v20 }
 0x3ee   :  { %v1424_v31 = vadd.f32 %v2871_v26, %v1423_v32  ;;  %v1425_v49 = vpop.f32.mrb[22].mxu0  ;;  %v1466_v46 = vpop.f32.mrb[22].mxu1  ;;  %v1465_v21 = vadd.f32 %v2873_v19, %v1464_v55 }
 0x3ef   :  { %v2878_v37 = vmul.f32 -1.442695, %v1422_v54  ;;  %v2880_v6 = vmul.f32 -1.442695, %v1463_v63  ;;  %v1426_v11 = vpop.f32.mrb[23].mxu0  ;;  %v1467_v15 = vpop.f32.mrb[23].mxu1 }
 0x3f0   :  { %v2879_v9 = vmul.f32 -1.442695, %v1424_v31  ;;  %v2881_v47 = vmul.f32 -1.442695, %v1465_v21 }
 0x3f1   :  { %3147 = vpow2.f32 %v2878_v37 }
 0x3f2   :  { %3149 = vpow2.f32 %v2880_v6 }
 0x3f3   :  { %3151 = vpow2.f32 %v2879_v9 }
 0x3f4   :  { %3153 = vpow2.f32 %v2877_v27 }
 0x3fb   :  { %v3148_v28 = vpop.eup %3147 }
 0x3fc   :  { %v3150_v26 = vpop.eup %3149  ;;  %v1497_v32 = vadd.f32 1.0, %v3148_v28 }
 0x3fd   :  { %v3152_v41 = vpop.eup %3151  ;;  %v1499_v54 = vadd.f32 1.0, %v3150_v26 }
 0x3fe   :  { %v1498_v63 = vadd.f32 1.0, %v3152_v41  ;;  %v3154_v31 = vpop.eup %3153 }
 0x3ff   :  { %3155 = vrcp.f32 %v1499_v54  ;;  %v1496_v22 = vadd.f32 1.0, %v3154_v31  ;;  %v5925_v31 = vld [vmem:[#allocation90_spill] sm:$0xff] }
 0x400   :  { %3157 = vpow2.f32 %v2881_v47 }
 0x401   :  { %3159 = vrcp.f32 %v1498_v63  ;;  %v5923_v63 = vld [vmem:[#allocation88_spill] sm:$0xff] }
 0x402   :  { %3161 = vrcp.f32 %v1497_v32  ;;  %v5924_v32 = vld [vmem:[#allocation89_spill] sm:$0xff] }
 0x403   :  { %3163 = vtanh.f32 %v4561_v4 }
 0x404   :  { %3165 = vrcp.f32 %v1496_v22  ;;  %v5930_v22 = vld [vmem:[#allocation95_spill] sm:$0xff] }
 0x409   :  { %v3156_v49 = vpop.eup %3155 }
 0x40a   :  { %v3158_v46 = vpop.eup %3157  ;;  %v1524_v37 = vmul.f32 2.0, %v3156_v49  ;;  %v5926_v49 = vld [vmem:[#allocation91_spill] sm:$0xff] }
 0x40b   :  { %v3160_v6 = vpop.eup %3159  ;;  %v1500_v15 = vadd.f32 1.0, %v3158_v46  ;;  %v5927_v46 = vld [vmem:[#allocation92_spill] sm:$0xff] }
 0x40c   :  { %v2883_v55 = vadd.f32 -1.0, %v1524_v37  ;;  %v3162_v11 = vpop.eup %3161  ;;  %v1526_v10 = vmul.f32 %v3160_v6, %v4414_v2  ;;  %v5922_v2 = vld [vmem:[#allocation87_spill] sm:$0xff]  ;;  %v5928_v37 = vld [vmem:[#allocation93_spill] sm:$0xff]  ;;  %v5929_v6 = vld [vmem:[#allocation94_spill] sm:$0xff] }
 0x40d   :  { %3167 = vrcp.f32 %v1500_v15  ;;  %v3164_v20 = vpop.eup %3163  ;;  %v5933_v15 = vld [vmem:[#allocation98_spill] sm:$0xff] }
 0x40e   :  { %v1527_v9 = vmul.f32 %v3162_v11, %v2883_v55  ;;  %v3166_v21 = vpop.eup %3165  ;;  %v5931_v55 = vld [vmem:[#allocation96_spill] sm:$0xff]  ;;  %v5932_v11 = vld [vmem:[#allocation97_spill] sm:$0xff] }
 0x40f   :  { %v1523_v26 = vmul.f32 %v3166_v21, %v3164_v20  ;;  %v5936_v20 = vld [vmem:[#allocation123_spill] sm:$0xff]  ;;  %v5937_v21 = vld [vmem:[#allocation124_spill] sm:$0xff] }
 0x410   :  { %v4580_v19 = vadd.f32 %v1527_v9, %v1526_v10  ;;  %v5934_v9 = vld [vmem:[#allocation99_spill] sm:$0xff]  ;;  %v5935_v10 = vld [vmem:[#allocation122_spill] sm:$0xff] }
 0x411   :  { %v4583_v54 = vpack.c.bf16 %v1523_v26, %v1523_v26  ;;  %v5940_v26 = vld [vmem:[#allocation127_spill] sm:$0xff] }
 0x412   :  { %3169 = vtanh.f32 %v4580_v19 }
 0x417   :  { %v3168_v27 = vpop.eup %3167 }
 0x41c   :  { %v3170_v28 = vpop.eup %3169 }
 0x41d   :  { %v1530_v47 = vmul.f32 %v3170_v28, %v3168_v27  ;;  %v5938_v27 = vld [vmem:[#allocation125_spill] sm:$0xff]  ;;  %v5939_v28 = vld [vmem:[#allocation126_spill] sm:$0xff] }
 0x41f   :  { %v1541_v41 = vpack.c.bf16 %v1530_v47, %v1530_v47  ;;  %v5941_v47 = vld [vmem:[#allocation128_spill] sm:$0xff] }
 0x421   :  { %1574 = vmatprep.mubr.bf16.mxu0 %v1541_v41  ;;  %1615 = vmatprep.mubr.bf16.mxu1 %v1541_v41 }
 0x422   :  { %1575 = vmatmul.mubr.bf16.vlgmr.msra.gmra.mrb[24].mxu0 %v4583_v54  ;;  %1616 = vmatmul.mubr.bf16.vlgmr.msra.gmra.mrb[24].mxu1 %v4583_v54 }
 0x423   :  { %1625 = vmatpush1.bf16.msra.mxu0 %v5748_v62  ;;  %1666 = vmatpush1.bf16.msra.mxu1 %v5749_v59 }
 0x424   :  { %1656 = vmatprep.mubr.bf16.mxu0 %v1541_v41  ;;  %1697 = vmatprep.mubr.bf16.mxu1 %v1541_v41  ;;  %v5942_v41 = vld [vmem:[#allocation129_spill] sm:$0xff] }
 0x425   :  { %1626 = vmatprep.subr.bf16.mxu0 %v5750_v13  ;;  %1667 = vmatprep.subr.bf16.mxu1 %v5751_v8 }
 0x427   :  { %1627 = vmatpush1.bf16.msra.mxu0 %v5752_v50  ;;  %1668 = vmatpush1.bf16.msra.mxu1 %v5753_v25 }
 0x428   :  { %1628 = vmatprep.subr.bf16.mxu0 %v5754_v61  ;;  %1669 = vmatprep.subr.bf16.mxu1 %v5755_v24 }
 0x42b   :  { %1629 = vmatpush1.bf16.msra.mxu0 %v5834_v12  ;;  %1670 = vmatpush1.bf16.msra.mxu1 %v5835_v45 }
 0x42c   :  { %1630 = vmatprep.subr.bf16.mxu0 %v5836_v5  ;;  %1671 = vmatprep.subr.bf16.mxu1 %v5837_v16 }
 0x42f   :  { %1631 = vmatpush1.bf16.msra.mxu0 %v5838_v18  ;;  %1672 = vmatpush1.bf16.msra.mxu1 %v5839_v40 }
 0x430   :  { %1632 = vmatprep.subr.bf16.mxu0 %v5840_v0  ;;  %1673 = vmatprep.subr.bf16.mxu1 %v5841_v53 }
 0x433   :  { %1633 = vmatpush1.bf16.msra.mxu0 %v5842_v17  ;;  %1674 = vmatpush1.bf16.msra.mxu1 %v5843_v7 }
 0x434   :  { %1634 = vmatprep.subr.bf16.mxu0 %v5922_v2  ;;  %1675 = vmatprep.subr.bf16.mxu1 %v5923_v63 }
 0x437   :  { %1635 = vmatpush1.bf16.msra.mxu0 %v5924_v32  ;;  %1676 = vmatpush1.bf16.msra.mxu1 %v5925_v31 }
 0x438   :  { %1636 = vmatprep.subr.bf16.mxu0 %v5926_v49  ;;  %1677 = vmatprep.subr.bf16.mxu1 %v5927_v46 }
 0x43b   :  { %1637 = vmatpush1.bf16.msra.mxu0 %v5928_v37  ;;  %1678 = vmatpush1.bf16.msra.mxu1 %v5929_v6 }
 0x43c   :  { %1638 = vmatprep.subr.bf16.mxu0 %v5930_v22  ;;  %1679 = vmatprep.subr.bf16.mxu1 %v5931_v55 }
 0x43f   :  { %1639 = vmatpush1.bf16.msra.mxu0 %v5932_v11  ;;  %1680 = vmatpush1.bf16.msra.mxu1 %v5933_v15 }
 0x440   :  { %1640 = vmatprep.subr.bf16.mxu0 %v5934_v9  ;;  %1681 = vmatprep.subr.bf16.mxu1 %v5857_v51 }
 0x443   :  { %1641 = vmatpush1.bf16.msra.mxu0 %v5858_v57  ;;  %1682 = vmatpush1.bf16.msra.mxu1 %v5859_v44 }
 0x444   :  { %1642 = vmatprep.subr.bf16.mxu0 %v5860_v43  ;;  %1683 = vmatprep.subr.bf16.mxu1 %v5861_v38 }
 0x447   :  { %1643 = vmatpush1.bf16.msra.mxu0 %v5862_v30  ;;  %1684 = vmatpush1.bf16.msra.mxu1 %v5863_v29 }
 0x448   :  { %1644 = vmatprep.subr.bf16.mxu0 %v5864_v35  ;;  %1685 = vmatprep.subr.bf16.mxu1 %v5865_v36 }
 0x44b   :  { %1645 = vmatpush1.bf16.msra.mxu0 %v5866_v52  ;;  %1686 = vmatpush1.bf16.msra.mxu1 %v5867_v1 }
 0x44c   :  { %1646 = vmatprep.subr.bf16.mxu0 %v5790_v3  ;;  %1687 = vmatprep.subr.bf16.mxu1 %v5791_v60 }
 0x44f   :  { %1647 = vmatpush1.bf16.msra.mxu0 %v5792_v58  ;;  %1688 = vmatpush1.bf16.msra.mxu1 %v5793_v42 }
 0x450   :  { %1648 = vmatprep.subr.bf16.mxu0 %v5794_v23  ;;  %1689 = vmatprep.subr.bf16.mxu1 %v5795_v33 }
 0x453   :  { %1649 = vmatpush1.bf16.msra.mxu0 %v5796_v34  ;;  %1690 = vmatpush1.bf16.msra.mxu1 %v5797_v39 }
 0x454   :  { %1650 = vmatprep.subr.bf16.mxu0 %v5798_v56  ;;  %1691 = vmatprep.subr.bf16.mxu1 %v5799_v48  ;;  %v5943_v56 = vld [vmem:[#allocation130_spill] sm:$0xff] }
 0x455   :  { %v5944_v48 = vld [vmem:[#allocation2_spill] sm:$0xff] }
 0x457   :  { %1651 = vmatpush1.bf16.msra.mxu0 %v5800_v14  ;;  %1692 = vmatpush1.bf16.msra.mxu1 %v5935_v10  ;;  %v5945_v14 = vld [vmem:[#allocation4_spill] sm:$0xff] }
 0x458   :  { %1652 = vmatprep.subr.bf16.mxu0 %v5936_v20  ;;  %1693 = vmatprep.subr.bf16.mxu1 %v5937_v21  ;;  %v5946_v21 = vld [vmem:[#allocation3_spill] sm:$0xff]  ;;  %v5955_v20 = vld [vmem:[#allocation13_spill] sm:$0xff] }
 0x45b   :  { %1653 = vmatpush1.bf16.msra.mxu0 %v5938_v27  ;;  %1694 = vmatpush1.bf16.msra.mxu1 %v5939_v28  ;;  %v5947_v27 = vld [vmem:[#allocation5_spill] sm:$0xff]  ;;  %v5948_v28 = vld [vmem:[#allocation6_spill] sm:$0xff] }
 0x45c   :  { %1654 = vmatprep.subr.bf16.mxu0 %v5940_v26  ;;  %1695 = vmatprep.subr.bf16.mxu1 %v5941_v47  ;;  %v5949_v26 = vld [vmem:[#allocation7_spill] sm:$0xff]  ;;  %v5950_v47 = vld [vmem:[#allocation8_spill] sm:$0xff] }
 0x45f   :  { %1655 = vmatpush1.bf16.msra.mxu0 %v5942_v41  ;;  %1696 = vmatpush1.bf16.msra.mxu1 %v5943_v56  ;;  %v5951_v41 = vld [vmem:[#allocation9_spill] sm:$0xff]  ;;  %v5952_v56 = vld [vmem:[#allocation10_spill] sm:$0xff] }
 0x460   :  { %1779 = vmatprep.subr.bf16.mxu0 %v5944_v48  ;;  %1820 = vmatprep.subr.bf16.mxu1 %v5945_v14  ;;  %v5953_v48 = vld [vmem:[#allocation11_spill] sm:$0xff]  ;;  %v5954_v14 = vld [vmem:[#allocation12_spill] sm:$0xff] }
 0x462   :  { %1657 = vmatmul.mubr.bf16.vlgmr.msra.gmra.mrb[28].mxu0 %v4583_v54  ;;  %1698 = vmatmul.mubr.bf16.vlgmr.msra.gmra.mrb[28].mxu1 %v4583_v54  ;;  %v5956_v54 = vld [vmem:[#allocation14_spill] sm:$0xff] }
 0x463   :  { %1780 = vmatpush1.bf16.msra.mxu0 %v5946_v21  ;;  %1821 = vmatpush1.bf16.msra.mxu1 %v5947_v27  ;;  %v5957_v21 = vld [vmem:[#allocation15_spill] sm:$0xff]  ;;  %v5958_v27 = vld [vmem:[#allocation16_spill] sm:$0xff] }
 0x464   :  { %1781 = vmatprep.subr.bf16.mxu0 %v5948_v28  ;;  %1822 = vmatprep.subr.bf16.mxu1 %v5949_v26  ;;  %v5959_v28 = vld [vmem:[#allocation17_spill] sm:$0xff]  ;;  %v5960_v26 = vld [vmem:[#allocation18_spill] sm:$0xff] }
 0x467   :  { %1782 = vmatpush1.bf16.msra.mxu0 %v5950_v47  ;;  %1823 = vmatpush1.bf16.msra.mxu1 %v5951_v41  ;;  %v5961_v47 = vld [vmem:[#allocation19_spill] sm:$0xff]  ;;  %v5962_v41 = vld [vmem:[#allocation20_spill] sm:$0xff] }
 0x468   :  { %1783 = vmatprep.subr.bf16.mxu0 %v5952_v56  ;;  %1824 = vmatprep.subr.bf16.mxu1 %v5953_v48  ;;  %v5963_v56 = vld [vmem:[#allocation21_spill] sm:$0xff]  ;;  %v5964_v48 = vld [vmem:[#allocation22_spill] sm:$0xff] }
 0x46b   :  { %1784 = vmatpush1.bf16.msra.mxu0 %v5954_v14  ;;  %1825 = vmatpush1.bf16.msra.mxu1 %v5955_v20  ;;  %v5965_v14 = vld [vmem:[#allocation23_spill] sm:$0xff]  ;;  %v5966_v20 = vld [vmem:[#allocation24_spill] sm:$0xff] }
 0x46c   :  { %1785 = vmatprep.subr.bf16.mxu0 %v5956_v54  ;;  %1826 = vmatprep.subr.bf16.mxu1 %v5957_v21  ;;  %v5967_v54 = vld [vmem:[#allocation25_spill] sm:$0xff]  ;;  %v5968_v21 = vld [vmem:[#allocation26_spill] sm:$0xff] }
 0x46f   :  { %1786 = vmatpush1.bf16.msra.mxu0 %v5958_v27  ;;  %1827 = vmatpush1.bf16.msra.mxu1 %v5959_v28  ;;  %v5969_v27 = vld [vmem:[#allocation27_spill] sm:$0xff]  ;;  %v5970_v28 = vld [vmem:[#allocation28_spill] sm:$0xff] }
 0x470   :  { %1787 = vmatprep.subr.bf16.mxu0 %v5960_v26  ;;  %1828 = vmatprep.subr.bf16.mxu1 %v5961_v47  ;;  %v5971_v26 = vld [vmem:[#allocation29_spill] sm:$0xff]  ;;  %v5972_v47 = vld [vmem:[#allocation30_spill] sm:$0xff] }
 0x473   :  { %1788 = vmatpush1.bf16.msra.mxu0 %v5962_v41  ;;  %1829 = vmatpush1.bf16.msra.mxu1 %v5963_v56  ;;  %v5973_v41 = vld [vmem:[#allocation31_spill] sm:$0xff]  ;;  %v5974_v56 = vld [vmem:[#allocation32_spill] sm:$0xff] }
 0x474   :  { %1789 = vmatprep.subr.bf16.mxu0 %v5964_v48  ;;  %1830 = vmatprep.subr.bf16.mxu1 %v5965_v14  ;;  %v5975_v48 = vld [vmem:[#allocation33_spill] sm:$0xff]  ;;  %v5976_v14 = vld [vmem:[#allocation34_spill] sm:$0xff] }
 0x477   :  { %1790 = vmatpush1.bf16.msra.mxu0 %v5966_v20  ;;  %1831 = vmatpush1.bf16.msra.mxu1 %v5967_v54  ;;  %v5977_v20 = vld [vmem:[#allocation35_spill] sm:$0xff]  ;;  %v5978_v54 = vld [vmem:[#allocation36_spill] sm:$0xff] }
 0x478   :  { %1791 = vmatprep.subr.bf16.mxu0 %v5968_v21  ;;  %1832 = vmatprep.subr.bf16.mxu1 %v5969_v27  ;;  %v5979_v21 = vld [vmem:[#allocation37_spill] sm:$0xff]  ;;  %v5980_v27 = vld [vmem:[#allocation38_spill] sm:$0xff] }
 0x47b   :  { %1792 = vmatpush1.bf16.msra.mxu0 %v5970_v28  ;;  %1833 = vmatpush1.bf16.msra.mxu1 %v5971_v26  ;;  %v5981_v28 = vld [vmem:[#allocation39_spill] sm:$0xff]  ;;  %v5982_v26 = vld [vmem:[#allocation40_spill] sm:$0xff] }
 0x47c   :  { %1793 = vmatprep.subr.bf16.mxu0 %v5972_v47  ;;  %1834 = vmatprep.subr.bf16.mxu1 %v5973_v41  ;;  %v5983_v47 = vld [vmem:[#allocation41_spill] sm:$0xff]  ;;  %v5984_v41 = vld [vmem:[#allocation42_spill] sm:$0xff] }
 0x47f   :  { %1794 = vmatpush1.bf16.msra.mxu0 %v5974_v56  ;;  %1835 = vmatpush1.bf16.msra.mxu1 %v5975_v48  ;;  %v5985_v56 = vld [vmem:[#allocation43_spill] sm:$0xff]  ;;  %v5986_v48 = vld [vmem:[#allocation44_spill] sm:$0xff] }
 0x480   :  { %1795 = vmatprep.subr.bf16.mxu0 %v5976_v14  ;;  %1836 = vmatprep.subr.bf16.mxu1 %v5977_v20  ;;  %v5987_v14 = vld [vmem:[#allocation45_spill] sm:$0xff]  ;;  %v5988_v20 = vld [vmem:[#allocation46_spill] sm:$0xff] }
 0x483   :  { %1796 = vmatpush1.bf16.msra.mxu0 %v5978_v54  ;;  %1837 = vmatpush1.bf16.msra.mxu1 %v5979_v21  ;;  %v5989_v54 = vld [vmem:[#allocation47_spill] sm:$0xff]  ;;  %v5990_v21 = vld [vmem:[#allocation48_spill] sm:$0xff] }
 0x484   :  { %1797 = vmatprep.subr.bf16.mxu0 %v5980_v27  ;;  %1838 = vmatprep.subr.bf16.mxu1 %v5981_v28  ;;  %v5991_v27 = vld [vmem:[#allocation49_spill] sm:$0xff]  ;;  %v5992_v28 = vld [vmem:[#allocation50_spill] sm:$0xff] }
 0x487   :  { %1798 = vmatpush1.bf16.msra.mxu0 %v5982_v26  ;;  %1839 = vmatpush1.bf16.msra.mxu1 %v5983_v47  ;;  %v5993_v26 = vld [vmem:[#allocation51_spill] sm:$0xff]  ;;  %v5994_v47 = vld [vmem:[#allocation52_spill] sm:$0xff] }
 0x488   :  { %1799 = vmatprep.subr.bf16.mxu0 %v5984_v41  ;;  %1840 = vmatprep.subr.bf16.mxu1 %v5985_v56  ;;  %v5995_v41 = vld [vmem:[#allocation53_spill] sm:$0xff]  ;;  %v5996_v56 = vld [vmem:[#allocation54_spill] sm:$0xff] }
 0x48b   :  { %1800 = vmatpush1.bf16.msra.mxu0 %v5986_v48  ;;  %1841 = vmatpush1.bf16.msra.mxu1 %v5987_v14  ;;  %v5997_v48 = vld [vmem:[#allocation55_spill] sm:$0xff]  ;;  %v5998_v14 = vld [vmem:[#allocation56_spill] sm:$0xff] }
 0x48c   :  { %1801 = vmatprep.subr.bf16.mxu0 %v5988_v20  ;;  %1842 = vmatprep.subr.bf16.mxu1 %v5989_v54  ;;  %v5999_v20 = vld [vmem:[#allocation57_spill] sm:$0xff]  ;;  %v6000_v54 = vld [vmem:[#allocation58_spill] sm:$0xff] }
 0x48f   :  { %1802 = vmatpush1.bf16.msra.mxu0 %v5990_v21  ;;  %1843 = vmatpush1.bf16.msra.mxu1 %v5991_v27  ;;  %v6001_v21 = vld [vmem:[#allocation59_spill] sm:$0xff]  ;;  %v6002_v27 = vld [vmem:[#allocation60_spill] sm:$0xff] }
 0x490   :  { %1803 = vmatprep.subr.bf16.mxu0 %v5992_v28  ;;  %1844 = vmatprep.subr.bf16.mxu1 %v5993_v26  ;;  %v6003_v28 = vld [vmem:[#allocation62_spill] sm:$0xff]  ;;  %v6004_v26 = vld [vmem:[#allocation63_spill] sm:$0xff] }
 0x493   :  { %1804 = vmatpush1.bf16.msra.mxu0 %v5994_v47  ;;  %1845 = vmatpush1.bf16.msra.mxu1 %v5995_v41  ;;  %v6005_v47 = vld [vmem:[#allocation64_spill] sm:$0xff]  ;;  %v6006_v41 = vld [vmem:[#allocation65_spill] sm:$0xff] }
 0x494   :  { %1805 = vmatprep.subr.bf16.mxu0 %v5996_v56  ;;  %1846 = vmatprep.subr.bf16.mxu1 %v5997_v48  ;;  %v6007_v56 = vld [vmem:[#allocation66_spill] sm:$0xff]  ;;  %v6008_v48 = vld [vmem:[#allocation67_spill] sm:$0xff] }
 0x497   :  { %1806 = vmatpush1.bf16.msra.mxu0 %v5998_v14  ;;  %1847 = vmatpush1.bf16.msra.mxu1 %v5999_v20  ;;  %v6009_v14 = vld [vmem:[#allocation68_spill] sm:$0xff] }
 0x498   :  { %1807 = vmatprep.subr.bf16.mxu0 %v6000_v54  ;;  %1848 = vmatprep.subr.bf16.mxu1 %v6001_v21  ;;  %v2884_v21 = vld [vmem:[%s5318_s0 + $0x100] sm:$0xff] }
 0x49b   :  { %1808 = vmatpush1.bf16.msra.mxu0 %v6002_v27  ;;  %1849 = vmatpush1.bf16.msra.mxu1 %v6003_v28  ;;  %v2886_v28 = vld [vmem:[%s5318_s0 + $0x110] sm:$0xff] }
 0x49c   :  { %1809 = vmatprep.subr.bf16.mxu0 %v6004_v26  ;;  %1850 = vmatprep.subr.bf16.mxu1 %v6005_v47  ;;  %v2885_v47 = vld [vmem:[%s5318_s0 + $0x108] sm:$0xff] }
 0x49f   :  { %1810 = vmatpush1.bf16.msra.mxu0 %v6006_v41  ;;  %1851 = vmatpush1.bf16.msra.mxu1 %v6007_v56 }
 0x4a0   :  { %1861 = vmatprep.subr.bf16.mxu0 %v6008_v48  ;;  %1902 = vmatprep.subr.bf16.mxu1 %v6009_v14 }
 0x4f5   :  { %v1576_v26 = vpop.f32.mrb[24].mxu0  ;;  %v1617_v41 = vpop.f32.mrb[24].mxu1 }
 0x4f6   :  { %v1577_v27 = vadd.f32 %v2884_v21, %v1576_v26  ;;  %v1618_v56 = vadd.f32 %v2886_v28, %v1617_v41  ;;  %v1578_v54 = vpop.f32.mrb[25].mxu0  ;;  %v1619_v48 = vpop.f32.mrb[25].mxu1 }
 0x4f7   :  { %v1579_v20 = vadd.f32 %v2885_v47, %v1578_v54  ;;  %v1580_v14 = vpop.f32.mrb[26].mxu0  ;;  %v1621_v10 = vpop.f32.mrb[26].mxu1 }
 0x4f8   :  { %v2892_v39 = vmul.f32 -1.442695, %v1577_v27  ;;  %v2894_v34 = vmul.f32 -1.442695, %v1618_v56  ;;  %v1581_v33 = vpop.f32.mrb[27].mxu0  ;;  %v1622_v23 = vpop.f32.mrb[27].mxu1 }
 0x4f9   :  { %v2893_v42 = vmul.f32 -1.442695, %v1579_v20 }
 0x4fa   :  { %3171 = vpow2.f32 %v2892_v39 }
 0x4fb   :  { %3173 = vpow2.f32 %v2894_v34 }
 0x4fc   :  { %3175 = vpow2.f32 %v2893_v42  ;;  %v2888_v42 = vld [vmem:[%s5318_s0 + $0x120] sm:$0xff] }
 0x504   :  { %v3172_v58 = vpop.eup %3171 }
 0x505   :  { %v3174_v60 = vpop.eup %3173  ;;  %v1730_v21 = vadd.f32 1.0, %v3172_v58 }
 0x506   :  { %v3176_v3 = vpop.eup %3175  ;;  %v1732_v1 = vadd.f32 1.0, %v3174_v60  ;;  %v2889_v60 = vld [vmem:[%s5318_s0 + $0x128] sm:$0xff] }
 0x507   :  { %v1731_v52 = vadd.f32 1.0, %v3176_v3  ;;  %v2890_v3 = vld [vmem:[%s5318_s0 + $0x130] sm:$0xff] }
 0x508   :  { %3177 = vrcp.f32 %v1732_v1 }
 0x509   :  { %3179 = vrcp.f32 %v1731_v52 }
 0x50a   :  { %3181 = vrcp.f32 %v1730_v21 }
 0x512   :  { %v3178_v28 = vpop.eup %3177 }
 0x513   :  { %v1754_v14 = vmul.f32 2.0, %v3178_v28  ;;  %v3180_v10 = vpop.eup %3179 }
 0x514   :  { %v3182_v56 = vpop.eup %3181  ;;  %v1756_v23 = vmul.f32 %v3180_v10, %v4561_v4 }
 0x515   :  { %v2900_v27 = vadd.f32 -1.0, %v1754_v14 }
 0x517   :  { %v1757_v33 = vmul.f32 %v3182_v56, %v2900_v27  ;;  %v2887_v27 = vld [vmem:[%s5318_s0 + $0x118] sm:$0xff] }
 0x518   :  { %v2891_v56 = vld [vmem:[%s5318_s0 + $0x138] sm:$0xff] }
 0x519   :  { %v4727_v39 = vadd.f32 %v1757_v33, %v1756_v23  ;;  %v1620_v33 = vadd.f32 %v2887_v27, %v1619_v48 }
 0x535   :  { %v1658_v58 = vpop.f32.mrb[28].mxu0  ;;  %v1699_v34 = vpop.f32.mrb[28].mxu1 }
 0x536   :  { %v1659_v52 = vadd.f32 %v2888_v42, %v1658_v58  ;;  %v1700_v1 = vadd.f32 %v2890_v3, %v1699_v34  ;;  %v1660_v20 = vpop.f32.mrb[29].mxu0  ;;  %v1701_v4 = vpop.f32.mrb[29].mxu1  ;;  %v2895_v42 = vmul.f32 -1.442695, %v1620_v33 }
 0x537   :  { %v1661_v26 = vadd.f32 %v2889_v60, %v1660_v20  ;;  %v1662_v47 = vpop.f32.mrb[30].mxu0  ;;  %v1703_v41 = vpop.f32.mrb[30].mxu1  ;;  %v1702_v23 = vadd.f32 %v2891_v56, %v1701_v4 }
 0x538   :  { %v2896_v54 = vmul.f32 -1.442695, %v1659_v52  ;;  %v2898_v21 = vmul.f32 -1.442695, %v1700_v1  ;;  %v1663_v28 = vpop.f32.mrb[31].mxu0  ;;  %v1704_v14 = vpop.f32.mrb[31].mxu1 }
 0x539   :  { %v2897_v10 = vmul.f32 -1.442695, %v1661_v26  ;;  %v2899_v58 = vmul.f32 -1.442695, %v1702_v23 }
 0x53a   :  { %3183 = vpow2.f32 %v2896_v54 }
 0x53b   :  { %3185 = vpow2.f32 %v2898_v21 }
 0x53c   :  { %3187 = vpow2.f32 %v2897_v10 }
 0x53d   :  { %3189 = vpow2.f32 %v2895_v42 }
 0x544   :  { %v3184_v3 = vpop.eup %3183 }
 0x545   :  { %v3186_v60 = vpop.eup %3185  ;;  %v1734_v20 = vadd.f32 1.0, %v3184_v3 }
 0x546   :  { %v3188_v34 = vpop.eup %3187  ;;  %v1736_v52 = vadd.f32 1.0, %v3186_v60 }
 0x547   :  { %v1735_v1 = vadd.f32 1.0, %v3188_v34  ;;  %v3190_v26 = vpop.eup %3189 }
 0x548   :  { %3191 = vrcp.f32 %v1736_v52  ;;  %v1733_v48 = vadd.f32 1.0, %v3190_v26  ;;  %v6013_v26 = vld [vmem:[#allocation112_spill] sm:$0xff] }
 0x549   :  { %3193 = vpow2.f32 %v2899_v58 }
 0x54a   :  { %3195 = vrcp.f32 %v1735_v1  ;;  %v6011_v1 = vld [vmem:[#allocation110_spill] sm:$0xff] }
 0x54b   :  { %3197 = vrcp.f32 %v1734_v20  ;;  %v6012_v20 = vld [vmem:[#allocation111_spill] sm:$0xff] }
 0x54c   :  { %3199 = vtanh.f32 %v4727_v39 }
 0x54d   :  { %3201 = vrcp.f32 %v1733_v48  ;;  %v6018_v48 = vld [vmem:[#allocation117_spill] sm:$0xff] }
 0x552   :  { %v3192_v47 = vpop.eup %3191 }
 0x553   :  { %v3194_v41 = vpop.eup %3193  ;;  %v1761_v54 = vmul.f32 2.0, %v3192_v47  ;;  %v6014_v47 = vld [vmem:[#allocation113_spill] sm:$0xff] }
 0x554   :  { %v3196_v21 = vpop.eup %3195  ;;  %v1737_v14 = vadd.f32 1.0, %v3194_v41  ;;  %v6015_v41 = vld [vmem:[#allocation114_spill] sm:$0xff] }
 0x555   :  { %v2901_v4 = vadd.f32 -1.0, %v1761_v54  ;;  %v3198_v28 = vpop.eup %3197  ;;  %v1763_v27 = vmul.f32 %v3196_v21, %v4580_v19  ;;  %v6010_v19 = vld [vmem:[#allocation109_spill] sm:$0xff]  ;;  %v6016_v54 = vld [vmem:[#allocation115_spill] sm:$0xff]  ;;  %v6017_v21 = vld [vmem:[#allocation116_spill] sm:$0xff] }
 0x556   :  { %3203 = vrcp.f32 %v1737_v14  ;;  %v3200_v33 = vpop.eup %3199  ;;  %v6021_v14 = vld [vmem:[#allocation120_spill] sm:$0xff] }
 0x557   :  { %v1764_v10 = vmul.f32 %v3198_v28, %v2901_v4  ;;  %v3202_v23 = vpop.eup %3201  ;;  %v6019_v4 = vld [vmem:[#allocation118_spill] sm:$0xff]  ;;  %v6020_v28 = vld [vmem:[#allocation119_spill] sm:$0xff] }
 0x558   :  { %v1760_v60 = vmul.f32 %v3202_v23, %v3200_v33  ;;  %v6024_v33 = vld [vmem:[#allocation123_spill] sm:$0xff]  ;;  %v6025_v23 = vld [vmem:[#allocation124_spill] sm:$0xff] }
 0x559   :  { %v4746_v56 = vadd.f32 %v1764_v10, %v1763_v27  ;;  %v6022_v10 = vld [vmem:[#allocation121_spill] sm:$0xff]  ;;  %v6023_v27 = vld [vmem:[#allocation122_spill] sm:$0xff] }
 0x55a   :  { %v4749_v52 = vpack.c.bf16 %v1760_v60, %v1760_v60  ;;  %v6028_v60 = vld [vmem:[#allocation127_spill] sm:$0xff] }
 0x55b   :  { %3205 = vtanh.f32 %v4746_v56 }
 0x560   :  { %v3204_v42 = vpop.eup %3203 }
 0x565   :  { %v3206_v3 = vpop.eup %3205 }
 0x566   :  { %v1767_v58 = vmul.f32 %v3206_v3, %v3204_v42  ;;  %v6026_v42 = vld [vmem:[#allocation125_spill] sm:$0xff]  ;;  %v6027_v3 = vld [vmem:[#allocation126_spill] sm:$0xff] }
 0x568   :  { %v1778_v34 = vpack.c.bf16 %v1767_v58, %v1767_v58  ;;  %v6029_v58 = vld [vmem:[#allocation128_spill] sm:$0xff] }
 0x56a   :  { %1811 = vmatprep.mubr.bf16.mxu0 %v1778_v34  ;;  %1852 = vmatprep.mubr.bf16.mxu1 %v1778_v34 }
 0x56b   :  { %1812 = vmatmul.mubr.bf16.vlgmr.msra.gmra.mrb[32].mxu0 %v4749_v52  ;;  %1853 = vmatmul.mubr.bf16.vlgmr.msra.gmra.mrb[32].mxu1 %v4749_v52 }
 0x56c   :  { %1862 = vmatpush1.bf16.msra.mxu0 %v5748_v62  ;;  %1903 = vmatpush1.bf16.msra.mxu1 %v5749_v59 }
 0x56d   :  { %1893 = vmatprep.mubr.bf16.mxu0 %v1778_v34  ;;  %1934 = vmatprep.mubr.bf16.mxu1 %v1778_v34  ;;  %v6030_v34 = vld [vmem:[#allocation129_spill] sm:$0xff] }
 0x56e   :  { %1863 = vmatprep.subr.bf16.mxu0 %v5750_v13  ;;  %1904 = vmatprep.subr.bf16.mxu1 %v5751_v8 }
 0x570   :  { %1864 = vmatpush1.bf16.msra.mxu0 %v5752_v50  ;;  %1905 = vmatpush1.bf16.msra.mxu1 %v5753_v25 }
 0x571   :  { %1865 = vmatprep.subr.bf16.mxu0 %v5754_v61  ;;  %1906 = vmatprep.subr.bf16.mxu1 %v5755_v24 }
 0x574   :  { %1866 = vmatpush1.bf16.msra.mxu0 %v5834_v12  ;;  %1907 = vmatpush1.bf16.msra.mxu1 %v5835_v45 }
 0x575   :  { %1867 = vmatprep.subr.bf16.mxu0 %v5836_v5  ;;  %1908 = vmatprep.subr.bf16.mxu1 %v5837_v16 }
 0x578   :  { %1868 = vmatpush1.bf16.msra.mxu0 %v5838_v18  ;;  %1909 = vmatpush1.bf16.msra.mxu1 %v5839_v40 }
 0x579   :  { %1869 = vmatprep.subr.bf16.mxu0 %v5840_v0  ;;  %1910 = vmatprep.subr.bf16.mxu1 %v5841_v53 }
 0x57c   :  { %1870 = vmatpush1.bf16.msra.mxu0 %v5842_v17  ;;  %1911 = vmatpush1.bf16.msra.mxu1 %v5843_v7 }
 0x57d   :  { %1871 = vmatprep.subr.bf16.mxu0 %v5922_v2  ;;  %1912 = vmatprep.subr.bf16.mxu1 %v5923_v63 }
 0x580   :  { %1872 = vmatpush1.bf16.msra.mxu0 %v5924_v32  ;;  %1913 = vmatpush1.bf16.msra.mxu1 %v5925_v31 }
 0x581   :  { %1873 = vmatprep.subr.bf16.mxu0 %v5926_v49  ;;  %1914 = vmatprep.subr.bf16.mxu1 %v5927_v46 }
 0x584   :  { %1874 = vmatpush1.bf16.msra.mxu0 %v5928_v37  ;;  %1915 = vmatpush1.bf16.msra.mxu1 %v5929_v6 }
 0x585   :  { %1875 = vmatprep.subr.bf16.mxu0 %v5930_v22  ;;  %1916 = vmatprep.subr.bf16.mxu1 %v5931_v55 }
 0x588   :  { %1876 = vmatpush1.bf16.msra.mxu0 %v5932_v11  ;;  %1917 = vmatpush1.bf16.msra.mxu1 %v5933_v15 }
 0x589   :  { %1877 = vmatprep.subr.bf16.mxu0 %v5934_v9  ;;  %1918 = vmatprep.subr.bf16.mxu1 %v5857_v51 }
 0x58c   :  { %1878 = vmatpush1.bf16.msra.mxu0 %v5858_v57  ;;  %1919 = vmatpush1.bf16.msra.mxu1 %v5859_v44 }
 0x58d   :  { %1879 = vmatprep.subr.bf16.mxu0 %v5860_v43  ;;  %1920 = vmatprep.subr.bf16.mxu1 %v5861_v38 }
 0x590   :  { %1880 = vmatpush1.bf16.msra.mxu0 %v5862_v30  ;;  %1921 = vmatpush1.bf16.msra.mxu1 %v5863_v29 }
 0x591   :  { %1881 = vmatprep.subr.bf16.mxu0 %v5864_v35  ;;  %1922 = vmatprep.subr.bf16.mxu1 %v5865_v36 }
 0x594   :  { %1882 = vmatpush1.bf16.msra.mxu0 %v6010_v19  ;;  %1923 = vmatpush1.bf16.msra.mxu1 %v6011_v1 }
 0x595   :  { %1883 = vmatprep.subr.bf16.mxu0 %v6012_v20  ;;  %1924 = vmatprep.subr.bf16.mxu1 %v6013_v26 }
 0x598   :  { %1884 = vmatpush1.bf16.msra.mxu0 %v6014_v47  ;;  %1925 = vmatpush1.bf16.msra.mxu1 %v6015_v41 }
 0x599   :  { %1885 = vmatprep.subr.bf16.mxu0 %v6016_v54  ;;  %1926 = vmatprep.subr.bf16.mxu1 %v6017_v21 }
 0x59c   :  { %1886 = vmatpush1.bf16.msra.mxu0 %v6018_v48  ;;  %1927 = vmatpush1.bf16.msra.mxu1 %v6019_v4 }
 0x59d   :  { %1887 = vmatprep.subr.bf16.mxu0 %v6020_v28  ;;  %1928 = vmatprep.subr.bf16.mxu1 %v6021_v14  ;;  %v6031_v28 = vld [vmem:[#allocation130_spill] sm:$0xff] }
 0x59e   :  { %v6032_v14 = vld [vmem:[#allocation2_spill] sm:$0xff] }
 0x5a0   :  { %1888 = vmatpush1.bf16.msra.mxu0 %v6022_v10  ;;  %1929 = vmatpush1.bf16.msra.mxu1 %v6023_v27  ;;  %v6033_v10 = vld [vmem:[#allocation4_spill] sm:$0xff] }
 0x5a1   :  { %1889 = vmatprep.subr.bf16.mxu0 %v6024_v33  ;;  %1930 = vmatprep.subr.bf16.mxu1 %v6025_v23  ;;  %v6034_v23 = vld [vmem:[#allocation3_spill] sm:$0xff]  ;;  %v6043_v33 = vld [vmem:[#allocation13_spill] sm:$0xff] }
 0x5a4   :  { %1890 = vmatpush1.bf16.msra.mxu0 %v6026_v42  ;;  %1931 = vmatpush1.bf16.msra.mxu1 %v6027_v3  ;;  %v6035_v42 = vld [vmem:[#allocation5_spill] sm:$0xff]  ;;  %v6036_v3 = vld [vmem:[#allocation6_spill] sm:$0xff] }
 0x5a5   :  { %1891 = vmatprep.subr.bf16.mxu0 %v6028_v60  ;;  %1932 = vmatprep.subr.bf16.mxu1 %v6029_v58  ;;  %v6037_v60 = vld [vmem:[#allocation7_spill] sm:$0xff]  ;;  %v6038_v58 = vld [vmem:[#allocation8_spill] sm:$0xff] }
 0x5a8   :  { %1892 = vmatpush1.bf16.msra.mxu0 %v6030_v34  ;;  %1933 = vmatpush1.bf16.msra.mxu1 %v6031_v28  ;;  %v6039_v34 = vld [vmem:[#allocation9_spill] sm:$0xff]  ;;  %v6040_v28 = vld [vmem:[#allocation10_spill] sm:$0xff] }
 0x5a9   :  { %2016 = vmatprep.subr.bf16.mxu0 %v6032_v14  ;;  %2057 = vmatprep.subr.bf16.mxu1 %v6033_v10  ;;  %v6041_v14 = vld [vmem:[#allocation11_spill] sm:$0xff]  ;;  %v6042_v10 = vld [vmem:[#allocation12_spill] sm:$0xff] }
 0x5ab   :  { %1894 = vmatmul.mubr.bf16.vlgmr.msra.gmra.mrb[36].mxu0 %v4749_v52  ;;  %1935 = vmatmul.mubr.bf16.vlgmr.msra.gmra.mrb[36].mxu1 %v4749_v52  ;;  %v6044_v52 = vld [vmem:[#allocation14_spill] sm:$0xff] }
 0x5ac   :  { %2017 = vmatpush1.bf16.msra.mxu0 %v6034_v23  ;;  %2058 = vmatpush1.bf16.msra.mxu1 %v6035_v42  ;;  %v6045_v23 = vld [vmem:[#allocation15_spill] sm:$0xff]  ;;  %v6046_v42 = vld [vmem:[#allocation16_spill] sm:$0xff] }
 0x5ad   :  { %2018 = vmatprep.subr.bf16.mxu0 %v6036_v3  ;;  %2059 = vmatprep.subr.bf16.mxu1 %v6037_v60  ;;  %v6047_v3 = vld [vmem:[#allocation17_spill] sm:$0xff]  ;;  %v6048_v60 = vld [vmem:[#allocation18_spill] sm:$0xff] }
 0x5b0   :  { %2019 = vmatpush1.bf16.msra.mxu0 %v6038_v58  ;;  %2060 = vmatpush1.bf16.msra.mxu1 %v6039_v34  ;;  %v6049_v58 = vld [vmem:[#allocation19_spill] sm:$0xff]  ;;  %v6050_v34 = vld [vmem:[#allocation20_spill] sm:$0xff] }
 0x5b1   :  { %2020 = vmatprep.subr.bf16.mxu0 %v6040_v28  ;;  %2061 = vmatprep.subr.bf16.mxu1 %v6041_v14  ;;  %v6051_v28 = vld [vmem:[#allocation21_spill] sm:$0xff]  ;;  %v6052_v14 = vld [vmem:[#allocation22_spill] sm:$0xff] }
 0x5b4   :  { %2021 = vmatpush1.bf16.msra.mxu0 %v6042_v10  ;;  %2062 = vmatpush1.bf16.msra.mxu1 %v6043_v33  ;;  %v6053_v10 = vld [vmem:[#allocation23_spill] sm:$0xff]  ;;  %v6054_v33 = vld [vmem:[#allocation24_spill] sm:$0xff] }
 0x5b5   :  { %2022 = vmatprep.subr.bf16.mxu0 %v6044_v52  ;;  %2063 = vmatprep.subr.bf16.mxu1 %v6045_v23  ;;  %v6055_v52 = vld [vmem:[#allocation25_spill] sm:$0xff]  ;;  %v6056_v23 = vld [vmem:[#allocation26_spill] sm:$0xff] }
 0x5b8   :  { %2023 = vmatpush1.bf16.msra.mxu0 %v6046_v42  ;;  %2064 = vmatpush1.bf16.msra.mxu1 %v6047_v3  ;;  %v6057_v42 = vld [vmem:[#allocation27_spill] sm:$0xff]  ;;  %v6058_v3 = vld [vmem:[#allocation28_spill] sm:$0xff] }
 0x5b9   :  { %2024 = vmatprep.subr.bf16.mxu0 %v6048_v60  ;;  %2065 = vmatprep.subr.bf16.mxu1 %v6049_v58  ;;  %v6059_v60 = vld [vmem:[#allocation29_spill] sm:$0xff]  ;;  %v6060_v58 = vld [vmem:[#allocation30_spill] sm:$0xff] }
 0x5bc   :  { %2025 = vmatpush1.bf16.msra.mxu0 %v6050_v34  ;;  %2066 = vmatpush1.bf16.msra.mxu1 %v6051_v28  ;;  %v6061_v34 = vld [vmem:[#allocation31_spill] sm:$0xff]  ;;  %v6062_v28 = vld [vmem:[#allocation32_spill] sm:$0xff] }
 0x5bd   :  { %2026 = vmatprep.subr.bf16.mxu0 %v6052_v14  ;;  %2067 = vmatprep.subr.bf16.mxu1 %v6053_v10  ;;  %v6063_v14 = vld [vmem:[#allocation33_spill] sm:$0xff]  ;;  %v6064_v10 = vld [vmem:[#allocation34_spill] sm:$0xff] }
 0x5c0   :  { %2027 = vmatpush1.bf16.msra.mxu0 %v6054_v33  ;;  %2068 = vmatpush1.bf16.msra.mxu1 %v6055_v52  ;;  %v6065_v33 = vld [vmem:[#allocation35_spill] sm:$0xff]  ;;  %v6066_v52 = vld [vmem:[#allocation36_spill] sm:$0xff] }
 0x5c1   :  { %2028 = vmatprep.subr.bf16.mxu0 %v6056_v23  ;;  %2069 = vmatprep.subr.bf16.mxu1 %v6057_v42  ;;  %v6067_v23 = vld [vmem:[#allocation37_spill] sm:$0xff]  ;;  %v6068_v42 = vld [vmem:[#allocation38_spill] sm:$0xff] }
 0x5c4   :  { %2029 = vmatpush1.bf16.msra.mxu0 %v6058_v3  ;;  %2070 = vmatpush1.bf16.msra.mxu1 %v6059_v60  ;;  %v6069_v3 = vld [vmem:[#allocation39_spill] sm:$0xff]  ;;  %v6070_v60 = vld [vmem:[#allocation40_spill] sm:$0xff] }
 0x5c5   :  { %2030 = vmatprep.subr.bf16.mxu0 %v6060_v58  ;;  %2071 = vmatprep.subr.bf16.mxu1 %v6061_v34  ;;  %v6071_v58 = vld [vmem:[#allocation41_spill] sm:$0xff]  ;;  %v6072_v34 = vld [vmem:[#allocation42_spill] sm:$0xff] }
 0x5c8   :  { %2031 = vmatpush1.bf16.msra.mxu0 %v6062_v28  ;;  %2072 = vmatpush1.bf16.msra.mxu1 %v6063_v14  ;;  %v6073_v28 = vld [vmem:[#allocation43_spill] sm:$0xff]  ;;  %v6074_v14 = vld [vmem:[#allocation44_spill] sm:$0xff] }
 0x5c9   :  { %2032 = vmatprep.subr.bf16.mxu0 %v6064_v10  ;;  %2073 = vmatprep.subr.bf16.mxu1 %v6065_v33  ;;  %v6075_v10 = vld [vmem:[#allocation45_spill] sm:$0xff]  ;;  %v6076_v33 = vld [vmem:[#allocation46_spill] sm:$0xff] }
 0x5cc   :  { %2033 = vmatpush1.bf16.msra.mxu0 %v6066_v52  ;;  %2074 = vmatpush1.bf16.msra.mxu1 %v6067_v23  ;;  %v6077_v52 = vld [vmem:[#allocation47_spill] sm:$0xff]  ;;  %v6078_v23 = vld [vmem:[#allocation48_spill] sm:$0xff] }
 0x5cd   :  { %2034 = vmatprep.subr.bf16.mxu0 %v6068_v42  ;;  %2075 = vmatprep.subr.bf16.mxu1 %v6069_v3  ;;  %v6079_v42 = vld [vmem:[#allocation49_spill] sm:$0xff]  ;;  %v6080_v3 = vld [vmem:[#allocation50_spill] sm:$0xff] }
 0x5d0   :  { %2035 = vmatpush1.bf16.msra.mxu0 %v6070_v60  ;;  %2076 = vmatpush1.bf16.msra.mxu1 %v6071_v58  ;;  %v6081_v60 = vld [vmem:[#allocation51_spill] sm:$0xff]  ;;  %v6082_v58 = vld [vmem:[#allocation52_spill] sm:$0xff] }
 0x5d1   :  { %2036 = vmatprep.subr.bf16.mxu0 %v6072_v34  ;;  %2077 = vmatprep.subr.bf16.mxu1 %v6073_v28  ;;  %v6083_v34 = vld [vmem:[#allocation53_spill] sm:$0xff]  ;;  %v6084_v28 = vld [vmem:[#allocation54_spill] sm:$0xff] }
 0x5d4   :  { %2037 = vmatpush1.bf16.msra.mxu0 %v6074_v14  ;;  %2078 = vmatpush1.bf16.msra.mxu1 %v6075_v10  ;;  %v6085_v14 = vld [vmem:[#allocation55_spill] sm:$0xff]  ;;  %v6086_v10 = vld [vmem:[#allocation56_spill] sm:$0xff] }
 0x5d5   :  { %2038 = vmatprep.subr.bf16.mxu0 %v6076_v33  ;;  %2079 = vmatprep.subr.bf16.mxu1 %v6077_v52  ;;  %v6087_v33 = vld [vmem:[#allocation57_spill] sm:$0xff]  ;;  %v6088_v52 = vld [vmem:[#allocation58_spill] sm:$0xff] }
 0x5d8   :  { %2039 = vmatpush1.bf16.msra.mxu0 %v6078_v23  ;;  %2080 = vmatpush1.bf16.msra.mxu1 %v6079_v42  ;;  %v6089_v23 = vld [vmem:[#allocation59_spill] sm:$0xff]  ;;  %v6090_v42 = vld [vmem:[#allocation60_spill] sm:$0xff] }
 0x5d9   :  { %2040 = vmatprep.subr.bf16.mxu0 %v6080_v3  ;;  %2081 = vmatprep.subr.bf16.mxu1 %v6081_v60  ;;  %v6091_v3 = vld [vmem:[#allocation62_spill] sm:$0xff]  ;;  %v6092_v60 = vld [vmem:[#allocation63_spill] sm:$0xff] }
 0x5dc   :  { %2041 = vmatpush1.bf16.msra.mxu0 %v6082_v58  ;;  %2082 = vmatpush1.bf16.msra.mxu1 %v6083_v34  ;;  %v6093_v58 = vld [vmem:[#allocation64_spill] sm:$0xff]  ;;  %v6094_v34 = vld [vmem:[#allocation65_spill] sm:$0xff] }
 0x5dd   :  { %2042 = vmatprep.subr.bf16.mxu0 %v6084_v28  ;;  %2083 = vmatprep.subr.bf16.mxu1 %v6085_v14  ;;  %v6095_v28 = vld [vmem:[#allocation66_spill] sm:$0xff]  ;;  %v6096_v14 = vld [vmem:[#allocation67_spill] sm:$0xff] }
 0x5e0   :  { %2043 = vmatpush1.bf16.msra.mxu0 %v6086_v10  ;;  %2084 = vmatpush1.bf16.msra.mxu1 %v6087_v33  ;;  %v6097_v10 = vld [vmem:[#allocation68_spill] sm:$0xff] }
 0x5e1   :  { %2044 = vmatprep.subr.bf16.mxu0 %v6088_v52  ;;  %2085 = vmatprep.subr.bf16.mxu1 %v6089_v23  ;;  %v2902_v23 = vld [vmem:[%s5318_s0 + $0x140] sm:$0xff] }
 0x5e4   :  { %2045 = vmatpush1.bf16.msra.mxu0 %v6090_v42  ;;  %2086 = vmatpush1.bf16.msra.mxu1 %v6091_v3  ;;  %v2904_v3 = vld [vmem:[%s5318_s0 + $0x150] sm:$0xff] }
 0x5e5   :  { %2046 = vmatprep.subr.bf16.mxu0 %v6092_v60  ;;  %2087 = vmatprep.subr.bf16.mxu1 %v6093_v58  ;;  %v2903_v58 = vld [vmem:[%s5318_s0 + $0x148] sm:$0xff] }
 0x5e8   :  { %2047 = vmatpush1.bf16.msra.mxu0 %v6094_v34  ;;  %2088 = vmatpush1.bf16.msra.mxu1 %v6095_v28 }
 0x5e9   :  { %2098 = vmatprep.subr.bf16.mxu0 %v6096_v14  ;;  %2139 = vmatprep.subr.bf16.mxu1 %v6097_v10 }
 0x63e   :  { %v1813_v60 = vpop.f32.mrb[32].mxu0  ;;  %v1854_v34 = vpop.f32.mrb[32].mxu1 }
 0x63f   :  { %v1814_v42 = vadd.f32 %v2902_v23, %v1813_v60  ;;  %v1855_v28 = vadd.f32 %v2904_v3, %v1854_v34  ;;  %v1815_v52 = vpop.f32.mrb[33].mxu0  ;;  %v1856_v14 = vpop.f32.mrb[33].mxu1 }
 0x640   :  { %v1816_v33 = vadd.f32 %v2903_v58, %v1815_v52  ;;  %v1817_v10 = vpop.f32.mrb[34].mxu0  ;;  %v1858_v27 = vpop.f32.mrb[34].mxu1 }
 0x641   :  { %v2910_v4 = vmul.f32 -1.442695, %v1814_v42  ;;  %v2912_v48 = vmul.f32 -1.442695, %v1855_v28  ;;  %v1818_v21 = vpop.f32.mrb[35].mxu0  ;;  %v1859_v54 = vpop.f32.mrb[35].mxu1 }
 0x642   :  { %v2911_v41 = vmul.f32 -1.442695, %v1816_v33 }
 0x643   :  { %3207 = vpow2.f32 %v2910_v4 }
 0x644   :  { %3209 = vpow2.f32 %v2912_v48 }
 0x645   :  { %3211 = vpow2.f32 %v2911_v41  ;;  %v2906_v41 = vld [vmem:[%s5318_s0 + $0x160] sm:$0xff] }
 0x64d   :  { %v3208_v47 = vpop.eup %3207 }
 0x64e   :  { %v3210_v26 = vpop.eup %3209  ;;  %v1967_v23 = vadd.f32 1.0, %v3208_v47 }
 0x64f   :  { %v3212_v20 = vpop.eup %3211  ;;  %v1969_v1 = vadd.f32 1.0, %v3210_v26 }
 0x650   :  { %v1968_v19 = vadd.f32 1.0, %v3212_v20 }
 0x651   :  { %3213 = vrcp.f32 %v1969_v1  ;;  %v2908_v1 = vld [vmem:[%s5318_s0 + $0x170] sm:$0xff] }
 0x652   :  { %3215 = vrcp.f32 %v1968_v19  ;;  %v2907_v19 = vld [vmem:[%s5318_s0 + $0x168] sm:$0xff] }
 0x653   :  { %3217 = vrcp.f32 %v1967_v23 }
 0x65b   :  { %v3214_v3 = vpop.eup %3213 }
 0x65c   :  { %v1991_v10 = vmul.f32 2.0, %v3214_v3  ;;  %v3216_v27 = vpop.eup %3215 }
 0x65d   :  { %v3218_v28 = vpop.eup %3217  ;;  %v1993_v54 = vmul.f32 %v3216_v27, %v4727_v39 }
 0x65e   :  { %v2918_v42 = vadd.f32 -1.0, %v1991_v10 }
 0x660   :  { %v1994_v21 = vmul.f32 %v3218_v28, %v2918_v42  ;;  %v2905_v42 = vld [vmem:[%s5318_s0 + $0x158] sm:$0xff] }
 0x661   :  { %v2909_v28 = vld [vmem:[%s5318_s0 + $0x178] sm:$0xff] }
 0x662   :  { %v4893_v4 = vadd.f32 %v1994_v21, %v1993_v54  ;;  %v1857_v21 = vadd.f32 %v2905_v42, %v1856_v14 }
 0x67e   :  { %v1895_v20 = vpop.f32.mrb[36].mxu0  ;;  %v1936_v26 = vpop.f32.mrb[36].mxu1 }
 0x67f   :  { %v1896_v47 = vadd.f32 %v2906_v41, %v1895_v20  ;;  %v1937_v48 = vadd.f32 %v2908_v1, %v1936_v26  ;;  %v1897_v33 = vpop.f32.mrb[37].mxu0  ;;  %v1938_v39 = vpop.f32.mrb[37].mxu1  ;;  %v2913_v41 = vmul.f32 -1.442695, %v1857_v21 }
 0x680   :  { %v1898_v60 = vadd.f32 %v2907_v19, %v1897_v33  ;;  %v1899_v58 = vpop.f32.mrb[38].mxu0  ;;  %v1940_v34 = vpop.f32.mrb[38].mxu1  ;;  %v1939_v54 = vadd.f32 %v2909_v28, %v1938_v39 }
 0x681   :  { %v2914_v52 = vmul.f32 -1.442695, %v1896_v47  ;;  %v2916_v23 = vmul.f32 -1.442695, %v1937_v48  ;;  %v1900_v3 = vpop.f32.mrb[39].mxu0  ;;  %v1941_v10 = vpop.f32.mrb[39].mxu1 }
 0x682   :  { %v2915_v27 = vmul.f32 -1.442695, %v1898_v60  ;;  %v2917_v20 = vmul.f32 -1.442695, %v1939_v54 }
 0x683   :  { %3219 = vpow2.f32 %v2914_v52 }
 0x684   :  { %3221 = vpow2.f32 %v2916_v23 }
 0x685   :  { %3223 = vpow2.f32 %v2915_v27 }
 0x686   :  { %3225 = vpow2.f32 %v2913_v41 }
 0x68d   :  { %v3220_v1 = vpop.eup %3219 }
 0x68e   :  { %v3222_v19 = vpop.eup %3221  ;;  %v1971_v33 = vadd.f32 1.0, %v3220_v1 }
 0x68f   :  { %v3224_v26 = vpop.eup %3223  ;;  %v1973_v47 = vadd.f32 1.0, %v3222_v19 }
 0x690   :  { %v1972_v48 = vadd.f32 1.0, %v3224_v26  ;;  %v3226_v60 = vpop.eup %3225 }
 0x691   :  { %3227 = vrcp.f32 %v1973_v47  ;;  %v1970_v14 = vadd.f32 1.0, %v3226_v60  ;;  %v6101_v60 = vld [vmem:[#allocation112_spill] sm:$0xff] }
 0x692   :  { %3229 = vpow2.f32 %v2917_v20 }
 0x693   :  { %3231 = vrcp.f32 %v1972_v48  ;;  %v6099_v48 = vld [vmem:[#allocation110_spill] sm:$0xff] }
 0x694   :  { %3233 = vrcp.f32 %v1971_v33  ;;  %v6100_v33 = vld [vmem:[#allocation111_spill] sm:$0xff] }
 0x695   :  { %3235 = vtanh.f32 %v4893_v4 }
 0x696   :  { %3237 = vrcp.f32 %v1970_v14  ;;  %v6106_v14 = vld [vmem:[#allocation117_spill] sm:$0xff] }
 0x69b   :  { %v3228_v58 = vpop.eup %3227 }
 0x69c   :  { %v3230_v34 = vpop.eup %3229  ;;  %v1998_v52 = vmul.f32 2.0, %v3228_v58  ;;  %v6102_v58 = vld [vmem:[#allocation113_spill] sm:$0xff] }
 0x69d   :  { %v3232_v23 = vpop.eup %3231  ;;  %v1974_v10 = vadd.f32 1.0, %v3230_v34  ;;  %v6103_v34 = vld [vmem:[#allocation114_spill] sm:$0xff] }
 0x69e   :  { %v2919_v39 = vadd.f32 -1.0, %v1998_v52  ;;  %v3234_v3 = vpop.eup %3233  ;;  %v2000_v42 = vmul.f32 %v3232_v23, %v4746_v56  ;;  %v6098_v56 = vld [vmem:[#allocation109_spill] sm:$0xff]  ;;  %v6104_v52 = vld [vmem:[#allocation115_spill] sm:$0xff]  ;;  %v6105_v23 = vld [vmem:[#allocation116_spill] sm:$0xff] }
 0x69f   :  { %3239 = vrcp.f32 %v1974_v10  ;;  %v3236_v21 = vpop.eup %3235  ;;  %v6109_v10 = vld [vmem:[#allocation120_spill] sm:$0xff] }
 0x6a0   :  { %v2001_v27 = vmul.f32 %v3234_v3, %v2919_v39  ;;  %v3238_v54 = vpop.eup %3237  ;;  %v6107_v39 = vld [vmem:[#allocation118_spill] sm:$0xff]  ;;  %v6108_v3 = vld [vmem:[#allocation119_spill] sm:$0xff] }
 0x6a1   :  { %v1997_v19 = vmul.f32 %v3238_v54, %v3236_v21  ;;  %v6112_v21 = vld [vmem:[#allocation123_spill] sm:$0xff]  ;;  %v6113_v54 = vld [vmem:[#allocation124_spill] sm:$0xff] }
 0x6a2   :  { %v4912_v28 = vadd.f32 %v2001_v27, %v2000_v42  ;;  %v6110_v27 = vld [vmem:[#allocation121_spill] sm:$0xff]  ;;  %v6111_v42 = vld [vmem:[#allocation122_spill] sm:$0xff] }
 0x6a3   :  { %v4915_v47 = vpack.c.bf16 %v1997_v19, %v1997_v19  ;;  %v6116_v19 = vld [vmem:[#allocation127_spill] sm:$0xff] }
 0x6a4   :  { %3241 = vtanh.f32 %v4912_v28 }
 0x6a9   :  { %v3240_v41 = vpop.eup %3239 }
 0x6ae   :  { %v3242_v1 = vpop.eup %3241 }
 0x6af   :  { %v2004_v20 = vmul.f32 %v3242_v1, %v3240_v41  ;;  %v6114_v41 = vld [vmem:[#allocation125_spill] sm:$0xff]  ;;  %v6115_v1 = vld [vmem:[#allocation126_spill] sm:$0xff] }
 0x6b1   :  { %v2015_v26 = vpack.c.bf16 %v2004_v20, %v2004_v20  ;;  %v6117_v20 = vld [vmem:[#allocation128_spill] sm:$0xff] }
 0x6b3   :  { %2048 = vmatprep.mubr.bf16.mxu0 %v2015_v26  ;;  %2089 = vmatprep.mubr.bf16.mxu1 %v2015_v26 }
 0x6b4   :  { %2049 = vmatmul.mubr.bf16.vlgmr.msra.gmra.mrb[40].mxu0 %v4915_v47  ;;  %2090 = vmatmul.mubr.bf16.vlgmr.msra.gmra.mrb[40].mxu1 %v4915_v47 }
 0x6b5   :  { %2099 = vmatpush1.bf16.msra.mxu0 %v5748_v62  ;;  %2140 = vmatpush1.bf16.msra.mxu1 %v5749_v59 }
 0x6b6   :  { %2130 = vmatprep.mubr.bf16.mxu0 %v2015_v26  ;;  %2171 = vmatprep.mubr.bf16.mxu1 %v2015_v26  ;;  %v6118_v26 = vld [vmem:[#allocation129_spill] sm:$0xff] }
 0x6b7   :  { %2100 = vmatprep.subr.bf16.mxu0 %v5750_v13  ;;  %2141 = vmatprep.subr.bf16.mxu1 %v5751_v8 }
 0x6b9   :  { %2101 = vmatpush1.bf16.msra.mxu0 %v5752_v50  ;;  %2142 = vmatpush1.bf16.msra.mxu1 %v5753_v25 }
 0x6ba   :  { %2102 = vmatprep.subr.bf16.mxu0 %v5754_v61  ;;  %2143 = vmatprep.subr.bf16.mxu1 %v5755_v24 }
 0x6bd   :  { %2103 = vmatpush1.bf16.msra.mxu0 %v5834_v12  ;;  %2144 = vmatpush1.bf16.msra.mxu1 %v5835_v45 }
 0x6be   :  { %2104 = vmatprep.subr.bf16.mxu0 %v5836_v5  ;;  %2145 = vmatprep.subr.bf16.mxu1 %v5837_v16 }
 0x6c1   :  { %2105 = vmatpush1.bf16.msra.mxu0 %v5838_v18  ;;  %2146 = vmatpush1.bf16.msra.mxu1 %v5839_v40 }
 0x6c2   :  { %2106 = vmatprep.subr.bf16.mxu0 %v5840_v0  ;;  %2147 = vmatprep.subr.bf16.mxu1 %v5841_v53 }
 0x6c5   :  { %2107 = vmatpush1.bf16.msra.mxu0 %v5842_v17  ;;  %2148 = vmatpush1.bf16.msra.mxu1 %v5843_v7 }
 0x6c6   :  { %2108 = vmatprep.subr.bf16.mxu0 %v5922_v2  ;;  %2149 = vmatprep.subr.bf16.mxu1 %v5923_v63 }
 0x6c9   :  { %2109 = vmatpush1.bf16.msra.mxu0 %v5924_v32  ;;  %2150 = vmatpush1.bf16.msra.mxu1 %v5925_v31 }
 0x6ca   :  { %2110 = vmatprep.subr.bf16.mxu0 %v5926_v49  ;;  %2151 = vmatprep.subr.bf16.mxu1 %v5927_v46 }
 0x6cd   :  { %2111 = vmatpush1.bf16.msra.mxu0 %v5928_v37  ;;  %2152 = vmatpush1.bf16.msra.mxu1 %v5929_v6 }
 0x6ce   :  { %2112 = vmatprep.subr.bf16.mxu0 %v5930_v22  ;;  %2153 = vmatprep.subr.bf16.mxu1 %v5931_v55 }
 0x6d1   :  { %2113 = vmatpush1.bf16.msra.mxu0 %v5932_v11  ;;  %2154 = vmatpush1.bf16.msra.mxu1 %v5933_v15 }
 0x6d2   :  { %2114 = vmatprep.subr.bf16.mxu0 %v5934_v9  ;;  %2155 = vmatprep.subr.bf16.mxu1 %v5857_v51 }
 0x6d5   :  { %2115 = vmatpush1.bf16.msra.mxu0 %v5858_v57  ;;  %2156 = vmatpush1.bf16.msra.mxu1 %v5859_v44 }
 0x6d6   :  { %2116 = vmatprep.subr.bf16.mxu0 %v5860_v43  ;;  %2157 = vmatprep.subr.bf16.mxu1 %v5861_v38 }
 0x6d9   :  { %2117 = vmatpush1.bf16.msra.mxu0 %v5862_v30  ;;  %2158 = vmatpush1.bf16.msra.mxu1 %v5863_v29 }
 0x6da   :  { %2118 = vmatprep.subr.bf16.mxu0 %v5864_v35  ;;  %2159 = vmatprep.subr.bf16.mxu1 %v5865_v36 }
 0x6dd   :  { %2119 = vmatpush1.bf16.msra.mxu0 %v6098_v56  ;;  %2160 = vmatpush1.bf16.msra.mxu1 %v6099_v48 }
 0x6de   :  { %2120 = vmatprep.subr.bf16.mxu0 %v6100_v33  ;;  %2161 = vmatprep.subr.bf16.mxu1 %v6101_v60 }
 0x6e1   :  { %2121 = vmatpush1.bf16.msra.mxu0 %v6102_v58  ;;  %2162 = vmatpush1.bf16.msra.mxu1 %v6103_v34 }
 0x6e2   :  { %2122 = vmatprep.subr.bf16.mxu0 %v6104_v52  ;;  %2163 = vmatprep.subr.bf16.mxu1 %v6105_v23 }
 0x6e5   :  { %2123 = vmatpush1.bf16.msra.mxu0 %v6106_v14  ;;  %2164 = vmatpush1.bf16.msra.mxu1 %v6107_v39 }
 0x6e6   :  { %2124 = vmatprep.subr.bf16.mxu0 %v6108_v3  ;;  %2165 = vmatprep.subr.bf16.mxu1 %v6109_v10  ;;  %v6119_v3 = vld [vmem:[#allocation130_spill] sm:$0xff] }
 0x6e7   :  { %v6120_v10 = vld [vmem:[#allocation2_spill] sm:$0xff] }
 0x6e9   :  { %2125 = vmatpush1.bf16.msra.mxu0 %v6110_v27  ;;  %2166 = vmatpush1.bf16.msra.mxu1 %v6111_v42  ;;  %v6121_v27 = vld [vmem:[#allocation4_spill] sm:$0xff] }
 0x6ea   :  { %2126 = vmatprep.subr.bf16.mxu0 %v6112_v21  ;;  %2167 = vmatprep.subr.bf16.mxu1 %v6113_v54  ;;  %v6122_v54 = vld [vmem:[#allocation3_spill] sm:$0xff]  ;;  %v6131_v21 = vld [vmem:[#allocation13_spill] sm:$0xff] }
 0x6ed   :  { %2127 = vmatpush1.bf16.msra.mxu0 %v6114_v41  ;;  %2168 = vmatpush1.bf16.msra.mxu1 %v6115_v1  ;;  %v6123_v41 = vld [vmem:[#allocation5_spill] sm:$0xff]  ;;  %v6124_v1 = vld [vmem:[#allocation6_spill] sm:$0xff] }
 0x6ee   :  { %2128 = vmatprep.subr.bf16.mxu0 %v6116_v19  ;;  %2169 = vmatprep.subr.bf16.mxu1 %v6117_v20  ;;  %v6125_v19 = vld [vmem:[#allocation7_spill] sm:$0xff]  ;;  %v6126_v20 = vld [vmem:[#allocation8_spill] sm:$0xff] }
 0x6f1   :  { %2129 = vmatpush1.bf16.msra.mxu0 %v6118_v26  ;;  %2170 = vmatpush1.bf16.msra.mxu1 %v6119_v3  ;;  %v6127_v26 = vld [vmem:[#allocation9_spill] sm:$0xff]  ;;  %v6128_v3 = vld [vmem:[#allocation10_spill] sm:$0xff] }
 0x6f2   :  { %2253 = vmatprep.subr.bf16.mxu0 %v6120_v10  ;;  %2294 = vmatprep.subr.bf16.mxu1 %v6121_v27  ;;  %v6129_v10 = vld [vmem:[#allocation11_spill] sm:$0xff]  ;;  %v6130_v27 = vld [vmem:[#allocation12_spill] sm:$0xff] }
 0x6f4   :  { %2131 = vmatmul.mubr.bf16.vlgmr.msra.gmra.mrb[44].mxu0 %v4915_v47  ;;  %2172 = vmatmul.mubr.bf16.vlgmr.msra.gmra.mrb[44].mxu1 %v4915_v47  ;;  %v6132_v47 = vld [vmem:[#allocation14_spill] sm:$0xff] }
 0x6f5   :  { %2254 = vmatpush1.bf16.msra.mxu0 %v6122_v54  ;;  %2295 = vmatpush1.bf16.msra.mxu1 %v6123_v41  ;;  %v6133_v54 = vld [vmem:[#allocation15_spill] sm:$0xff]  ;;  %v6134_v41 = vld [vmem:[#allocation16_spill] sm:$0xff] }
 0x6f6   :  { %2255 = vmatprep.subr.bf16.mxu0 %v6124_v1  ;;  %2296 = vmatprep.subr.bf16.mxu1 %v6125_v19  ;;  %v6135_v1 = vld [vmem:[#allocation17_spill] sm:$0xff]  ;;  %v6136_v19 = vld [vmem:[#allocation18_spill] sm:$0xff] }
 0x6f9   :  { %2256 = vmatpush1.bf16.msra.mxu0 %v6126_v20  ;;  %2297 = vmatpush1.bf16.msra.mxu1 %v6127_v26  ;;  %v6137_v20 = vld [vmem:[#allocation19_spill] sm:$0xff]  ;;  %v6138_v26 = vld [vmem:[#allocation20_spill] sm:$0xff] }
 0x6fa   :  { %2257 = vmatprep.subr.bf16.mxu0 %v6128_v3  ;;  %2298 = vmatprep.subr.bf16.mxu1 %v6129_v10  ;;  %v6139_v3 = vld [vmem:[#allocation21_spill] sm:$0xff]  ;;  %v6140_v10 = vld [vmem:[#allocation22_spill] sm:$0xff] }
 0x6fd   :  { %2258 = vmatpush1.bf16.msra.mxu0 %v6130_v27  ;;  %2299 = vmatpush1.bf16.msra.mxu1 %v6131_v21  ;;  %v6141_v27 = vld [vmem:[#allocation23_spill] sm:$0xff]  ;;  %v6142_v21 = vld [vmem:[#allocation24_spill] sm:$0xff] }
 0x6fe   :  { %2259 = vmatprep.subr.bf16.mxu0 %v6132_v47  ;;  %2300 = vmatprep.subr.bf16.mxu1 %v6133_v54  ;;  %v6143_v47 = vld [vmem:[#allocation25_spill] sm:$0xff]  ;;  %v6144_v54 = vld [vmem:[#allocation26_spill] sm:$0xff] }
 0x701   :  { %2260 = vmatpush1.bf16.msra.mxu0 %v6134_v41  ;;  %2301 = vmatpush1.bf16.msra.mxu1 %v6135_v1  ;;  %v6145_v41 = vld [vmem:[#allocation27_spill] sm:$0xff]  ;;  %v6146_v1 = vld [vmem:[#allocation28_spill] sm:$0xff] }
 0x702   :  { %2261 = vmatprep.subr.bf16.mxu0 %v6136_v19  ;;  %2302 = vmatprep.subr.bf16.mxu1 %v6137_v20  ;;  %v6147_v19 = vld [vmem:[#allocation29_spill] sm:$0xff]  ;;  %v6148_v20 = vld [vmem:[#allocation30_spill] sm:$0xff] }
 0x705   :  { %2262 = vmatpush1.bf16.msra.mxu0 %v6138_v26  ;;  %2303 = vmatpush1.bf16.msra.mxu1 %v6139_v3  ;;  %v6149_v26 = vld [vmem:[#allocation31_spill] sm:$0xff]  ;;  %v6150_v3 = vld [vmem:[#allocation32_spill] sm:$0xff] }
 0x706   :  { %2263 = vmatprep.subr.bf16.mxu0 %v6140_v10  ;;  %2304 = vmatprep.subr.bf16.mxu1 %v6141_v27  ;;  %v6151_v10 = vld [vmem:[#allocation33_spill] sm:$0xff]  ;;  %v6152_v27 = vld [vmem:[#allocation34_spill] sm:$0xff] }
 0x709   :  { %2264 = vmatpush1.bf16.msra.mxu0 %v6142_v21  ;;  %2305 = vmatpush1.bf16.msra.mxu1 %v6143_v47  ;;  %v6153_v21 = vld [vmem:[#allocation35_spill] sm:$0xff]  ;;  %v6154_v47 = vld [vmem:[#allocation36_spill] sm:$0xff] }
 0x70a   :  { %2265 = vmatprep.subr.bf16.mxu0 %v6144_v54  ;;  %2306 = vmatprep.subr.bf16.mxu1 %v6145_v41  ;;  %v6155_v54 = vld [vmem:[#allocation37_spill] sm:$0xff]  ;;  %v6156_v41 = vld [vmem:[#allocation38_spill] sm:$0xff] }
 0x70d   :  { %2266 = vmatpush1.bf16.msra.mxu0 %v6146_v1  ;;  %2307 = vmatpush1.bf16.msra.mxu1 %v6147_v19  ;;  %v6157_v1 = vld [vmem:[#allocation39_spill] sm:$0xff]  ;;  %v6158_v19 = vld [vmem:[#allocation40_spill] sm:$0xff] }
 0x70e   :  { %2267 = vmatprep.subr.bf16.mxu0 %v6148_v20  ;;  %2308 = vmatprep.subr.bf16.mxu1 %v6149_v26  ;;  %v6159_v20 = vld [vmem:[#allocation41_spill] sm:$0xff]  ;;  %v6160_v26 = vld [vmem:[#allocation42_spill] sm:$0xff] }
 0x711   :  { %2268 = vmatpush1.bf16.msra.mxu0 %v6150_v3  ;;  %2309 = vmatpush1.bf16.msra.mxu1 %v6151_v10  ;;  %v6161_v3 = vld [vmem:[#allocation43_spill] sm:$0xff]  ;;  %v6162_v10 = vld [vmem:[#allocation44_spill] sm:$0xff] }
 0x712   :  { %2269 = vmatprep.subr.bf16.mxu0 %v6152_v27  ;;  %2310 = vmatprep.subr.bf16.mxu1 %v6153_v21  ;;  %v6163_v27 = vld [vmem:[#allocation45_spill] sm:$0xff]  ;;  %v6164_v21 = vld [vmem:[#allocation46_spill] sm:$0xff] }
 0x715   :  { %2270 = vmatpush1.bf16.msra.mxu0 %v6154_v47  ;;  %2311 = vmatpush1.bf16.msra.mxu1 %v6155_v54  ;;  %v6165_v47 = vld [vmem:[#allocation47_spill] sm:$0xff]  ;;  %v6166_v54 = vld [vmem:[#allocation48_spill] sm:$0xff] }
 0x716   :  { %2271 = vmatprep.subr.bf16.mxu0 %v6156_v41  ;;  %2312 = vmatprep.subr.bf16.mxu1 %v6157_v1  ;;  %v6167_v41 = vld [vmem:[#allocation49_spill] sm:$0xff]  ;;  %v6168_v1 = vld [vmem:[#allocation50_spill] sm:$0xff] }
 0x719   :  { %2272 = vmatpush1.bf16.msra.mxu0 %v6158_v19  ;;  %2313 = vmatpush1.bf16.msra.mxu1 %v6159_v20  ;;  %v6169_v19 = vld [vmem:[#allocation51_spill] sm:$0xff]  ;;  %v6170_v20 = vld [vmem:[#allocation52_spill] sm:$0xff] }
 0x71a   :  { %2273 = vmatprep.subr.bf16.mxu0 %v6160_v26  ;;  %2314 = vmatprep.subr.bf16.mxu1 %v6161_v3  ;;  %v6171_v26 = vld [vmem:[#allocation53_spill] sm:$0xff]  ;;  %v6172_v3 = vld [vmem:[#allocation54_spill] sm:$0xff] }
 0x71d   :  { %2274 = vmatpush1.bf16.msra.mxu0 %v6162_v10  ;;  %2315 = vmatpush1.bf16.msra.mxu1 %v6163_v27  ;;  %v6173_v10 = vld [vmem:[#allocation55_spill] sm:$0xff]  ;;  %v6174_v27 = vld [vmem:[#allocation56_spill] sm:$0xff] }
 0x71e   :  { %2275 = vmatprep.subr.bf16.mxu0 %v6164_v21  ;;  %2316 = vmatprep.subr.bf16.mxu1 %v6165_v47  ;;  %v6175_v21 = vld [vmem:[#allocation57_spill] sm:$0xff]  ;;  %v6176_v47 = vld [vmem:[#allocation58_spill] sm:$0xff] }
 0x721   :  { %2276 = vmatpush1.bf16.msra.mxu0 %v6166_v54  ;;  %2317 = vmatpush1.bf16.msra.mxu1 %v6167_v41  ;;  %v6177_v54 = vld [vmem:[#allocation59_spill] sm:$0xff]  ;;  %v6178_v41 = vld [vmem:[#allocation60_spill] sm:$0xff] }
 0x722   :  { %2277 = vmatprep.subr.bf16.mxu0 %v6168_v1  ;;  %2318 = vmatprep.subr.bf16.mxu1 %v6169_v19  ;;  %v6179_v1 = vld [vmem:[#allocation62_spill] sm:$0xff]  ;;  %v6180_v19 = vld [vmem:[#allocation63_spill] sm:$0xff] }
 0x725   :  { %2278 = vmatpush1.bf16.msra.mxu0 %v6170_v20  ;;  %2319 = vmatpush1.bf16.msra.mxu1 %v6171_v26  ;;  %v6181_v20 = vld [vmem:[#allocation64_spill] sm:$0xff]  ;;  %v6182_v26 = vld [vmem:[#allocation65_spill] sm:$0xff] }
 0x726   :  { %2279 = vmatprep.subr.bf16.mxu0 %v6172_v3  ;;  %2320 = vmatprep.subr.bf16.mxu1 %v6173_v10  ;;  %v6183_v3 = vld [vmem:[#allocation66_spill] sm:$0xff]  ;;  %v6184_v10 = vld [vmem:[#allocation67_spill] sm:$0xff] }
 0x729   :  { %2280 = vmatpush1.bf16.msra.mxu0 %v6174_v27  ;;  %2321 = vmatpush1.bf16.msra.mxu1 %v6175_v21  ;;  %v6185_v27 = vld [vmem:[#allocation68_spill] sm:$0xff]  ;;  %v2920_v21 = vld [vmem:[%s5318_s0 + $0x180] sm:$0xff] }
 0x72a   :  { %2281 = vmatprep.subr.bf16.mxu0 %v6176_v47  ;;  %2322 = vmatprep.subr.bf16.mxu1 %v6177_v54  ;;  %v2922_v47 = vld [vmem:[%s5318_s0 + $0x190] sm:$0xff]  ;;  %v2921_v54 = vld [vmem:[%s5318_s0 + $0x188] sm:$0xff] }
 0x72d   :  { %2282 = vmatpush1.bf16.msra.mxu0 %v6178_v41  ;;  %2323 = vmatpush1.bf16.msra.mxu1 %v6179_v1 }
 0x72e   :  { %2283 = vmatprep.subr.bf16.mxu0 %v6180_v19  ;;  %2324 = vmatprep.subr.bf16.mxu1 %v6181_v20 }
 0x731   :  { %2284 = vmatpush1.bf16.msra.mxu0 %v6182_v26  ;;  %2325 = vmatpush1.bf16.msra.mxu1 %v6183_v3 }
 0x732   :  { %2335 = vmatprep.subr.bf16.mxu0 %v6184_v10  ;;  %2376 = vmatprep.subr.bf16.mxu1 %v6185_v27 }
 0x787   :  { %v2050_v41 = vpop.f32.mrb[40].mxu0  ;;  %v2091_v1 = vpop.f32.mrb[40].mxu1 }
 0x788   :  { %v2051_v19 = vadd.f32 %v2920_v21, %v2050_v41  ;;  %v2092_v20 = vadd.f32 %v2922_v47, %v2091_v1  ;;  %v2052_v26 = vpop.f32.mrb[41].mxu0  ;;  %v2093_v3 = vpop.f32.mrb[41].mxu1 }
 0x789   :  { %v2053_v10 = vadd.f32 %v2921_v54, %v2052_v26  ;;  %v2054_v27 = vpop.f32.mrb[42].mxu0  ;;  %v2095_v42 = vpop.f32.mrb[42].mxu1 }
 0x78a   :  { %v2928_v39 = vmul.f32 -1.442695, %v2051_v19  ;;  %v2930_v14 = vmul.f32 -1.442695, %v2092_v20  ;;  %v2055_v23 = vpop.f32.mrb[43].mxu0  ;;  %v2096_v52 = vpop.f32.mrb[43].mxu1 }
 0x78b   :  { %v2929_v34 = vmul.f32 -1.442695, %v2053_v10 }
 0x78c   :  { %3243 = vpow2.f32 %v2928_v39 }
 0x78d   :  { %3245 = vpow2.f32 %v2930_v14 }
 0x78e   :  { %3247 = vpow2.f32 %v2929_v34  ;;  %v2924_v34 = vld [vmem:[%s5318_s0 + $0x1a0] sm:$0xff] }
 0x796   :  { %v3244_v58 = vpop.eup %3243 }
 0x797   :  { %v3246_v60 = vpop.eup %3245  ;;  %v2204_v21 = vadd.f32 1.0, %v3244_v58 }
 0x798   :  { %v3248_v33 = vpop.eup %3247  ;;  %v2206_v48 = vadd.f32 1.0, %v3246_v60 }
 0x799   :  { %v2205_v56 = vadd.f32 1.0, %v3248_v33 }
 0x79a   :  { %3249 = vrcp.f32 %v2206_v48  ;;  %v2926_v48 = vld [vmem:[%s5318_s0 + $0x1b0] sm:$0xff] }
 0x79b   :  { %3251 = vrcp.f32 %v2205_v56  ;;  %v2925_v56 = vld [vmem:[%s5318_s0 + $0x1a8] sm:$0xff] }
 0x79c   :  { %3253 = vrcp.f32 %v2204_v21 }
 0x7a4   :  { %v3250_v47 = vpop.eup %3249 }
 0x7a5   :  { %v2228_v27 = vmul.f32 2.0, %v3250_v47  ;;  %v3252_v42 = vpop.eup %3251 }
 0x7a6   :  { %v3254_v41 = vpop.eup %3253  ;;  %v2230_v52 = vmul.f32 %v3252_v42, %v4893_v4 }
 0x7a7   :  { %v2936_v54 = vadd.f32 -1.0, %v2228_v27 }
 0x7a9   :  { %v2231_v23 = vmul.f32 %v3254_v41, %v2936_v54  ;;  %v2923_v54 = vld [vmem:[%s5318_s0 + $0x198] sm:$0xff] }
 0x7aa   :  { %v2927_v41 = vld [vmem:[%s5318_s0 + $0x1b8] sm:$0xff] }
 0x7ab   :  { %v5059_v39 = vadd.f32 %v2231_v23, %v2230_v52  ;;  %v2094_v23 = vadd.f32 %v2923_v54, %v2093_v3 }
 0x7ad   :  { %6186 = vst [vmem:[#allocation61_spill] sm:$0xff] %v5059_v39 }
 0x7c7   :  { %v2132_v33 = vpop.f32.mrb[44].mxu0  ;;  %v2173_v60 = vpop.f32.mrb[44].mxu1 }
 0x7c8   :  { %v2133_v58 = vadd.f32 %v2924_v34, %v2132_v33  ;;  %v2174_v14 = vadd.f32 %v2926_v48, %v2173_v60  ;;  %v2134_v10 = vpop.f32.mrb[45].mxu0  ;;  %v2175_v4 = vpop.f32.mrb[45].mxu1  ;;  %v2931_v34 = vmul.f32 -1.442695, %v2094_v23 }
 0x7c9   :  { %v2135_v1 = vadd.f32 %v2925_v56, %v2134_v10  ;;  %v2136_v19 = vpop.f32.mrb[46].mxu0  ;;  %v2177_v20 = vpop.f32.mrb[46].mxu1  ;;  %v2176_v52 = vadd.f32 %v2927_v41, %v2175_v4 }
 0x7ca   :  { %v2932_v26 = vmul.f32 -1.442695, %v2133_v58  ;;  %v2934_v21 = vmul.f32 -1.442695, %v2174_v14  ;;  %v2137_v47 = vpop.f32.mrb[47].mxu0  ;;  %v2178_v27 = vpop.f32.mrb[47].mxu1 }
 0x7cb   :  { %v2933_v42 = vmul.f32 -1.442695, %v2135_v1  ;;  %v2935_v33 = vmul.f32 -1.442695, %v2176_v52 }
 0x7cc   :  { %3255 = vpow2.f32 %v2932_v26 }
 0x7cd   :  { %3257 = vpow2.f32 %v2934_v21 }
 0x7ce   :  { %3259 = vpow2.f32 %v2933_v42 }
 0x7cf   :  { %3261 = vpow2.f32 %v2931_v34 }
 0x7d6   :  { %v3256_v48 = vpop.eup %3255 }
 0x7d7   :  { %v3258_v56 = vpop.eup %3257  ;;  %v2208_v10 = vadd.f32 1.0, %v3256_v48 }
 0x7d8   :  { %v3260_v60 = vpop.eup %3259  ;;  %v2210_v58 = vadd.f32 1.0, %v3258_v56 }
 0x7d9   :  { %v2209_v14 = vadd.f32 1.0, %v3260_v60  ;;  %v3262_v1 = vpop.eup %3261 }
 0x7da   :  { %3263 = vrcp.f32 %v2210_v58  ;;  %v2207_v3 = vadd.f32 1.0, %v3262_v1  ;;  %v6191_v1 = vld [vmem:[#allocation112_spill] sm:$0xff] }
 0x7db   :  { %3265 = vpow2.f32 %v2935_v33 }
 0x7dc   :  { %3267 = vrcp.f32 %v2209_v14  ;;  %v6189_v14 = vld [vmem:[#allocation110_spill] sm:$0xff] }
 0x7dd   :  { %3269 = vrcp.f32 %v2208_v10  ;;  %v6190_v10 = vld [vmem:[#allocation111_spill] sm:$0xff] }
 0x7de   :  { %3271 = vtanh.f32 %v5059_v39  ;;  %v6210_v39 = vld [vmem:[#allocation67_spill] sm:$0xff] }
 0x7df   :  { %3273 = vrcp.f32 %v2207_v3  ;;  %v6196_v3 = vld [vmem:[#allocation117_spill] sm:$0xff] }
 0x7e4   :  { %v3264_v19 = vpop.eup %3263 }
 0x7e5   :  { %v3266_v20 = vpop.eup %3265  ;;  %v2235_v26 = vmul.f32 2.0, %v3264_v19  ;;  %v6192_v19 = vld [vmem:[#allocation113_spill] sm:$0xff] }
 0x7e6   :  { %v3268_v21 = vpop.eup %3267  ;;  %v2211_v27 = vadd.f32 1.0, %v3266_v20  ;;  %v6193_v20 = vld [vmem:[#allocation114_spill] sm:$0xff] }
 0x7e7   :  { %v2937_v4 = vadd.f32 -1.0, %v2235_v26  ;;  %v3270_v47 = vpop.eup %3269  ;;  %v2237_v54 = vmul.f32 %v3268_v21, %v4912_v28  ;;  %v6188_v28 = vld [vmem:[#allocation109_spill] sm:$0xff]  ;;  %v6194_v26 = vld [vmem:[#allocation115_spill] sm:$0xff]  ;;  %v6195_v21 = vld [vmem:[#allocation116_spill] sm:$0xff] }
 0x7e8   :  { %3275 = vrcp.f32 %v2211_v27  ;;  %v3272_v23 = vpop.eup %3271  ;;  %v6199_v27 = vld [vmem:[#allocation120_spill] sm:$0xff] }
 0x7e9   :  { %v2238_v42 = vmul.f32 %v3270_v47, %v2937_v4  ;;  %v3274_v52 = vpop.eup %3273  ;;  %v6197_v4 = vld [vmem:[#allocation118_spill] sm:$0xff]  ;;  %v6198_v47 = vld [vmem:[#allocation119_spill] sm:$0xff] }
 0x7ea   :  { %v2234_v56 = vmul.f32 %v3274_v52, %v3272_v23  ;;  %v6202_v23 = vld [vmem:[#allocation123_spill] sm:$0xff]  ;;  %v6203_v52 = vld [vmem:[#allocation124_spill] sm:$0xff] }
 0x7eb   :  { %v5078_v41 = vadd.f32 %v2238_v42, %v2237_v54  ;;  %v6200_v42 = vld [vmem:[#allocation121_spill] sm:$0xff]  ;;  %v6201_v54 = vld [vmem:[#allocation122_spill] sm:$0xff] }
 0x7ec   :  { %v5081_v58 = vpack.c.bf16 %v2234_v56, %v2234_v56  ;;  %v6206_v56 = vld [vmem:[#allocation127_spill] sm:$0xff] }
 0x7ed   :  { %6187 = vst [vmem:[#allocation69_spill] sm:$0xff] %v5078_v41  ;;  %3277 = vtanh.f32 %v5078_v41  ;;  %v6209_v41 = vld [vmem:[#allocation130_spill] sm:$0xff] }
 0x7f2   :  { %v3276_v34 = vpop.eup %3275 }
 0x7f7   :  { %v3278_v48 = vpop.eup %3277 }
 0x7f8   :  { %v2241_v33 = vmul.f32 %v3278_v48, %v3276_v34  ;;  %v6204_v34 = vld [vmem:[#allocation125_spill] sm:$0xff]  ;;  %v6205_v48 = vld [vmem:[#allocation126_spill] sm:$0xff] }
 0x7fa   :  { %v2252_v60 = vpack.c.bf16 %v2241_v33, %v2241_v33  ;;  %v6207_v33 = vld [vmem:[#allocation128_spill] sm:$0xff] }
 0x7fc   :  { %2285 = vmatprep.mubr.bf16.mxu0 %v2252_v60  ;;  %2326 = vmatprep.mubr.bf16.mxu1 %v2252_v60 }
 0x7fd   :  { %2286 = vmatmul.mubr.bf16.vlgmr.msra.gmra.mrb[48].mxu0 %v5081_v58  ;;  %2327 = vmatmul.mubr.bf16.vlgmr.msra.gmra.mrb[48].mxu1 %v5081_v58 }
 0x7fe   :  { %2336 = vmatpush1.bf16.msra.mxu0 %v5748_v62  ;;  %2377 = vmatpush1.bf16.msra.mxu1 %v5749_v59 }
 0x7ff   :  { %2367 = vmatprep.mubr.bf16.mxu0 %v2252_v60  ;;  %2408 = vmatprep.mubr.bf16.mxu1 %v2252_v60  ;;  %v6208_v60 = vld [vmem:[#allocation129_spill] sm:$0xff] }
 0x800   :  { %2337 = vmatprep.subr.bf16.mxu0 %v5750_v13  ;;  %2378 = vmatprep.subr.bf16.mxu1 %v5751_v8 }
 0x802   :  { %2338 = vmatpush1.bf16.msra.mxu0 %v5752_v50  ;;  %2379 = vmatpush1.bf16.msra.mxu1 %v5753_v25 }
 0x803   :  { %2339 = vmatprep.subr.bf16.mxu0 %v5754_v61  ;;  %2380 = vmatprep.subr.bf16.mxu1 %v5755_v24 }
 0x806   :  { %2340 = vmatpush1.bf16.msra.mxu0 %v5834_v12  ;;  %2381 = vmatpush1.bf16.msra.mxu1 %v5835_v45 }
 0x807   :  { %2341 = vmatprep.subr.bf16.mxu0 %v5836_v5  ;;  %2382 = vmatprep.subr.bf16.mxu1 %v5837_v16 }
 0x80a   :  { %2342 = vmatpush1.bf16.msra.mxu0 %v5838_v18  ;;  %2383 = vmatpush1.bf16.msra.mxu1 %v5839_v40 }
 0x80b   :  { %2343 = vmatprep.subr.bf16.mxu0 %v5840_v0  ;;  %2384 = vmatprep.subr.bf16.mxu1 %v5841_v53 }
 0x80e   :  { %2344 = vmatpush1.bf16.msra.mxu0 %v5842_v17  ;;  %2385 = vmatpush1.bf16.msra.mxu1 %v5843_v7 }
 0x80f   :  { %2345 = vmatprep.subr.bf16.mxu0 %v5922_v2  ;;  %2386 = vmatprep.subr.bf16.mxu1 %v5923_v63 }
 0x812   :  { %2346 = vmatpush1.bf16.msra.mxu0 %v5924_v32  ;;  %2387 = vmatpush1.bf16.msra.mxu1 %v5925_v31 }
 0x813   :  { %2347 = vmatprep.subr.bf16.mxu0 %v5926_v49  ;;  %2388 = vmatprep.subr.bf16.mxu1 %v5927_v46 }
 0x816   :  { %2348 = vmatpush1.bf16.msra.mxu0 %v5928_v37  ;;  %2389 = vmatpush1.bf16.msra.mxu1 %v5929_v6 }
 0x817   :  { %2349 = vmatprep.subr.bf16.mxu0 %v5930_v22  ;;  %2390 = vmatprep.subr.bf16.mxu1 %v5931_v55 }
 0x81a   :  { %2350 = vmatpush1.bf16.msra.mxu0 %v5932_v11  ;;  %2391 = vmatpush1.bf16.msra.mxu1 %v5933_v15 }
 0x81b   :  { %2351 = vmatprep.subr.bf16.mxu0 %v5934_v9  ;;  %2392 = vmatprep.subr.bf16.mxu1 %v5857_v51 }
 0x81e   :  { %2352 = vmatpush1.bf16.msra.mxu0 %v5858_v57  ;;  %2393 = vmatpush1.bf16.msra.mxu1 %v5859_v44 }
 0x81f   :  { %2353 = vmatprep.subr.bf16.mxu0 %v5860_v43  ;;  %2394 = vmatprep.subr.bf16.mxu1 %v5861_v38 }
 0x822   :  { %2354 = vmatpush1.bf16.msra.mxu0 %v5862_v30  ;;  %2395 = vmatpush1.bf16.msra.mxu1 %v5863_v29 }
 0x823   :  { %2355 = vmatprep.subr.bf16.mxu0 %v5864_v35  ;;  %2396 = vmatprep.subr.bf16.mxu1 %v5865_v36 }
 0x826   :  { %2356 = vmatpush1.bf16.msra.mxu0 %v6188_v28  ;;  %2397 = vmatpush1.bf16.msra.mxu1 %v6189_v14 }
 0x827   :  { %2357 = vmatprep.subr.bf16.mxu0 %v6190_v10  ;;  %2398 = vmatprep.subr.bf16.mxu1 %v6191_v1 }
 0x82a   :  { %2358 = vmatpush1.bf16.msra.mxu0 %v6192_v19  ;;  %2399 = vmatpush1.bf16.msra.mxu1 %v6193_v20 }
 0x82b   :  { %2359 = vmatprep.subr.bf16.mxu0 %v6194_v26  ;;  %2400 = vmatprep.subr.bf16.mxu1 %v6195_v21 }
 0x82e   :  { %2360 = vmatpush1.bf16.msra.mxu0 %v6196_v3  ;;  %2401 = vmatpush1.bf16.msra.mxu1 %v6197_v4 }
 0x82f   :  { %2361 = vmatprep.subr.bf16.mxu0 %v6198_v47  ;;  %2402 = vmatprep.subr.bf16.mxu1 %v6199_v27 }
 0x832   :  { %2362 = vmatpush1.bf16.msra.mxu0 %v6200_v42  ;;  %2403 = vmatpush1.bf16.msra.mxu1 %v6201_v54  ;;  %v6211_v42 = vld [vmem:[#allocation68_spill] sm:$0xff] }
 0x833   :  { %2363 = vmatprep.subr.bf16.mxu0 %v6202_v23  ;;  %2404 = vmatprep.subr.bf16.mxu1 %v6203_v52 }
 0x836   :  { %2364 = vmatpush1.bf16.msra.mxu0 %v6204_v34  ;;  %2405 = vmatpush1.bf16.msra.mxu1 %v6205_v48 }
 0x837   :  { %2365 = vmatprep.subr.bf16.mxu0 %v6206_v56  ;;  %2406 = vmatprep.subr.bf16.mxu1 %v6207_v33 }
 0x83a   :  { %2366 = vmatpush1.bf16.msra.mxu0 %v6208_v60  ;;  %2407 = vmatpush1.bf16.msra.mxu1 %v6209_v41 }
 0x83b   :  { %2486 = vmatprep.subr.bf16.mxu0 %v6210_v39  ;;  %2527 = vmatprep.subr.bf16.mxu1 %v6211_v42 }
 0x83d   :  { %2368 = vmatmul.mubr.bf16.vlgmr.msra.gmra.mrb[52].mxu0 %v5081_v58  ;;  %2409 = vmatmul.mubr.bf16.vlgmr.msra.gmra.mrb[52].mxu1 %v5081_v58  ;;  %v2942_v58 = vld [vmem:[%s5318_s0 + $0x1e0] sm:$0xff] }
 0x83e   :  { %2487 = vmatpush1.bf16.msra.mxu0 %v5748_v62  ;;  %2528 = vmatpush1.bf16.msra.mxu1 %v5749_v59  ;;  %v6212_v62 = vld [vmem:[#allocation121_spill] sm:$0xff]  ;;  %v6213_v59 = vmov 0.0|0.0  }
 0x83f   :  { %2488 = vmatprep.subr.bf16.mxu0 %v5750_v13  ;;  %2529 = vmatprep.subr.bf16.mxu1 %v5751_v8  ;;  %v2938_v13 = vld [vmem:[%s5318_s0 + $0x1c0] sm:$0xff]  ;;  %v2940_v8 = vld [vmem:[%s5318_s0 + $0x1d0] sm:$0xff] }
 0x842   :  { %2489 = vmatpush1.bf16.msra.mxu0 %v5752_v50  ;;  %2530 = vmatpush1.bf16.msra.mxu1 %v5753_v25  ;;  %v2939_v50 = vld [vmem:[%s5318_s0 + $0x1c8] sm:$0xff] }
 0x843   :  { %2490 = vmatprep.subr.bf16.mxu0 %v5754_v61  ;;  %2531 = vmatprep.subr.bf16.mxu1 %v5755_v24 }
 0x846   :  { %2491 = vmatpush1.bf16.msra.mxu0 %v5834_v12  ;;  %2532 = vmatpush1.bf16.msra.mxu1 %v5835_v45 }
 0x847   :  { %2492 = vmatprep.subr.bf16.mxu0 %v5836_v5  ;;  %2533 = vmatprep.subr.bf16.mxu1 %v5837_v16 }
 0x84a   :  { %2493 = vmatpush1.bf16.msra.mxu0 %v5838_v18  ;;  %2534 = vmatpush1.bf16.msra.mxu1 %v5839_v40 }
 0x84b   :  { %2494 = vmatprep.subr.bf16.mxu0 %v5840_v0  ;;  %2535 = vmatprep.subr.bf16.mxu1 %v5841_v53 }
 0x84e   :  { %2495 = vmatpush1.bf16.msra.mxu0 %v5842_v17  ;;  %2536 = vmatpush1.bf16.msra.mxu1 %v5843_v7 }
 0x84f   :  { %2496 = vmatprep.subr.bf16.mxu0 %v5922_v2  ;;  %2537 = vmatprep.subr.bf16.mxu1 %v5923_v63 }
 0x852   :  { %2497 = vmatpush1.bf16.msra.mxu0 %v5924_v32  ;;  %2538 = vmatpush1.bf16.msra.mxu1 %v5925_v31 }
 0x853   :  { %2498 = vmatprep.subr.bf16.mxu0 %v5926_v49  ;;  %2539 = vmatprep.subr.bf16.mxu1 %v5927_v46 }
 0x856   :  { %2499 = vmatpush1.bf16.msra.mxu0 %v5928_v37  ;;  %2540 = vmatpush1.bf16.msra.mxu1 %v5929_v6 }
 0x857   :  { %2500 = vmatprep.subr.bf16.mxu0 %v5930_v22  ;;  %2541 = vmatprep.subr.bf16.mxu1 %v5931_v55  ;;  %v6214_v55 = vld [vmem:[#allocation61_spill] sm:$0xff] }
 0x85a   :  { %2501 = vmatpush1.bf16.msra.mxu0 %v5932_v11  ;;  %2542 = vmatpush1.bf16.msra.mxu1 %v5933_v15 }
 0x85b   :  { %2502 = vmatprep.subr.bf16.mxu0 %v5934_v9  ;;  %2543 = vmatprep.subr.bf16.mxu1 %v5857_v51 }
 0x85e   :  { %2503 = vmatpush1.bf16.msra.mxu0 %v5858_v57  ;;  %2544 = vmatpush1.bf16.msra.mxu1 %v5859_v44  ;;  %v2941_v57 = vld [vmem:[%s5318_s0 + $0x1d8] sm:$0xff] }
 0x85f   :  { %2504 = vmatprep.subr.bf16.mxu0 %v5860_v43  ;;  %2545 = vmatprep.subr.bf16.mxu1 %v5861_v38 }
 0x862   :  { %2505 = vmatpush1.bf16.msra.mxu0 %v5862_v30  ;;  %2546 = vmatpush1.bf16.msra.mxu1 %v5863_v29 }
 0x863   :  { %2506 = vmatprep.subr.bf16.mxu0 %v5864_v35  ;;  %2547 = vmatprep.subr.bf16.mxu1 %v5865_v36 }
 0x866   :  { %2507 = vmatpush1.bf16.msra.mxu0 %v6188_v28  ;;  %2548 = vmatpush1.bf16.msra.mxu1 %v6189_v14  ;;  %v2944_v28 = vld [vmem:[%s5318_s0 + $0x1f0] sm:$0xff]  ;;  %v2943_v14 = vld [vmem:[%s5318_s0 + $0x1e8] sm:$0xff] }
 0x867   :  { %2508 = vmatprep.subr.bf16.mxu0 %v6190_v10  ;;  %2549 = vmatprep.subr.bf16.mxu1 %v6191_v1 }
 0x86a   :  { %2509 = vmatpush1.bf16.msra.mxu0 %v6192_v19  ;;  %2550 = vmatpush1.bf16.msra.mxu1 %v6193_v20 }
 0x86b   :  { %2510 = vmatprep.subr.bf16.mxu0 %v6194_v26  ;;  %2551 = vmatprep.subr.bf16.mxu1 %v6195_v21 }
 0x86e   :  { %2511 = vmatpush1.bf16.msra.mxu0 %v6196_v3  ;;  %2552 = vmatpush1.bf16.msra.mxu1 %v6197_v4 }
 0x86f   :  { %2512 = vmatprep.subr.bf16.mxu0 %v6198_v47  ;;  %2553 = vmatprep.subr.bf16.mxu1 %v6199_v27 }
 0x872   :  { %2513 = vmatpush1.bf16.msra.mxu0 %v6212_v62  ;;  %2554 = vmatpush1.bf16.msra.mxu1 %v6201_v54 }
 0x873   :  { %2514 = vmatprep.subr.bf16.mxu0 %v6202_v23  ;;  %2555 = vmatprep.subr.bf16.mxu1 %v6203_v52 }
 0x876   :  { %2515 = vmatpush1.bf16.msra.mxu0 %v6204_v34  ;;  %2556 = vmatpush1.bf16.msra.mxu1 %v6205_v48  ;;  %v2945_v34 = vld [vmem:[%s5318_s0 + $0x1f8] sm:$0xff] }
 0x877   :  { %2516 = vmatprep.subr.bf16.mxu0 %v6206_v56  ;;  %2557 = vmatprep.subr.bf16.mxu1 %v6207_v33 }
 0x87a   :  { %2517 = vmatpush1.bf16.msra.mxu0 %v6208_v60  ;;  %2558 = vmatpush1.bf16.msra.mxu1 %v6209_v41 }
 0x87b   :  { %3018 = vmatprep.subr.bf16.mxu0 %v6213_v59 }
 0x8d0   :  { %v2287_v25 = vpop.f32.mrb[48].mxu0  ;;  %v2328_v61 = vpop.f32.mrb[48].mxu1 }
 0x8d1   :  { %v2288_v24 = vadd.f32 %v2938_v13, %v2287_v25  ;;  %v2329_v12 = vadd.f32 %v2940_v8, %v2328_v61  ;;  %v2289_v45 = vpop.f32.mrb[49].mxu0  ;;  %v2330_v5 = vpop.f32.mrb[49].mxu1 }
 0x8d2   :  { %v2290_v16 = vadd.f32 %v2939_v50, %v2289_v45  ;;  %v2291_v18 = vpop.f32.mrb[50].mxu0  ;;  %v2332_v40 = vpop.f32.mrb[50].mxu1  ;;  %v2331_v44 = vadd.f32 %v2941_v57, %v2330_v5 }
 0x8d3   :  { %v2946_v0 = vmul.f32 -1.442695, %v2288_v24  ;;  %v2948_v53 = vmul.f32 -1.442695, %v2329_v12  ;;  %v2292_v17 = vpop.f32.mrb[51].mxu0  ;;  %v2333_v7 = vpop.f32.mrb[51].mxu1 }
 0x8d4   :  { %v2947_v51 = vmul.f32 -1.442695, %v2290_v16  ;;  %v2949_v30 = vmul.f32 -1.442695, %v2331_v44  ;;  %v6215_v40 = vld [vmem:[#allocation69_spill] sm:$0xff] }
 0x8d5   :  { %3279 = vpow2.f32 %v2946_v0 }
 0x8d6   :  { %3281 = vpow2.f32 %v2948_v53 }
 0x8d7   :  { %3283 = vpow2.f32 %v2947_v51 }
 0x8df   :  { %v3280_v43 = vpop.eup %3279 }
 0x8e0   :  { %v3282_v38 = vpop.eup %3281  ;;  %v2441_v2 = vadd.f32 1.0, %v3280_v43  ;;  %v2599_v43 = vld [vmem:[%s5319_s2] sm:$0xff] }
 0x8e1   :  { %v3284_v29 = vpop.eup %3283  ;;  %v2443_v35 = vadd.f32 1.0, %v3282_v38  ;;  %v2600_v38 = vld [vmem:[%s5319_s2 + $0x8] sm:$0xff] }
 0x8e2   :  { %v2442_v36 = vadd.f32 1.0, %v3284_v29  ;;  %v2601_v29 = vld [vmem:[%s5319_s2 + $0x10] sm:$0xff] }
 0x8e3   :  { %3285 = vrcp.f32 %v2443_v35  ;;  %v2602_v35 = vld [vmem:[%s5319_s2 + $0x18] sm:$0xff] }
 0x8e4   :  { %3287 = vpow2.f32 %v2949_v30  ;;  %v3019_v30 = vpack.c.bf16 %v2600_v38, %v2599_v43  ;;  %v2965_v38 = vld [vmem:[%s5320_s3] ss:$0 sm:$0xff] }
 0x8e5   :  { %3289 = vrcp.f32 %v2442_v36  ;;  %v3022_v36 = vpack.c.bf16 %v2602_v35, %v2601_v29 }
 0x8e6   :  { %3291 = vrcp.f32 %v2441_v2  ;;  %v2603_v2 = vld [vmem:[%s5319_s2 + $0x20] sm:$0xff] }
 0x8ed   :  { %v3286_v63 = vpop.eup %3285 }
 0x8ee   :  { %v3288_v32 = vpop.eup %3287  ;;  %v2465_v31 = vmul.f32 2.0, %v3286_v63  ;;  %v2604_v63 = vld [vmem:[%s5319_s2 + $0x28] sm:$0xff] }
 0x8ef   :  { %v3290_v49 = vpop.eup %3289  ;;  %v2444_v6 = vadd.f32 1.0, %v3288_v32  ;;  %v3025_v32 = vpack.c.bf16 %v2604_v63, %v2603_v2 }
 0x8f0   :  { %v2954_v46 = vadd.f32 -1.0, %v2465_v31  ;;  %v3292_v37 = vpop.eup %3291  ;;  %v2467_v11 = vmul.f32 %v3290_v49, %v6214_v55  ;;  %v2605_v31 = vld [vmem:[%s5319_s2 + $0x30] sm:$0xff]  ;;  %v2606_v49 = vld [vmem:[%s5319_s2 + $0x38] sm:$0xff] }
 0x8f1   :  { %3293 = vrcp.f32 %v2444_v6  ;;  %v2608_v6 = vld [vmem:[%s5319_s2 + $0x48] sm:$0xff]  ;;  %v2609_v55 = vld [vmem:[%s5319_s2 + $0x50] sm:$0xff] }
 0x8f2   :  { %v2468_v22 = vmul.f32 %v3292_v37, %v2954_v46  ;;  %v3028_v46 = vpack.c.bf16 %v2606_v49, %v2605_v31  ;;  %v2607_v37 = vld [vmem:[%s5319_s2 + $0x40] sm:$0xff] }
 0x8f4   :  { %v2469_v15 = vadd.f32 %v2468_v22, %v2467_v11  ;;  %v3031_v22 = vpack.c.bf16 %v2608_v6, %v2607_v37  ;;  %v2610_v11 = vld [vmem:[%s5319_s2 + $0x58] sm:$0xff] }
 0x8f6   :  { %3295 = vtanh.f32 %v2469_v15  ;;  %v2611_v15 = vld [vmem:[%s5319_s2 + $0x60] sm:$0xff] }
 0x8fb   :  { %v3294_v9 = vpop.eup %3293 }
 0x900   :  { %v3296_v39 = vpop.eup %3295 }
 0x901   :  { %v2471_v41 = vmul.f32 %v3296_v39, %v3294_v9  ;;  %v3034_v9 = vpack.c.bf16 %v2610_v11, %v2609_v55  ;;  %v2612_v39 = vld [vmem:[%s5319_s2 + $0x68] sm:$0xff] }
 0x903   :  { %v2484_v44 = vpack.c.bf16 %v2471_v41, %v2471_v41  ;;  %v3335_v41 = vmov 0.0  }
 0x910   :  { %v2369_v10 = vpop.f32.mrb[52].mxu0  ;;  %v2410_v1 = vpop.f32.mrb[52].mxu1 }
 0x911   :  { %v2370_v19 = vadd.f32 %v2942_v58, %v2369_v10  ;;  %v2411_v20 = vadd.f32 %v2944_v28, %v2410_v1  ;;  %v2371_v26 = vpop.f32.mrb[53].mxu0  ;;  %v2412_v21 = vpop.f32.mrb[53].mxu1  ;;  %v3037_v58 = vpack.c.bf16 %v2612_v39, %v2611_v15  ;;  %v2613_v28 = vld [vmem:[%s5319_s2 + $0x70] sm:$0xff]  ;;  %v2956_v1 = vld [vmem:[%s5318_s0 + $0x220] sm:$0xff] }
 0x912   :  { %v2372_v3 = vadd.f32 %v2943_v14, %v2371_v26  ;;  %v2373_v4 = vpop.f32.mrb[54].mxu0  ;;  %v2414_v47 = vpop.f32.mrb[54].mxu1  ;;  %v2413_v48 = vadd.f32 %v2945_v34, %v2412_v21  ;;  %v2614_v14 = vld [vmem:[%s5319_s2 + $0x78] sm:$0xff] }
 0x913   :  { %v2950_v27 = vmul.f32 -1.442695, %v2370_v19  ;;  %v2952_v42 = vmul.f32 -1.442695, %v2411_v20  ;;  %v2374_v54 = vpop.f32.mrb[55].mxu0  ;;  %v2415_v23 = vpop.f32.mrb[55].mxu1  ;;  %v3040_v10 = vpack.c.bf16 %v2614_v14, %v2613_v28 }
 0x914   :  { %v2951_v52 = vmul.f32 -1.442695, %v2372_v3  ;;  %v2953_v60 = vmul.f32 -1.442695, %v2413_v48  ;;  %v2958_v19 = vld [vmem:[%s5318_s0 + $0x230] sm:$0xff]  ;;  %v2957_v20 = vld [vmem:[%s5318_s0 + $0x228] sm:$0xff] }
 0x915   :  { %3297 = vpow2.f32 %v2950_v27 }
 0x916   :  { %3299 = vpow2.f32 %v2952_v42 }
 0x917   :  { %3301 = vpow2.f32 %v2951_v52 }
 0x91f   :  { %v3298_v56 = vpop.eup %3297 }
 0x920   :  { %v3300_v33 = vpop.eup %3299  ;;  %v2445_v50 = vadd.f32 1.0, %v3298_v56 }
 0x921   :  { %v3302_v62 = vpop.eup %3301  ;;  %v2447_v13 = vadd.f32 1.0, %v3300_v33  ;;  %v2959_v33 = vld [vmem:[%s5318_s0 + $0x238] sm:$0xff] }
 0x922   :  { %v2446_v8 = vadd.f32 1.0, %v3302_v62 }
 0x923   :  { %3303 = vrcp.f32 %v2447_v13 }
 0x924   :  { %3305 = vpow2.f32 %v2953_v60 }
 0x925   :  { %3307 = vrcp.f32 %v2446_v8 }
 0x926   :  { %3309 = vrcp.f32 %v2445_v50 }
 0x92d   :  { %v3304_v25 = vpop.eup %3303 }
 0x92e   :  { %v3306_v61 = vpop.eup %3305  ;;  %v2472_v24 = vmul.f32 2.0, %v3304_v25 }
 0x92f   :  { %v3308_v12 = vpop.eup %3307  ;;  %v2448_v16 = vadd.f32 1.0, %v3306_v61 }
 0x930   :  { %v2955_v45 = vadd.f32 -1.0, %v2472_v24  ;;  %v3310_v5 = vpop.eup %3309  ;;  %v2474_v0 = vmul.f32 %v3308_v12, %v6215_v40 }
 0x931   :  { %3311 = vrcp.f32 %v2448_v16 }
 0x932   :  { %v2475_v18 = vmul.f32 %v3310_v5, %v2955_v45 }
 0x934   :  { %v5240_v53 = vadd.f32 %v2475_v18, %v2474_v0 }
 0x936   :  { %3313 = vtanh.f32 %v5240_v53 }
 0x93b   :  { %v3312_v17 = vpop.eup %3311 }
 0x940   :  { %v3314_v7 = vpop.eup %3313 }
 0x941   :  { %v2478_v51 = vmul.f32 %v3314_v7, %v3312_v17 }
 0x943   :  { %v2485_v57 = vpack.c.bf16 %v2478_v51, %v2478_v51 }
 0x945   :  { %2518 = vmatprep.mubr.bf16.mxu0 %v2485_v57  ;;  %2559 = vmatprep.mubr.bf16.mxu1 %v2485_v57 }
 0x946   :  { %2519 = vmatmul.mubr.bf16.vlgmr.msra.gmra.mrb[56].mxu0 %v2484_v44  ;;  %2560 = vmatmul.mubr.bf16.vlgmr.msra.gmra.mrb[56].mxu1 %v2484_v44 }
 0x947   :  { %3020 = vmatpush3.bf16.msra.mxu0 %v3019_v30  ;;  %3015 = vmatprep.mubr.msk.f32.mxu0 %vm3334_vm0, %v3335_v41 }
 0x948   :  { %3021 = vmatprep.subr.bf16.mxu0 %v6213_v59 }
 0x94b   :  { %3023 = vmatpush3.bf16.msra.mxu0 %v3022_v36 }
 0x94c   :  { %3024 = vmatprep.subr.bf16.mxu0 %v6213_v59 }
 0x94f   :  { %3026 = vmatpush3.bf16.msra.mxu0 %v3025_v32 }
 0x950   :  { %3027 = vmatprep.subr.bf16.mxu0 %v6213_v59 }
 0x953   :  { %3029 = vmatpush3.bf16.msra.mxu0 %v3028_v46 }
 0x954   :  { %3030 = vmatprep.subr.bf16.mxu0 %v6213_v59 }
 0x957   :  { %3032 = vmatpush3.bf16.msra.mxu0 %v3031_v22 }
 0x958   :  { %3033 = vmatprep.subr.bf16.mxu0 %v6213_v59 }
 0x95b   :  { %3035 = vmatpush3.bf16.msra.mxu0 %v3034_v9 }
 0x95c   :  { %3036 = vmatprep.subr.bf16.mxu0 %v6213_v59 }
 0x95f   :  { %3038 = vmatpush3.bf16.msra.mxu0 %v3037_v58 }
 0x960   :  { %3039 = vmatprep.subr.bf16.mxu0 %v6213_v59 }
 0x963   :  { %3041 = vmatpush3.bf16.msra.mxu0 %v3040_v10 }
 0xa19   :  { %v2520_v26 = vpop.f32.mrb[56].mxu0  ;;  %v2561_v21 = vpop.f32.mrb[56].mxu1 }
 0xa1a   :  { %v2521_v3 = vadd.f32 %v2956_v1, %v2520_v26  ;;  %v2562_v4 = vadd.f32 %v2958_v19, %v2561_v21  ;;  %v2522_v47 = vpop.f32.mrb[57].mxu0  ;;  %v2563_v27 = vpop.f32.mrb[57].mxu1 }
 0xa1b   :  { %v2523_v59 = vadd.f32 %v2957_v20, %v2522_v47  ;;  %v2524_v42 = vpop.f32.mrb[58].mxu0  ;;  %v2565_v54 = vpop.f32.mrb[58].mxu1  ;;  %v2564_v60 = vadd.f32 %v2959_v33, %v2563_v27 }
 0xa1c   :  { %v2960_v23 = vmul.f32 -1.442695, %v2521_v3  ;;  %v2962_v52 = vmul.f32 -1.442695, %v2562_v4  ;;  %v2525_v34 = vpop.f32.mrb[59].mxu0  ;;  %v2566_v48 = vpop.f32.mrb[59].mxu1 }
 0xa1d   :  { %v2961_v56 = vmul.f32 -1.442695, %v2523_v59  ;;  %v2963_v8 = vmul.f32 -1.442695, %v2564_v60 }
 0xa1e   :  { %3315 = vpow2.f32 %v2960_v23 }
 0xa1f   :  { %3317 = vpow2.f32 %v2962_v52 }
 0xa20   :  { %3319 = vpow2.f32 %v2961_v56 }
 0xa28   :  { %v3316_v62 = vpop.eup %3315 }
 0xa29   :  { %v3318_v13 = vpop.eup %3317  ;;  %v2580_v24 = vadd.f32 1.0, %v3316_v62 }
 0xa2a   :  { %v3320_v50 = vpop.eup %3319  ;;  %v2582_v25 = vadd.f32 1.0, %v3318_v13 }
 0xa2b   :  { %v2581_v61 = vadd.f32 1.0, %v3320_v50 }
 0xa2c   :  { %3321 = vrcp.f32 %v2582_v25 }
 0xa2d   :  { %3323 = vpow2.f32 %v2963_v8 }
 0xa2e   :  { %3325 = vrcp.f32 %v2581_v61 }
 0xa2f   :  { %3327 = vrcp.f32 %v2580_v24 }
 0xa36   :  { %v3322_v12 = vpop.eup %3321 }
 0xa37   :  { %v3324_v45 = vpop.eup %3323  ;;  %v2592_v5 = vmul.f32 2.0, %v3322_v12 }
 0xa38   :  { %v3326_v16 = vpop.eup %3325  ;;  %v2583_v0 = vadd.f32 1.0, %v3324_v45 }
 0xa39   :  { %v2964_v18 = vadd.f32 -1.0, %v2592_v5  ;;  %v3328_v40 = vpop.eup %3327  ;;  %v2594_v7 = vmul.f32 %v3326_v16, %v5240_v53 }
 0xa3a   :  { %3329 = vrcp.f32 %v2583_v0 }
 0xa3b   :  { %v2595_v17 = vmul.f32 %v3328_v40, %v2964_v18 }
 0xa3d   :  { %v2596_v51 = vadd.f32 %v2595_v17, %v2594_v7 }
 0xa3f   :  { %3331 = vtanh.f32 %v2596_v51 }
 0xa44   :  { %v3330_v57 = vpop.eup %3329 }
 0xa49   :  { %v3332_v44 = vpop.eup %3331 }
 0xa4a   :  { %v2598_v43 = vmul.f32 %v3332_v44, %v3330_v57 }
 0xa4c   :  { %3016 = vmatmul.mubr.f32.vlgmr.msra.gmra.mrb[60].mxu0 %v2598_v43 }
 0xb1f   :  { %v2688_v30 = vpop.f32.mrb[60].mxu0 }
 0xb20   :  { %v2689_v29 = vadd.f32 %v2965_v38, %v2688_v30  ;;  %v3017_v35 = vpop.f32.mrb[61].mxu0 }
 0xb22   :  { %2692 = vst [vmem:[%s5321_s4] sm:$0xff] %v2689_v29 }

</bundles_post_ra>
